<compile_context>
chip_gen: v5e
topology: v5e:2x2
jax: 0.10.0
libtpu: 0.0.40
codegen_flags: <defaults>
</compile_context>

<pallas_src>
import functools
import math

import numpy as np
import jax
import jax.numpy as jnp
from jax.experimental import pallas as pl
from jax.experimental.pallas import tpu as pltpu

LEAKY_SLOPE = 0.01   # F.leaky_relu default negative_slope
LN_EPS = 1e-5        # nn.LayerNorm default eps
NEG_INF = -1e30


# ----------------------------------------------------------------------------
# Fused kernel
# ----------------------------------------------------------------------------
def _fused_kernel(x_ref, m1_ref, fmask_ref, pe_ref, bidc_ref, bidr_ref,
                  c1w_ref, c1b_ref, c2w_ref, c2b_ref, cw_ref, cb_ref,
                  wqkv_ref, bqkv_ref, wo_ref, bo_ref,
                  w1_ref, b1_ref, w2_ref, b2_ref,
                  ln1w_ref, ln1b_ref, ln2w_ref, ln2b_ref,
                  out_ref,
                  buf1_ref, buf2_ref,
                  *, B, SEG, S_pad, nhead, n_conv_layers):
    R = B * SEG                    # flat CNN rows (segment-padded, mult of 8)
    N = B * S_pad                  # flat transformer rows (mult of 8)
    D = cw_ref.shape[1]            # d_model
    nlayers = wqkv_ref.shape[0]
    hd = D // nhead
    scale = math.sqrt(D)
    inv_sqrt_hd = 1.0 / math.sqrt(hd)

    # Zero the scratch buffers once: provides the zero rows conv2's padding
    # relies on and removes any uninitialised-VMEM hazard in the pad rows.
    buf1_ref[...] = jnp.zeros(buf1_ref.shape, jnp.float32)
    buf2_ref[...] = jnp.zeros(buf2_ref.shape, jnp.float32)

    def lrelu(v):
        return jnp.where(v > 0, v, LEAKY_SLOPE * v)

    def conv3(taps, w_ref_, b_ref_):
        # taps: 3 shifted (rows, Cin) f32 views -> one im2col MXU matmul.
        cols = jnp.concatenate(taps, axis=1).astype(jnp.bfloat16)
        acc = jnp.dot(cols, w_ref_[...], preferred_element_type=jnp.float32)
        return lrelu(acc + b_ref_[...])

    # ---- conv1 (k=3, valid) for the whole batch: one matmul ----------------
    z1 = conv3([x_ref[pl.ds(k, R), :] for k in range(3)], c1w_ref, c1b_ref)
    # zero the per-segment pad rows (they provide conv2's zero padding)
    z1 = jnp.where(m1_ref[...] > 0, z1, 0.0)

    # ---- conv2 (k=3, padding=1): one batched offset-1 store turns taps
    #      (-1, 0, +1) into plain offset reads (0, 1, 2); rows 0 / >= R+1
    #      are zero from the buffer init ------------------------------------
    buf1_ref[1:1 + R, :] = z1
    y = conv3([buf1_ref[pl.ds(k, R), :] for k in range(3)], c2w_ref, c2b_ref)

    # ---- n_conv_layers x [conv (k=3, valid) + leaky_relu + maxpool(k=2)] ---
    Ri = R
    for _ in range(n_conv_layers):
        buf2_ref[0:Ri, :] = y
        z = conv3([buf2_ref[pl.ds(k, Ri), :] for k in range(3)], cw_ref, cb_ref)
        buf2_ref[0:Ri, :] = z
        Rh = Ri // 2
        # maxpool(k=2): strided even/odd reads + VPU max (no selection matmuls)
        y = jnp.maximum(buf2_ref[pl.ds(0, Rh, stride=2), :],
                        buf2_ref[pl.ds(1, Rh, stride=2), :])
        Ri = Rh
    # y: (N, D); features of batch b live at rows [b*S_pad, b*S_pad + Lf)

    # ---- class token prepend + *sqrt(d_model) + positional encoding --------
    # Shift features down one row (class token takes position 0 of every
    # segment).  pe_ref already holds class_token*sqrt(D) + PE[0] at row 0 of
    # each segment and PE[t] elsewhere (reference order: cat -> *sqrt(d) -> +PE).
    buf2_ref[0:1, :] = jnp.zeros((1, D), jnp.float32)
    buf2_ref[1:N + 1, :] = y
    feat = buf2_ref[0:N, :]
    h = jnp.where(fmask_ref[...] > 0, feat * scale, 0.0) + pe_ref[...]

    # ---- transformer encoder (post-norm) on the flat (N, D) activation -----
    # Block-diagonal additive mask built in-kernel from two tiny id vectors
    # (pad positions have id -1, so they are never attended as keys).
    amask = jnp.where(bidc_ref[...] == bidr_ref[...], 0.0, NEG_INF)

    for l in range(nlayers):            # nlayers small -> static unroll is fine
        h_bf = h.astype(jnp.bfloat16)
        qkv = jnp.dot(h_bf, wqkv_ref[l],
                      preferred_element_type=jnp.float32) + bqkv_ref[l]
        qkv_bf = qkv.astype(jnp.bfloat16)          # cast once per layer
        heads = []
        for hh in range(nhead):
            q = qkv_bf[:, hh * hd:(hh + 1) * hd]
            k = qkv_bf[:, D + hh * hd:D + (hh + 1) * hd]
            v = qkv_bf[:, 2 * D + hh * hd:2 * D + (hh + 1) * hd]
            s = jnp.einsum('qd,kd->qk', q, k,
                           preferred_element_type=jnp.float32) * inv_sqrt_hd
            s = s + amask
            s = s - jnp.max(s, axis=-1, keepdims=True)
            p = jnp.exp(s)
            p = p * pl.reciprocal(jnp.sum(p, axis=-1, keepdims=True),
                                  approx=True)
            heads.append(jnp.dot(p.astype(jnp.bfloat16), v,
                                 preferred_element_type=jnp.float32))
        # lane-concat the heads -> ONE K=D output projection per layer
        attn = jnp.concatenate(heads, axis=1).astype(jnp.bfloat16)
        attn = jnp.dot(attn, wo_ref[l],
                       preferred_element_type=jnp.float32) + bo_ref[l]

        # residual + LayerNorm 1 (post-norm)
        y1 = h + attn
        mu = jnp.mean(y1, axis=-1, keepdims=True)
        var = jnp.mean((y1 - mu) ** 2, axis=-1, keepdims=True)
        y1 = (y1 - mu) * jax.lax.rsqrt(var + LN_EPS) * ln1w_ref[l] + ln1b_ref[l]

        # feed-forward (ReLU)
        f1 = jnp.dot(y1.astype(jnp.bfloat16), w1_ref[l],
                     preferred_element_type=jnp.float32) + b1_ref[l]
        f1 = jnp.maximum(f1, 0.0)
        f2 = jnp.dot(f1.astype(jnp.bfloat16), w2_ref[l],
                     preferred_element_type=jnp.float32) + b2_ref[l]

        # residual + LayerNorm 2
        z2 = y1 + f2
        mu2 = jnp.mean(z2, axis=-1, keepdims=True)
        var2 = jnp.mean((z2 - mu2) ** 2, axis=-1, keepdims=True)
        h = (z2 - mu2) * jax.lax.rsqrt(var2 + LN_EPS) * ln2w_ref[l] + ln2b_ref[l]

    # ---- class-token readout: strided read + one aligned (B, D) store ------
    buf2_ref[0:N, :] = h
    out_ref[...] = buf2_ref[pl.ds(0, B, stride=S_pad), :].astype(out_ref.dtype)


# ----------------------------------------------------------------------------
# Wrapper: layout preparation + single pallas_call
# ----------------------------------------------------------------------------
def make_positional_encoding(seq_len, d_model):
    position = jnp.arange(seq_len, dtype=jnp.float32)[:, None]
    div_term = jnp.exp(jnp.arange(0, d_model, 2, dtype=jnp.float32) *
                       (-math.log(10000.0) / d_model))
    pe = jnp.zeros((seq_len, d_model), jnp.float32)
    pe = pe.at[:, 0::2].set(jnp.sin(position * div_term))
    if d_model % 2 == 1:
        pe = pe.at[:, 1::2].set(jnp.cos(position * div_term[:-1]))
    else:
        pe = pe.at[:, 1::2].set(jnp.cos(position * div_term))
    return pe


def transformer_encoder_multichannel_cnn(src, params, *, nhead,
                                         n_conv_layers=2, d_model=64):
    """src: (B, in_channels, L) — PyTorch NCL layout.  Returns (B, d_model)."""
    B, Cin, L = src.shape
    D = d_model
    C1 = params['conv1_w'].shape[0]                  # conv1 out channels
    scale = math.sqrt(D)

    # Sequence-length arithmetic of the reference module.
    Lv = L - 2                                       # conv1 (valid); conv2 (p=1) keeps it
    for _ in range(n_conv_layers):
        Lv = (Lv - 2) // 2                           # conv (valid) + maxpool(k=2)
    Lf = Lv                                          # CNN tokens per batch element
    assert Lf >= 1, "input too short for this conv stack"
    S = Lf + 1                                       # + class token

    # Pad per-batch sequence length to a sublane multiple and pick the CNN
    # segment so SEG / 2^n_conv_layers == S_pad (alignment end-to-end).
    S_pad = ((S + 7) // 8) * 8
    while S_pad * (2 ** n_conv_layers) < L:
        S_pad += 8
    SEG = S_pad * (2 ** n_conv_layers)
    R = B * SEG
    N = B * S_pad

    # --- flat, segment-padded input (R + 8, Cin), zero pad rows -------------
    x = jnp.transpose(src, (0, 2, 1)).astype(jnp.float32)           # (B, L, Cin)
    x_seg = jnp.zeros((B, SEG, Cin), jnp.float32).at[:, :L, :].set(x)
    x_flat = jnp.concatenate(
        [x_seg.reshape(R, Cin), jnp.zeros((8, Cin), jnp.float32)], axis=0)

    # --- conv weights in im2col layout (K*Cin, Cout), bf16 operands ---------
    def prep_conv(w):                                # (Cout, Cin, K) -> (K*Cin, Cout)
        return jnp.concatenate([w[:, :, k].T for k in range(w.shape[2])],
                               axis=0).astype(jnp.bfloat16)

    c1w = prep_conv(params['conv1_w'])
    c1b = params['conv1_b'].reshape(1, -1).astype(jnp.float32)
    c2w = prep_conv(params['conv2_w'])
    c2b = params['conv2_b'].reshape(1, -1).astype(jnp.float32)
    cw = prep_conv(params['conv_w'])
    cb = params['conv_b'].reshape(1, -1).astype(jnp.float32)

    # --- tiny per-row masks / token ids (host-side, O(N) not O(N^2)) --------
    t_seg = np.arange(SEG)
    mask_c1 = jnp.asarray(
        np.tile((t_seg < L - 2).astype(np.float32), B).reshape(R, 1))

    t = np.arange(S_pad)
    feat_mask = jnp.asarray(
        np.tile(((t >= 1) & (t <= Lf)).astype(np.float32), B).reshape(N, 1))

    bid = np.concatenate(
        [np.where(t <= Lf, b, -1) for b in range(B)]).astype(np.int32)
    bid_col = jnp.asarray(bid.reshape(N, 1))
    bid_row = jnp.asarray(bid.reshape(1, N))

    # --- positional encoding with the scaled class token folded into row 0 --
    pe = make_positional_encoding(S_pad, D)
    cls = params['class_token'].reshape(1, D).astype(jnp.float32)
    pe_aug = pe.at[0:1, :].add(cls * scale)
    pe_flat = jnp.tile(pe_aug, (B, 1))                               # (N, D)

    # --- stacked transformer weights (layer axis first, statically indexed) -
    layers = params['layers']
    wqkv = jnp.stack([lp['wqkv'].T for lp in layers]).astype(jnp.bfloat16)
    bqkv = jnp.stack([lp['bqkv'].reshape(1, -1) for lp in layers]).astype(jnp.float32)
    wo = jnp.stack([lp['wo'].T for lp in layers]).astype(jnp.bfloat16)
    bo = jnp.stack([lp['bo'].reshape(1, -1) for lp in layers]).astype(jnp.float32)
    w1 = jnp.stack([lp['w1'].T for lp in layers]).astype(jnp.bfloat16)
    b1 = jnp.stack([lp['b1'].reshape(1, -1) for lp in layers]).astype(jnp.float32)
    w2 = jnp.stack([lp['w2'].T for lp in layers]).astype(jnp.bfloat16)
    b2 = jnp.stack([lp['b2'].reshape(1, -1) for lp in layers]).astype(jnp.float32)
    ln1w = jnp.stack([lp['ln1_w'].reshape(1, -1) for lp in layers]).astype(jnp.float32)
    ln1b = jnp.stack([lp['ln1_b'].reshape(1, -1) for lp in layers]).astype(jnp.float32)
    ln2w = jnp.stack([lp['ln2_w'].reshape(1, -1) for lp in layers]).astype(jnp.float32)
    ln2b = jnp.stack([lp['ln2_b'].reshape(1, -1) for lp in layers]).astype(jnp.float32)

    kernel = functools.partial(_fused_kernel, B=B, SEG=SEG, S_pad=S_pad,
                               nhead=nhead, n_conv_layers=n_conv_layers)
    return pl.pallas_call(
        kernel,
        out_shape=jax.ShapeDtypeStruct((B, D), jnp.float32),
        scratch_shapes=[pltpu.VMEM((R + 8, C1), jnp.float32),   # conv1 -> conv2
                        pltpu.VMEM((R + 8, D), jnp.float32)],   # conv / pool / seq
        compiler_params=pltpu.CompilerParams(
            vmem_limit_bytes=32 * 1024 * 1024),
    )(x_flat, mask_c1, feat_mask, pe_flat, bid_col, bid_row,
      c1w, c1b, c2w, c2b, cw, cb,
      wqkv, bqkv, wo, bo, w1, b1, w2, b2, ln1w, ln1b, ln2w, ln2b)


# ----------------------------------------------------------------------------
# Parameter init (matches PyTorch module shapes)
# ----------------------------------------------------------------------------
def init_params(key, in_channels, nhead, d_hid, nlayers, d_model):
    keys = jax.random.split(key, 8 + nlayers)

    def normal(k, shape, scale=0.05):
        return (scale * jax.random.normal(k, shape)).astype(jnp.float32)

    params = {
        'conv1_w': normal(keys[0], (128, in_channels, 3)),
        'conv1_b': normal(keys[1], (128,)),
        'conv2_w': normal(keys[2], (d_model, 128, 3)),
        'conv2_b': normal(keys[3], (d_model,)),
        'conv_w': normal(keys[4], (d_model, d_model, 3)),
        'conv_b': normal(keys[5], (d_model,)),
        'class_token': jax.random.normal(keys[6], (d_model,)).astype(jnp.float32),
        'layers': [],
    }
    for i in range(nlayers):
        lk = jax.random.split(keys[7 + i], 8)
        params['layers'].append({
            'wqkv': normal(lk[0], (3 * d_model, d_model)),
            'bqkv': normal(lk[1], (3 * d_model,)),
            'wo': normal(lk[2], (d_model, d_model)),
            'bo': normal(lk[3], (d_model,)),
            'w1': normal(lk[4], (d_hid, d_model)),
            'b1': normal(lk[5], (d_hid,)),
            'w2': normal(lk[6], (d_model, d_hid)),
            'b2': normal(lk[7], (d_model,)),
            'ln1_w': jnp.ones((d_model,), jnp.float32),
            'ln1_b': jnp.zeros((d_model,), jnp.float32),
            'ln2_w': jnp.ones((d_model,), jnp.float32),
            'ln2_b': jnp.zeros((d_model,), jnp.float32),
        })
    return params


if __name__ == "__main__":
    in_channels, nhead, d_hid, nlayers, d_model = 4, 4, 128, 2, 64
    n_conv_layers = 2
    B, L = 2, 64

    key = jax.random.PRNGKey(0)
    pkey, xkey = jax.random.split(key)
    params = init_params(pkey, in_channels, nhead, d_hid, nlayers, d_model)
    src = jax.random.normal(xkey, (B, in_channels, L), dtype=jnp.float32)

    out = transformer_encoder_multichannel_cnn(
        src, params, nhead=nhead, n_conv_layers=n_conv_layers, d_model=d_model)
    out = jax.block_until_ready(out)
    assert out.shape == (B, d_model), out.shape
    assert jnp.all(jnp.isfinite(out))
    print("KERNEL_OK")
</pallas_src>

<mosaic_0001>
module attributes {stable_mosaic.version = 11 : i64} {
  func.func @_fused_kernel(%arg0: memref<136x4xf32, #tpu.memory_space<vmem>>, %arg1: memref<128x1xf32, #tpu.memory_space<vmem>>, %arg2: memref<32x1xf32, #tpu.memory_space<vmem>>, %arg3: memref<32x64xf32, #tpu.memory_space<vmem>>, %arg4: memref<32x1xi32, #tpu.memory_space<vmem>>, %arg5: memref<1x32xi32, #tpu.memory_space<vmem>>, %arg6: memref<12x128xbf16, #tpu.memory_space<vmem>>, %arg7: memref<1x128xf32, #tpu.memory_space<vmem>>, %arg8: memref<384x64xbf16, #tpu.memory_space<vmem>>, %arg9: memref<1x64xf32, #tpu.memory_space<vmem>>, %arg10: memref<192x64xbf16, #tpu.memory_space<vmem>>, %arg11: memref<1x64xf32, #tpu.memory_space<vmem>>, %arg12: memref<2x64x192xbf16, #tpu.memory_space<vmem>>, %arg13: memref<2x1x192xf32, #tpu.memory_space<vmem>>, %arg14: memref<2x64x64xbf16, #tpu.memory_space<vmem>>, %arg15: memref<2x1x64xf32, #tpu.memory_space<vmem>>, %arg16: memref<2x64x128xbf16, #tpu.memory_space<vmem>>, %arg17: memref<2x1x128xf32, #tpu.memory_space<vmem>>, %arg18: memref<2x128x64xbf16, #tpu.memory_space<vmem>>, %arg19: memref<2x1x64xf32, #tpu.memory_space<vmem>>, %arg20: memref<2x1x64xf32, #tpu.memory_space<vmem>>, %arg21: memref<2x1x64xf32, #tpu.memory_space<vmem>>, %arg22: memref<2x1x64xf32, #tpu.memory_space<vmem>>, %arg23: memref<2x1x64xf32, #tpu.memory_space<vmem>>, %arg24: memref<2x64xf32, #tpu.memory_space<vmem>>, %arg25: memref<136x128xf32, #tpu.memory_space<vmem>>, %arg26: memref<136x64xf32, #tpu.memory_space<vmem>>) attributes {dimension_semantics = [], scalar_prefetch = 0 : i64, scratch_operands = 2 : i64, tpu.core_type = #tpu.core_type<tc>} {
    %cst = arith.constant 0.000000e+00 : f32
    %0 = vector.broadcast %cst : f32 to vector<136x128xf32>
    %c0 = arith.constant 0 : index
    %c0_0 = arith.constant 0 : index
    %1 = vector.load %arg25[%c0, %c0_0] : memref<136x128xf32, #tpu.memory_space<vmem>>, vector<136x128xf32>
    tpu.vector_store %arg25[%c0, %c0_0], %0 {strides = array<i32>} : memref<136x128xf32, #tpu.memory_space<vmem>>, vector<136x128xf32>,
    %cst_1 = arith.constant 0.000000e+00 : f32
    %2 = vector.broadcast %cst_1 : f32 to vector<136x64xf32>
    %c0_2 = arith.constant 0 : index
    %c0_3 = arith.constant 0 : index
    %3 = vector.load %arg26[%c0_2, %c0_3] : memref<136x64xf32, #tpu.memory_space<vmem>>, vector<136x64xf32>
    tpu.vector_store %arg26[%c0_2, %c0_3], %2 {strides = array<i32>} : memref<136x64xf32, #tpu.memory_space<vmem>>, vector<136x64xf32>,
    %c0_4 = arith.constant 0 : index
    %c0_5 = arith.constant 0 : index
    %4 = vector.load %arg0[%c0_4, %c0_5] : memref<136x4xf32, #tpu.memory_space<vmem>>, vector<128x4xf32>
    %c1 = arith.constant 1 : index
    %c0_6 = arith.constant 0 : index
    %5 = vector.load %arg0[%c1, %c0_6] : memref<136x4xf32, #tpu.memory_space<vmem>>, vector<128x4xf32>
    %c2 = arith.constant 2 : index
    %c0_7 = arith.constant 0 : index
    %6 = vector.load %arg0[%c2, %c0_7] : memref<136x4xf32, #tpu.memory_space<vmem>>, vector<128x4xf32>
    %7 = tpu.concatenate %4, %5, %6 in 1 : vector<128x4xf32>, vector<128x4xf32>, vector<128x4xf32> -> vector<128x12xf32>
    %8 = arith.truncf %7 : vector<128x12xf32> to vector<128x12xbf16>
    %c0_8 = arith.constant 0 : index
    %c0_9 = arith.constant 0 : index
    %9 = vector.load %arg6[%c0_8, %c0_9] : memref<12x128xbf16, #tpu.memory_space<vmem>>, vector<12x128xbf16>
    %cst_10 = arith.constant dense<0.000000e+00> : vector<128x128xf32>
    %10 = tpu.matmul %8, %9, %cst_10 {dimension_numbers = #tpu.dot_dimension_numbers<[1], [0], [0], [1], [0, 0, 1, 1], [], []>} : vector<128x12xbf16>, vector<12x128xbf16>, vector<128x128xf32> -> vector<128x128xf32>
    %c0_11 = arith.constant 0 : index
    %c0_12 = arith.constant 0 : index
    %11 = vector.load %arg7[%c0_11, %c0_12] : memref<1x128xf32, #tpu.memory_space<vmem>>, vector<1x128xf32>
    %12 = vector.broadcast %11 : vector<1x128xf32> to vector<128x128xf32>
    %13 = arith.addf %10, %12 : vector<128x128xf32>
    %cst_13 = arith.constant 0.000000e+00 : f32
    %14 = vector.broadcast %cst_13 : f32 to vector<128x128xf32>
    %15 = arith.cmpf ogt, %13, %14 : vector<128x128xf32>
    %cst_14 = arith.constant 0.00999999977 : f32
    %16 = vector.broadcast %cst_14 : f32 to vector<128x128xf32>
    %17 = arith.mulf %16, %13 : vector<128x128xf32>
    %18 = arith.select %15, %13, %17 : vector<128x128xi1>, vector<128x128xf32>
    %c0_15 = arith.constant 0 : index
    %c0_16 = arith.constant 0 : index
    %19 = vector.load %arg1[%c0_15, %c0_16] : memref<128x1xf32, #tpu.memory_space<vmem>>, vector<128x1xf32>
    %cst_17 = arith.constant 0.000000e+00 : f32
    %20 = vector.broadcast %cst_17 : f32 to vector<128x1xf32>
    %21 = arith.cmpf ogt, %19, %20 : vector<128x1xf32>
    %cst_18 = arith.constant 0.000000e+00 : f32
    %22 = vector.shape_cast %21 : vector<128x1xi1> to vector<128x1xi1>
    %23 = vector.broadcast %22 : vector<128x1xi1> to vector<128x128xi1>
    %24 = vector.broadcast %cst_18 : f32 to vector<128x128xf32>
    %25 = arith.select %23, %18, %24 : vector<128x128xi1>, vector<128x128xf32>
    %c1_19 = arith.constant 1 : index
    %c0_20 = arith.constant 0 : index
    %26 = vector.load %arg25[%c1_19, %c0_20] : memref<136x128xf32, #tpu.memory_space<vmem>>, vector<128x128xf32>
    tpu.vector_store %arg25[%c1_19, %c0_20], %25 {strides = array<i32>} : memref<136x128xf32, #tpu.memory_space<vmem>>, vector<128x128xf32>,
    %c0_21 = arith.constant 0 : index
    %c0_22 = arith.constant 0 : index
    %27 = vector.load %arg25[%c0_21, %c0_22] : memref<136x128xf32, #tpu.memory_space<vmem>>, vector<128x128xf32>
    %c1_23 = arith.constant 1 : index
    %c0_24 = arith.constant 0 : index
    %28 = vector.load %arg25[%c1_23, %c0_24] : memref<136x128xf32, #tpu.memory_space<vmem>>, vector<128x128xf32>
    %c2_25 = arith.constant 2 : index
    %c0_26 = arith.constant 0 : index
    %29 = vector.load %arg25[%c2_25, %c0_26] : memref<136x128xf32, #tpu.memory_space<vmem>>, vector<128x128xf32>
    %30 = tpu.concatenate %27, %28, %29 in 1 : vector<128x128xf32>, vector<128x128xf32>, vector<128x128xf32> -> vector<128x384xf32>
    %31 = arith.truncf %30 : vector<128x384xf32> to vector<128x384xbf16>
    %c0_27 = arith.constant 0 : index
    %c0_28 = arith.constant 0 : index
    %32 = vector.load %arg8[%c0_27, %c0_28] : memref<384x64xbf16, #tpu.memory_space<vmem>>, vector<384x64xbf16>
    %cst_29 = arith.constant dense<0.000000e+00> : vector<128x64xf32>
    %33 = tpu.matmul %31, %32, %cst_29 {dimension_numbers = #tpu.dot_dimension_numbers<[1], [0], [0], [1], [0, 0, 1, 1], [], []>} : vector<128x384xbf16>, vector<384x64xbf16>, vector<128x64xf32> -> vector<128x64xf32>
    %c0_30 = arith.constant 0 : index
    %c0_31 = arith.constant 0 : index
    %34 = vector.load %arg9[%c0_30, %c0_31] : memref<1x64xf32, #tpu.memory_space<vmem>>, vector<1x64xf32>
    %35 = vector.broadcast %34 : vector<1x64xf32> to vector<128x64xf32>
    %36 = arith.addf %33, %35 : vector<128x64xf32>
    %cst_32 = arith.constant 0.000000e+00 : f32
    %37 = vector.broadcast %cst_32 : f32 to vector<128x64xf32>
    %38 = arith.cmpf ogt, %36, %37 : vector<128x64xf32>
    %cst_33 = arith.constant 0.00999999977 : f32
    %39 = vector.broadcast %cst_33 : f32 to vector<128x64xf32>
    %40 = arith.mulf %39, %36 : vector<128x64xf32>
    %41 = arith.select %38, %36, %40 : vector<128x64xi1>, vector<128x64xf32>
    %c0_34 = arith.constant 0 : index
    %c0_35 = arith.constant 0 : index
    %42 = vector.load %arg26[%c0_34, %c0_35] : memref<136x64xf32, #tpu.memory_space<vmem>>, vector<128x64xf32>
    tpu.vector_store %arg26[%c0_34, %c0_35], %41 {strides = array<i32>} : memref<136x64xf32, #tpu.memory_space<vmem>>, vector<128x64xf32>,
    %c0_36 = arith.constant 0 : index
    %c0_37 = arith.constant 0 : index
    %43 = vector.load %arg26[%c0_36, %c0_37] : memref<136x64xf32, #tpu.memory_space<vmem>>, vector<128x64xf32>
    %c1_38 = arith.constant 1 : index
    %c0_39 = arith.constant 0 : index
    %44 = vector.load %arg26[%c1_38, %c0_39] : memref<136x64xf32, #tpu.memory_space<vmem>>, vector<128x64xf32>
    %c2_40 = arith.constant 2 : index
    %c0_41 = arith.constant 0 : index
    %45 = vector.load %arg26[%c2_40, %c0_41] : memref<136x64xf32, #tpu.memory_space<vmem>>, vector<128x64xf32>
    %46 = tpu.concatenate %43, %44, %45 in 1 : vector<128x64xf32>, vector<128x64xf32>, vector<128x64xf32> -> vector<128x192xf32>
    %47 = arith.truncf %46 : vector<128x192xf32> to vector<128x192xbf16>
    %c0_42 = arith.constant 0 : index
    %c0_43 = arith.constant 0 : index
    %48 = vector.load %arg10[%c0_42, %c0_43] : memref<192x64xbf16, #tpu.memory_space<vmem>>, vector<192x64xbf16>
    %cst_44 = arith.constant dense<0.000000e+00> : vector<128x64xf32>
    %49 = tpu.matmul %47, %48, %cst_44 {dimension_numbers = #tpu.dot_dimension_numbers<[1], [0], [0], [1], [0, 0, 1, 1], [], []>} : vector<128x192xbf16>, vector<192x64xbf16>, vector<128x64xf32> -> vector<128x64xf32>
    %c0_45 = arith.constant 0 : index
    %c0_46 = arith.constant 0 : index
    %50 = vector.load %arg11[%c0_45, %c0_46] : memref<1x64xf32, #tpu.memory_space<vmem>>, vector<1x64xf32>
    %51 = vector.broadcast %50 : vector<1x64xf32> to vector<128x64xf32>
    %52 = arith.addf %49, %51 : vector<128x64xf32>
    %cst_47 = arith.constant 0.000000e+00 : f32
    %53 = vector.broadcast %cst_47 : f32 to vector<128x64xf32>
    %54 = arith.cmpf ogt, %52, %53 : vector<128x64xf32>
    %cst_48 = arith.constant 0.00999999977 : f32
    %55 = vector.broadcast %cst_48 : f32 to vector<128x64xf32>
    %56 = arith.mulf %55, %52 : vector<128x64xf32>
    %57 = arith.select %54, %52, %56 : vector<128x64xi1>, vector<128x64xf32>
    %c0_49 = arith.constant 0 : index
    %c0_50 = arith.constant 0 : index
    %58 = vector.load %arg26[%c0_49, %c0_50] : memref<136x64xf32, #tpu.memory_space<vmem>>, vector<128x64xf32>
    tpu.vector_store %arg26[%c0_49, %c0_50], %57 {strides = array<i32>} : memref<136x64xf32, #tpu.memory_space<vmem>>, vector<128x64xf32>,
    %c0_51 = arith.constant 0 : index
    %c0_52 = arith.constant 0 : index
    %59 = tpu.strided_load %arg26[%c0_51, %c0_52] {strides = array<i32: 2, 1>} : memref<136x64xf32, #tpu.memory_space<vmem>>, vector<64x64xf32>
    %c1_53 = arith.constant 1 : index
    %c0_54 = arith.constant 0 : index
    %60 = tpu.strided_load %arg26[%c1_53, %c0_54] {strides = array<i32: 2, 1>} : memref<136x64xf32, #tpu.memory_space<vmem>>, vector<64x64xf32>
    %61 = arith.maximumf %59, %60 : vector<64x64xf32>
    %c0_55 = arith.constant 0 : index
    %c0_56 = arith.constant 0 : index
    %62 = vector.load %arg26[%c0_55, %c0_56] : memref<136x64xf32, #tpu.memory_space<vmem>>, vector<64x64xf32>
    tpu.vector_store %arg26[%c0_55, %c0_56], %61 {strides = array<i32>} : memref<136x64xf32, #tpu.memory_space<vmem>>, vector<64x64xf32>,
    %c0_57 = arith.constant 0 : index
    %c0_58 = arith.constant 0 : index
    %63 = vector.load %arg26[%c0_57, %c0_58] : memref<136x64xf32, #tpu.memory_space<vmem>>, vector<64x64xf32>
    %c1_59 = arith.constant 1 : index
    %c0_60 = arith.constant 0 : index
    %64 = vector.load %arg26[%c1_59, %c0_60] : memref<136x64xf32, #tpu.memory_space<vmem>>, vector<64x64xf32>
    %c2_61 = arith.constant 2 : index
    %c0_62 = arith.constant 0 : index
    %65 = vector.load %arg26[%c2_61, %c0_62] : memref<136x64xf32, #tpu.memory_space<vmem>>, vector<64x64xf32>
    %66 = tpu.concatenate %63, %64, %65 in 1 : vector<64x64xf32>, vector<64x64xf32>, vector<64x64xf32> -> vector<64x192xf32>
    %67 = arith.truncf %66 : vector<64x192xf32> to vector<64x192xbf16>
    %c0_63 = arith.constant 0 : index
    %c0_64 = arith.constant 0 : index
    %68 = vector.load %arg10[%c0_63, %c0_64] : memref<192x64xbf16, #tpu.memory_space<vmem>>, vector<192x64xbf16>
    %cst_65 = arith.constant dense<0.000000e+00> : vector<64x64xf32>
    %69 = tpu.matmul %67, %68, %cst_65 {dimension_numbers = #tpu.dot_dimension_numbers<[1], [0], [0], [1], [0, 0, 1, 1], [], []>} : vector<64x192xbf16>, vector<192x64xbf16>, vector<64x64xf32> -> vector<64x64xf32>
    %c0_66 = arith.constant 0 : index
    %c0_67 = arith.constant 0 : index
    %70 = vector.load %arg11[%c0_66, %c0_67] : memref<1x64xf32, #tpu.memory_space<vmem>>, vector<1x64xf32>
    %71 = vector.broadcast %70 : vector<1x64xf32> to vector<64x64xf32>
    %72 = arith.addf %69, %71 : vector<64x64xf32>
    %cst_68 = arith.constant 0.000000e+00 : f32
    %73 = vector.broadcast %cst_68 : f32 to vector<64x64xf32>
    %74 = arith.cmpf ogt, %72, %73 : vector<64x64xf32>
    %cst_69 = arith.constant 0.00999999977 : f32
    %75 = vector.broadcast %cst_69 : f32 to vector<64x64xf32>
    %76 = arith.mulf %75, %72 : vector<64x64xf32>
    %77 = arith.select %74, %72, %76 : vector<64x64xi1>, vector<64x64xf32>
    %c0_70 = arith.constant 0 : index
    %c0_71 = arith.constant 0 : index
    %78 = vector.load %arg26[%c0_70, %c0_71] : memref<136x64xf32, #tpu.memory_space<vmem>>, vector<64x64xf32>
    tpu.vector_store %arg26[%c0_70, %c0_71], %77 {strides = array<i32>} : memref<136x64xf32, #tpu.memory_space<vmem>>, vector<64x64xf32>,
    %c0_72 = arith.constant 0 : index
    %c0_73 = arith.constant 0 : index
    %79 = tpu.strided_load %arg26[%c0_72, %c0_73] {strides = array<i32: 2, 1>} : memref<136x64xf32, #tpu.memory_space<vmem>>, vector<32x64xf32>
    %c1_74 = arith.constant 1 : index
    %c0_75 = arith.constant 0 : index
    %80 = tpu.strided_load %arg26[%c1_74, %c0_75] {strides = array<i32: 2, 1>} : memref<136x64xf32, #tpu.memory_space<vmem>>, vector<32x64xf32>
    %81 = arith.maximumf %79, %80 : vector<32x64xf32>
    %cst_76 = arith.constant 0.000000e+00 : f32
    %82 = vector.broadcast %cst_76 : f32 to vector<1x64xf32>
    %c0_77 = arith.constant 0 : index
    %c0_78 = arith.constant 0 : index
    %83 = vector.load %arg26[%c0_77, %c0_78] : memref<136x64xf32, #tpu.memory_space<vmem>>, vector<1x64xf32>
    tpu.vector_store %arg26[%c0_77, %c0_78], %82 {strides = array<i32>} : memref<136x64xf32, #tpu.memory_space<vmem>>, vector<1x64xf32>,
    %c1_79 = arith.constant 1 : index
    %c0_80 = arith.constant 0 : index
    %84 = vector.load %arg26[%c1_79, %c0_80] : memref<136x64xf32, #tpu.memory_space<vmem>>, vector<32x64xf32>
    tpu.vector_store %arg26[%c1_79, %c0_80], %81 {strides = array<i32>} : memref<136x64xf32, #tpu.memory_space<vmem>>, vector<32x64xf32>,
    %c0_81 = arith.constant 0 : index
    %c0_82 = arith.constant 0 : index
    %85 = vector.load %arg26[%c0_81, %c0_82] : memref<136x64xf32, #tpu.memory_space<vmem>>, vector<32x64xf32>
    %c0_83 = arith.constant 0 : index
    %c0_84 = arith.constant 0 : index
    %86 = vector.load %arg2[%c0_83, %c0_84] : memref<32x1xf32, #tpu.memory_space<vmem>>, vector<32x1xf32>
    %cst_85 = arith.constant 0.000000e+00 : f32
    %87 = vector.broadcast %cst_85 : f32 to vector<32x1xf32>
    %88 = arith.cmpf ogt, %86, %87 : vector<32x1xf32>
    %cst_86 = arith.constant 8.000000e+00 : f32
    %89 = vector.broadcast %cst_86 : f32 to vector<32x64xf32>
    %90 = arith.mulf %85, %89 : vector<32x64xf32>
    %cst_87 = arith.constant 0.000000e+00 : f32
    %91 = vector.shape_cast %88 : vector<32x1xi1> to vector<32x1xi1>
    %92 = vector.broadcast %91 : vector<32x1xi1> to vector<32x64xi1>
    %93 = vector.broadcast %cst_87 : f32 to vector<32x64xf32>
    %94 = arith.select %92, %90, %93 : vector<32x64xi1>, vector<32x64xf32>
    %c0_88 = arith.constant 0 : index
    %c0_89 = arith.constant 0 : index
    %95 = vector.load %arg3[%c0_88, %c0_89] : memref<32x64xf32, #tpu.memory_space<vmem>>, vector<32x64xf32>
    %96 = arith.addf %94, %95 : vector<32x64xf32>
    %c0_90 = arith.constant 0 : index
    %c0_91 = arith.constant 0 : index
    %97 = vector.load %arg4[%c0_90, %c0_91] : memref<32x1xi32, #tpu.memory_space<vmem>>, vector<32x1xi32>
    %c0_92 = arith.constant 0 : index
    %c0_93 = arith.constant 0 : index
    %98 = vector.load %arg5[%c0_92, %c0_93] : memref<1x32xi32, #tpu.memory_space<vmem>>, vector<1x32xi32>
    %99 = vector.broadcast %97 : vector<32x1xi32> to vector<32x32xi32>
    %100 = vector.broadcast %98 : vector<1x32xi32> to vector<32x32xi32>
    %101 = arith.cmpi eq, %99, %100 : vector<32x32xi32>
    %cst_94 = arith.constant 0.000000e+00 : f32
    %cst_95 = arith.constant -1.000000e+30 : f32
    %102 = vector.broadcast %cst_94 : f32 to vector<32x32xf32>
    %103 = vector.broadcast %cst_95 : f32 to vector<32x32xf32>
    %104 = arith.select %101, %102, %103 : vector<32x32xi1>, vector<32x32xf32>
    %105 = arith.truncf %96 : vector<32x64xf32> to vector<32x64xbf16>
    %c0_96 = arith.constant 0 : index
    %c0_97 = arith.constant 0 : index
    %c0_98 = arith.constant 0 : index
    %106 = vector.load %arg12[%c0_96, %c0_97, %c0_98] : memref<2x64x192xbf16, #tpu.memory_space<vmem>>, vector<1x64x192xbf16>
    %107 = vector.shape_cast %106 : vector<1x64x192xbf16> to vector<64x192xbf16>
    %cst_99 = arith.constant dense<0.000000e+00> : vector<32x192xf32>
    %108 = tpu.matmul %105, %107, %cst_99 {dimension_numbers = #tpu.dot_dimension_numbers<[1], [0], [0], [1], [0, 0, 1, 1], [], []>} : vector<32x64xbf16>, vector<64x192xbf16>, vector<32x192xf32> -> vector<32x192xf32>
    %c0_100 = arith.constant 0 : index
    %c0_101 = arith.constant 0 : index
    %c0_102 = arith.constant 0 : index
    %109 = vector.load %arg13[%c0_100, %c0_101, %c0_102] : memref<2x1x192xf32, #tpu.memory_space<vmem>>, vector<1x1x192xf32>
    %110 = vector.shape_cast %109 : vector<1x1x192xf32> to vector<1x192xf32>
    %111 = vector.broadcast %110 : vector<1x192xf32> to vector<32x192xf32>
    %112 = arith.addf %108, %111 : vector<32x192xf32>
    %113 = arith.truncf %112 : vector<32x192xf32> to vector<32x192xbf16>
    %114 = vector.extract_strided_slice %113 {offsets = [0, 0], sizes = [32, 16], strides = [1, 1]} : vector<32x192xbf16> to vector<32x16xbf16>
    %115 = vector.extract_strided_slice %113 {offsets = [0, 64], sizes = [32, 16], strides = [1, 1]} : vector<32x192xbf16> to vector<32x16xbf16>
    %116 = vector.extract_strided_slice %113 {offsets = [0, 128], sizes = [32, 16], strides = [1, 1]} : vector<32x192xbf16> to vector<32x16xbf16>
    "tpu.trace_start"() <{level = 10 : i32, message = "qd,kd->qk"}> : () -> ()
    %cst_103 = arith.constant dense<0.000000e+00> : vector<32x32xf32>
    %117 = tpu.matmul %114, %115, %cst_103 {dimension_numbers = #tpu.dot_dimension_numbers<[1], [1], [0], [0], [0, 0, 1, 0], [], []>} : vector<32x16xbf16>, vector<32x16xbf16>, vector<32x32xf32> -> vector<32x32xf32>
    "tpu.trace_stop"() : () -> ()
    %cst_104 = arith.constant 2.500000e-01 : f32
    %118 = vector.broadcast %cst_104 : f32 to vector<32x32xf32>
    %119 = arith.mulf %117, %118 : vector<32x32xf32>
    %120 = arith.addf %119, %104 : vector<32x32xf32>
    %cst_105 = arith.constant dense<0xFF800000> : vector<32xf32>
    %121 = vector.multi_reduction <maximumf>, %120, %cst_105 [1] : vector<32x32xf32> to vector<32xf32>
    %122 = vector.shape_cast %121 : vector<32xf32> to vector<32x1xf32>
    %123 = vector.broadcast %122 : vector<32x1xf32> to vector<32x32xf32>
    %124 = arith.subf %120, %123 : vector<32x32xf32>
    %125 = math.exp %124 : vector<32x32xf32>
    %cst_106 = arith.constant dense<0.000000e+00> : vector<32xf32>
    %126 = vector.multi_reduction <add>, %125, %cst_106 [1] : vector<32x32xf32> to vector<32xf32>
    %127 = vector.shape_cast %126 : vector<32xf32> to vector<32x1xf32>
    %128 = tpu.reciprocal %127 {approx = true} : vector<32x1xf32> -> vector<32x1xf32>
    %129 = vector.broadcast %128 : vector<32x1xf32> to vector<32x32xf32>
    %130 = arith.mulf %125, %129 : vector<32x32xf32>
    %131 = arith.truncf %130 : vector<32x32xf32> to vector<32x32xbf16>
    %cst_107 = arith.constant dense<0.000000e+00> : vector<32x16xf32>
    %132 = tpu.matmul %131, %116, %cst_107 {dimension_numbers = #tpu.dot_dimension_numbers<[1], [0], [0], [1], [0, 0, 1, 1], [], []>} : vector<32x32xbf16>, vector<32x16xbf16>, vector<32x16xf32> -> vector<32x16xf32>
    %133 = vector.extract_strided_slice %113 {offsets = [0, 16], sizes = [32, 16], strides = [1, 1]} : vector<32x192xbf16> to vector<32x16xbf16>
    %134 = vector.extract_strided_slice %113 {offsets = [0, 80], sizes = [32, 16], strides = [1, 1]} : vector<32x192xbf16> to vector<32x16xbf16>
    %135 = vector.extract_strided_slice %113 {offsets = [0, 144], sizes = [32, 16], strides = [1, 1]} : vector<32x192xbf16> to vector<32x16xbf16>
    "tpu.trace_start"() <{level = 10 : i32, message = "qd,kd->qk"}> : () -> ()
    %cst_108 = arith.constant dense<0.000000e+00> : vector<32x32xf32>
    %136 = tpu.matmul %133, %134, %cst_108 {dimension_numbers = #tpu.dot_dimension_numbers<[1], [1], [0], [0], [0, 0, 1, 0], [], []>} : vector<32x16xbf16>, vector<32x16xbf16>, vector<32x32xf32> -> vector<32x32xf32>
    "tpu.trace_stop"() : () -> ()
    %cst_109 = arith.constant 2.500000e-01 : f32
    %137 = vector.broadcast %cst_109 : f32 to vector<32x32xf32>
    %138 = arith.mulf %136, %137 : vector<32x32xf32>
    %139 = arith.addf %138, %104 : vector<32x32xf32>
    %cst_110 = arith.constant dense<0xFF800000> : vector<32xf32>
    %140 = vector.multi_reduction <maximumf>, %139, %cst_110 [1] : vector<32x32xf32> to vector<32xf32>
    %141 = vector.shape_cast %140 : vector<32xf32> to vector<32x1xf32>
    %142 = vector.broadcast %141 : vector<32x1xf32> to vector<32x32xf32>
    %143 = arith.subf %139, %142 : vector<32x32xf32>
    %144 = math.exp %143 : vector<32x32xf32>
    %cst_111 = arith.constant dense<0.000000e+00> : vector<32xf32>
    %145 = vector.multi_reduction <add>, %144, %cst_111 [1] : vector<32x32xf32> to vector<32xf32>
    %146 = vector.shape_cast %145 : vector<32xf32> to vector<32x1xf32>
    %147 = tpu.reciprocal %146 {approx = true} : vector<32x1xf32> -> vector<32x1xf32>
    %148 = vector.broadcast %147 : vector<32x1xf32> to vector<32x32xf32>
    %149 = arith.mulf %144, %148 : vector<32x32xf32>
    %150 = arith.truncf %149 : vector<32x32xf32> to vector<32x32xbf16>
    %cst_112 = arith.constant dense<0.000000e+00> : vector<32x16xf32>
    %151 = tpu.matmul %150, %135, %cst_112 {dimension_numbers = #tpu.dot_dimension_numbers<[1], [0], [0], [1], [0, 0, 1, 1], [], []>} : vector<32x32xbf16>, vector<32x16xbf16>, vector<32x16xf32> -> vector<32x16xf32>
    %152 = vector.extract_strided_slice %113 {offsets = [0, 32], sizes = [32, 16], strides = [1, 1]} : vector<32x192xbf16> to vector<32x16xbf16>
    %153 = vector.extract_strided_slice %113 {offsets = [0, 96], sizes = [32, 16], strides = [1, 1]} : vector<32x192xbf16> to vector<32x16xbf16>
    %154 = vector.extract_strided_slice %113 {offsets = [0, 160], sizes = [32, 16], strides = [1, 1]} : vector<32x192xbf16> to vector<32x16xbf16>
    "tpu.trace_start"() <{level = 10 : i32, message = "qd,kd->qk"}> : () -> ()
    %cst_113 = arith.constant dense<0.000000e+00> : vector<32x32xf32>
    %155 = tpu.matmul %152, %153, %cst_113 {dimension_numbers = #tpu.dot_dimension_numbers<[1], [1], [0], [0], [0, 0, 1, 0], [], []>} : vector<32x16xbf16>, vector<32x16xbf16>, vector<32x32xf32> -> vector<32x32xf32>
    "tpu.trace_stop"() : () -> ()
    %cst_114 = arith.constant 2.500000e-01 : f32
    %156 = vector.broadcast %cst_114 : f32 to vector<32x32xf32>
    %157 = arith.mulf %155, %156 : vector<32x32xf32>
    %158 = arith.addf %157, %104 : vector<32x32xf32>
    %cst_115 = arith.constant dense<0xFF800000> : vector<32xf32>
    %159 = vector.multi_reduction <maximumf>, %158, %cst_115 [1] : vector<32x32xf32> to vector<32xf32>
    %160 = vector.shape_cast %159 : vector<32xf32> to vector<32x1xf32>
    %161 = vector.broadcast %160 : vector<32x1xf32> to vector<32x32xf32>
    %162 = arith.subf %158, %161 : vector<32x32xf32>
    %163 = math.exp %162 : vector<32x32xf32>
    %cst_116 = arith.constant dense<0.000000e+00> : vector<32xf32>
    %164 = vector.multi_reduction <add>, %163, %cst_116 [1] : vector<32x32xf32> to vector<32xf32>
    %165 = vector.shape_cast %164 : vector<32xf32> to vector<32x1xf32>
    %166 = tpu.reciprocal %165 {approx = true} : vector<32x1xf32> -> vector<32x1xf32>
    %167 = vector.broadcast %166 : vector<32x1xf32> to vector<32x32xf32>
    %168 = arith.mulf %163, %167 : vector<32x32xf32>
    %169 = arith.truncf %168 : vector<32x32xf32> to vector<32x32xbf16>
    %cst_117 = arith.constant dense<0.000000e+00> : vector<32x16xf32>
    %170 = tpu.matmul %169, %154, %cst_117 {dimension_numbers = #tpu.dot_dimension_numbers<[1], [0], [0], [1], [0, 0, 1, 1], [], []>} : vector<32x32xbf16>, vector<32x16xbf16>, vector<32x16xf32> -> vector<32x16xf32>
    %171 = vector.extract_strided_slice %113 {offsets = [0, 48], sizes = [32, 16], strides = [1, 1]} : vector<32x192xbf16> to vector<32x16xbf16>
    %172 = vector.extract_strided_slice %113 {offsets = [0, 112], sizes = [32, 16], strides = [1, 1]} : vector<32x192xbf16> to vector<32x16xbf16>
    %173 = vector.extract_strided_slice %113 {offsets = [0, 176], sizes = [32, 16], strides = [1, 1]} : vector<32x192xbf16> to vector<32x16xbf16>
    "tpu.trace_start"() <{level = 10 : i32, message = "qd,kd->qk"}> : () -> ()
    %cst_118 = arith.constant dense<0.000000e+00> : vector<32x32xf32>
    %174 = tpu.matmul %171, %172, %cst_118 {dimension_numbers = #tpu.dot_dimension_numbers<[1], [1], [0], [0], [0, 0, 1, 0], [], []>} : vector<32x16xbf16>, vector<32x16xbf16>, vector<32x32xf32> -> vector<32x32xf32>
    "tpu.trace_stop"() : () -> ()
    %cst_119 = arith.constant 2.500000e-01 : f32
    %175 = vector.broadcast %cst_119 : f32 to vector<32x32xf32>
    %176 = arith.mulf %174, %175 : vector<32x32xf32>
    %177 = arith.addf %176, %104 : vector<32x32xf32>
    %cst_120 = arith.constant dense<0xFF800000> : vector<32xf32>
    %178 = vector.multi_reduction <maximumf>, %177, %cst_120 [1] : vector<32x32xf32> to vector<32xf32>
    %179 = vector.shape_cast %178 : vector<32xf32> to vector<32x1xf32>
    %180 = vector.broadcast %179 : vector<32x1xf32> to vector<32x32xf32>
    %181 = arith.subf %177, %180 : vector<32x32xf32>
    %182 = math.exp %181 : vector<32x32xf32>
    %cst_121 = arith.constant dense<0.000000e+00> : vector<32xf32>
    %183 = vector.multi_reduction <add>, %182, %cst_121 [1] : vector<32x32xf32> to vector<32xf32>
    %184 = vector.shape_cast %183 : vector<32xf32> to vector<32x1xf32>
    %185 = tpu.reciprocal %184 {approx = true} : vector<32x1xf32> -> vector<32x1xf32>
    %186 = vector.broadcast %185 : vector<32x1xf32> to vector<32x32xf32>
    %187 = arith.mulf %182, %186 : vector<32x32xf32>
    %188 = arith.truncf %187 : vector<32x32xf32> to vector<32x32xbf16>
    %cst_122 = arith.constant dense<0.000000e+00> : vector<32x16xf32>
    %189 = tpu.matmul %188, %173, %cst_122 {dimension_numbers = #tpu.dot_dimension_numbers<[1], [0], [0], [1], [0, 0, 1, 1], [], []>} : vector<32x32xbf16>, vector<32x16xbf16>, vector<32x16xf32> -> vector<32x16xf32>
    %190 = tpu.concatenate %132, %151, %170, %189 in 1 : vector<32x16xf32>, vector<32x16xf32>, vector<32x16xf32>, vector<32x16xf32> -> vector<32x64xf32>
    %191 = arith.truncf %190 : vector<32x64xf32> to vector<32x64xbf16>
    %c0_123 = arith.constant 0 : index
    %c0_124 = arith.constant 0 : index
    %c0_125 = arith.constant 0 : index
    %192 = vector.load %arg14[%c0_123, %c0_124, %c0_125] : memref<2x64x64xbf16, #tpu.memory_space<vmem>>, vector<1x64x64xbf16>
    %193 = vector.shape_cast %192 : vector<1x64x64xbf16> to vector<64x64xbf16>
    %cst_126 = arith.constant dense<0.000000e+00> : vector<32x64xf32>
    %194 = tpu.matmul %191, %193, %cst_126 {dimension_numbers = #tpu.dot_dimension_numbers<[1], [0], [0], [1], [0, 0, 1, 1], [], []>} : vector<32x64xbf16>, vector<64x64xbf16>, vector<32x64xf32> -> vector<32x64xf32>
    %c0_127 = arith.constant 0 : index
    %c0_128 = arith.constant 0 : index
    %c0_129 = arith.constant 0 : index
    %195 = vector.load %arg15[%c0_127, %c0_128, %c0_129] : memref<2x1x64xf32, #tpu.memory_space<vmem>>, vector<1x1x64xf32>
    %196 = vector.shape_cast %195 : vector<1x1x64xf32> to vector<1x64xf32>
    %197 = vector.broadcast %196 : vector<1x64xf32> to vector<32x64xf32>
    %198 = arith.addf %194, %197 : vector<32x64xf32>
    %199 = arith.addf %96, %198 : vector<32x64xf32>
    %cst_130 = arith.constant dense<0.000000e+00> : vector<32xf32>
    %200 = vector.multi_reduction <add>, %199, %cst_130 [1] : vector<32x64xf32> to vector<32xf32>
    %201 = vector.shape_cast %200 : vector<32xf32> to vector<32x1xf32>
    %cst_131 = arith.constant 6.400000e+01 : f32
    %202 = vector.broadcast %cst_131 : f32 to vector<32x1xf32>
    %203 = arith.divf %201, %202 : vector<32x1xf32>
    %204 = vector.broadcast %203 : vector<32x1xf32> to vector<32x64xf32>
    %205 = arith.subf %199, %204 : vector<32x64xf32>
    %206 = arith.mulf %205, %205 : vector<32x64xf32>
    %cst_132 = arith.constant dense<0.000000e+00> : vector<32xf32>
    %207 = vector.multi_reduction <add>, %206, %cst_132 [1] : vector<32x64xf32> to vector<32xf32>
    %208 = vector.shape_cast %207 : vector<32xf32> to vector<32x1xf32>
    %cst_133 = arith.constant 6.400000e+01 : f32
    %209 = vector.broadcast %cst_133 : f32 to vector<32x1xf32>
    %210 = arith.divf %208, %209 : vector<32x1xf32>
    %211 = vector.broadcast %203 : vector<32x1xf32> to vector<32x64xf32>
    %212 = arith.subf %199, %211 : vector<32x64xf32>
    %cst_134 = arith.constant 9.99999974E-6 : f32
    %213 = vector.broadcast %cst_134 : f32 to vector<32x1xf32>
    %214 = arith.addf %210, %213 : vector<32x1xf32>
    %215 = math.rsqrt %214 : vector<32x1xf32>
    %216 = vector.broadcast %215 : vector<32x1xf32> to vector<32x64xf32>
    %217 = arith.mulf %212, %216 : vector<32x64xf32>
    %c0_135 = arith.constant 0 : index
    %c0_136 = arith.constant 0 : index
    %c0_137 = arith.constant 0 : index
    %218 = vector.load %arg20[%c0_135, %c0_136, %c0_137] : memref<2x1x64xf32, #tpu.memory_space<vmem>>, vector<1x1x64xf32>
    %219 = vector.shape_cast %218 : vector<1x1x64xf32> to vector<1x64xf32>
    %220 = vector.broadcast %219 : vector<1x64xf32> to vector<32x64xf32>
    %221 = arith.mulf %217, %220 : vector<32x64xf32>
    %c0_138 = arith.constant 0 : index
    %c0_139 = arith.constant 0 : index
    %c0_140 = arith.constant 0 : index
    %222 = vector.load %arg21[%c0_138, %c0_139, %c0_140] : memref<2x1x64xf32, #tpu.memory_space<vmem>>, vector<1x1x64xf32>
    %223 = vector.shape_cast %222 : vector<1x1x64xf32> to vector<1x64xf32>
    %224 = vector.broadcast %223 : vector<1x64xf32> to vector<32x64xf32>
    %225 = arith.addf %221, %224 : vector<32x64xf32>
    %226 = arith.truncf %225 : vector<32x64xf32> to vector<32x64xbf16>
    %c0_141 = arith.constant 0 : index
    %c0_142 = arith.constant 0 : index
    %c0_143 = arith.constant 0 : index
    %227 = vector.load %arg16[%c0_141, %c0_142, %c0_143] : memref<2x64x128xbf16, #tpu.memory_space<vmem>>, vector<1x64x128xbf16>
    %228 = vector.shape_cast %227 : vector<1x64x128xbf16> to vector<64x128xbf16>
    %cst_144 = arith.constant dense<0.000000e+00> : vector<32x128xf32>
    %229 = tpu.matmul %226, %228, %cst_144 {dimension_numbers = #tpu.dot_dimension_numbers<[1], [0], [0], [1], [0, 0, 1, 1], [], []>} : vector<32x64xbf16>, vector<64x128xbf16>, vector<32x128xf32> -> vector<32x128xf32>
    %c0_145 = arith.constant 0 : index
    %c0_146 = arith.constant 0 : index
    %c0_147 = arith.constant 0 : index
    %230 = vector.load %arg17[%c0_145, %c0_146, %c0_147] : memref<2x1x128xf32, #tpu.memory_space<vmem>>, vector<1x1x128xf32>
    %231 = vector.shape_cast %230 : vector<1x1x128xf32> to vector<1x128xf32>
    %232 = vector.broadcast %231 : vector<1x128xf32> to vector<32x128xf32>
    %233 = arith.addf %229, %232 : vector<32x128xf32>
    %cst_148 = arith.constant 0.000000e+00 : f32
    %234 = vector.broadcast %cst_148 : f32 to vector<32x128xf32>
    %235 = arith.maximumf %233, %234 : vector<32x128xf32>
    %236 = arith.truncf %235 : vector<32x128xf32> to vector<32x128xbf16>
    %c0_149 = arith.constant 0 : index
    %c0_150 = arith.constant 0 : index
    %c0_151 = arith.constant 0 : index
    %237 = vector.load %arg18[%c0_149, %c0_150, %c0_151] : memref<2x128x64xbf16, #tpu.memory_space<vmem>>, vector<1x128x64xbf16>
    %238 = vector.shape_cast %237 : vector<1x128x64xbf16> to vector<128x64xbf16>
    %cst_152 = arith.constant dense<0.000000e+00> : vector<32x64xf32>
    %239 = tpu.matmul %236, %238, %cst_152 {dimension_numbers = #tpu.dot_dimension_numbers<[1], [0], [0], [1], [0, 0, 1, 1], [], []>} : vector<32x128xbf16>, vector<128x64xbf16>, vector<32x64xf32> -> vector<32x64xf32>
    %c0_153 = arith.constant 0 : index
    %c0_154 = arith.constant 0 : index
    %c0_155 = arith.constant 0 : index
    %240 = vector.load %arg19[%c0_153, %c0_154, %c0_155] : memref<2x1x64xf32, #tpu.memory_space<vmem>>, vector<1x1x64xf32>
    %241 = vector.shape_cast %240 : vector<1x1x64xf32> to vector<1x64xf32>
    %242 = vector.broadcast %241 : vector<1x64xf32> to vector<32x64xf32>
    %243 = arith.addf %239, %242 : vector<32x64xf32>
    %244 = arith.addf %225, %243 : vector<32x64xf32>
    %cst_156 = arith.constant dense<0.000000e+00> : vector<32xf32>
    %245 = vector.multi_reduction <add>, %244, %cst_156 [1] : vector<32x64xf32> to vector<32xf32>
    %246 = vector.shape_cast %245 : vector<32xf32> to vector<32x1xf32>
    %cst_157 = arith.constant 6.400000e+01 : f32
    %247 = vector.broadcast %cst_157 : f32 to vector<32x1xf32>
    %248 = arith.divf %246, %247 : vector<32x1xf32>
    %249 = vector.broadcast %248 : vector<32x1xf32> to vector<32x64xf32>
    %250 = arith.subf %244, %249 : vector<32x64xf32>
    %251 = arith.mulf %250, %250 : vector<32x64xf32>
    %cst_158 = arith.constant dense<0.000000e+00> : vector<32xf32>
    %252 = vector.multi_reduction <add>, %251, %cst_158 [1] : vector<32x64xf32> to vector<32xf32>
    %253 = vector.shape_cast %252 : vector<32xf32> to vector<32x1xf32>
    %cst_159 = arith.constant 6.400000e+01 : f32
    %254 = vector.broadcast %cst_159 : f32 to vector<32x1xf32>
    %255 = arith.divf %253, %254 : vector<32x1xf32>
    %256 = vector.broadcast %248 : vector<32x1xf32> to vector<32x64xf32>
    %257 = arith.subf %244, %256 : vector<32x64xf32>
    %cst_160 = arith.constant 9.99999974E-6 : f32
    %258 = vector.broadcast %cst_160 : f32 to vector<32x1xf32>
    %259 = arith.addf %255, %258 : vector<32x1xf32>
    %260 = math.rsqrt %259 : vector<32x1xf32>
    %261 = vector.broadcast %260 : vector<32x1xf32> to vector<32x64xf32>
    %262 = arith.mulf %257, %261 : vector<32x64xf32>
    %c0_161 = arith.constant 0 : index
    %c0_162 = arith.constant 0 : index
    %c0_163 = arith.constant 0 : index
    %263 = vector.load %arg22[%c0_161, %c0_162, %c0_163] : memref<2x1x64xf32, #tpu.memory_space<vmem>>, vector<1x1x64xf32>
    %264 = vector.shape_cast %263 : vector<1x1x64xf32> to vector<1x64xf32>
    %265 = vector.broadcast %264 : vector<1x64xf32> to vector<32x64xf32>
    %266 = arith.mulf %262, %265 : vector<32x64xf32>
    %c0_164 = arith.constant 0 : index
    %c0_165 = arith.constant 0 : index
    %c0_166 = arith.constant 0 : index
    %267 = vector.load %arg23[%c0_164, %c0_165, %c0_166] : memref<2x1x64xf32, #tpu.memory_space<vmem>>, vector<1x1x64xf32>
    %268 = vector.shape_cast %267 : vector<1x1x64xf32> to vector<1x64xf32>
    %269 = vector.broadcast %268 : vector<1x64xf32> to vector<32x64xf32>
    %270 = arith.addf %266, %269 : vector<32x64xf32>
    %271 = arith.truncf %270 : vector<32x64xf32> to vector<32x64xbf16>
    %c1_167 = arith.constant 1 : index
    %c0_168 = arith.constant 0 : index
    %c0_169 = arith.constant 0 : index
    %272 = vector.load %arg12[%c1_167, %c0_168, %c0_169] : memref<2x64x192xbf16, #tpu.memory_space<vmem>>, vector<1x64x192xbf16>
    %273 = vector.shape_cast %272 : vector<1x64x192xbf16> to vector<64x192xbf16>
    %cst_170 = arith.constant dense<0.000000e+00> : vector<32x192xf32>
    %274 = tpu.matmul %271, %273, %cst_170 {dimension_numbers = #tpu.dot_dimension_numbers<[1], [0], [0], [1], [0, 0, 1, 1], [], []>} : vector<32x64xbf16>, vector<64x192xbf16>, vector<32x192xf32> -> vector<32x192xf32>
    %c1_171 = arith.constant 1 : index
    %c0_172 = arith.constant 0 : index
    %c0_173 = arith.constant 0 : index
    %275 = vector.load %arg13[%c1_171, %c0_172, %c0_173] : memref<2x1x192xf32, #tpu.memory_space<vmem>>, vector<1x1x192xf32>
    %276 = vector.shape_cast %275 : vector<1x1x192xf32> to vector<1x192xf32>
    %277 = vector.broadcast %276 : vector<1x192xf32> to vector<32x192xf32>
    %278 = arith.addf %274, %277 : vector<32x192xf32>
    %279 = arith.truncf %278 : vector<32x192xf32> to vector<32x192xbf16>
    %280 = vector.extract_strided_slice %279 {offsets = [0, 0], sizes = [32, 16], strides = [1, 1]} : vector<32x192xbf16> to vector<32x16xbf16>
    %281 = vector.extract_strided_slice %279 {offsets = [0, 64], sizes = [32, 16], strides = [1, 1]} : vector<32x192xbf16> to vector<32x16xbf16>
    %282 = vector.extract_strided_slice %279 {offsets = [0, 128], sizes = [32, 16], strides = [1, 1]} : vector<32x192xbf16> to vector<32x16xbf16>
    "tpu.trace_start"() <{level = 10 : i32, message = "qd,kd->qk"}> : () -> ()
    %cst_174 = arith.constant dense<0.000000e+00> : vector<32x32xf32>
    %283 = tpu.matmul %280, %281, %cst_174 {dimension_numbers = #tpu.dot_dimension_numbers<[1], [1], [0], [0], [0, 0, 1, 0], [], []>} : vector<32x16xbf16>, vector<32x16xbf16>, vector<32x32xf32> -> vector<32x32xf32>
    "tpu.trace_stop"() : () -> ()
    %cst_175 = arith.constant 2.500000e-01 : f32
    %284 = vector.broadcast %cst_175 : f32 to vector<32x32xf32>
    %285 = arith.mulf %283, %284 : vector<32x32xf32>
    %286 = arith.addf %285, %104 : vector<32x32xf32>
    %cst_176 = arith.constant dense<0xFF800000> : vector<32xf32>
    %287 = vector.multi_reduction <maximumf>, %286, %cst_176 [1] : vector<32x32xf32> to vector<32xf32>
    %288 = vector.shape_cast %287 : vector<32xf32> to vector<32x1xf32>
    %289 = vector.broadcast %288 : vector<32x1xf32> to vector<32x32xf32>
    %290 = arith.subf %286, %289 : vector<32x32xf32>
    %291 = math.exp %290 : vector<32x32xf32>
    %cst_177 = arith.constant dense<0.000000e+00> : vector<32xf32>
    %292 = vector.multi_reduction <add>, %291, %cst_177 [1] : vector<32x32xf32> to vector<32xf32>
    %293 = vector.shape_cast %292 : vector<32xf32> to vector<32x1xf32>
    %294 = tpu.reciprocal %293 {approx = true} : vector<32x1xf32> -> vector<32x1xf32>
    %295 = vector.broadcast %294 : vector<32x1xf32> to vector<32x32xf32>
    %296 = arith.mulf %291, %295 : vector<32x32xf32>
    %297 = arith.truncf %296 : vector<32x32xf32> to vector<32x32xbf16>
    %cst_178 = arith.constant dense<0.000000e+00> : vector<32x16xf32>
    %298 = tpu.matmul %297, %282, %cst_178 {dimension_numbers = #tpu.dot_dimension_numbers<[1], [0], [0], [1], [0, 0, 1, 1], [], []>} : vector<32x32xbf16>, vector<32x16xbf16>, vector<32x16xf32> -> vector<32x16xf32>
    %299 = vector.extract_strided_slice %279 {offsets = [0, 16], sizes = [32, 16], strides = [1, 1]} : vector<32x192xbf16> to vector<32x16xbf16>
    %300 = vector.extract_strided_slice %279 {offsets = [0, 80], sizes = [32, 16], strides = [1, 1]} : vector<32x192xbf16> to vector<32x16xbf16>
    %301 = vector.extract_strided_slice %279 {offsets = [0, 144], sizes = [32, 16], strides = [1, 1]} : vector<32x192xbf16> to vector<32x16xbf16>
    "tpu.trace_start"() <{level = 10 : i32, message = "qd,kd->qk"}> : () -> ()
    %cst_179 = arith.constant dense<0.000000e+00> : vector<32x32xf32>
    %302 = tpu.matmul %299, %300, %cst_179 {dimension_numbers = #tpu.dot_dimension_numbers<[1], [1], [0], [0], [0, 0, 1, 0], [], []>} : vector<32x16xbf16>, vector<32x16xbf16>, vector<32x32xf32> -> vector<32x32xf32>
    "tpu.trace_stop"() : () -> ()
    %cst_180 = arith.constant 2.500000e-01 : f32
    %303 = vector.broadcast %cst_180 : f32 to vector<32x32xf32>
    %304 = arith.mulf %302, %303 : vector<32x32xf32>
    %305 = arith.addf %304, %104 : vector<32x32xf32>
    %cst_181 = arith.constant dense<0xFF800000> : vector<32xf32>
    %306 = vector.multi_reduction <maximumf>, %305, %cst_181 [1] : vector<32x32xf32> to vector<32xf32>
    %307 = vector.shape_cast %306 : vector<32xf32> to vector<32x1xf32>
    %308 = vector.broadcast %307 : vector<32x1xf32> to vector<32x32xf32>
    %309 = arith.subf %305, %308 : vector<32x32xf32>
    %310 = math.exp %309 : vector<32x32xf32>
    %cst_182 = arith.constant dense<0.000000e+00> : vector<32xf32>
    %311 = vector.multi_reduction <add>, %310, %cst_182 [1] : vector<32x32xf32> to vector<32xf32>
    %312 = vector.shape_cast %311 : vector<32xf32> to vector<32x1xf32>
    %313 = tpu.reciprocal %312 {approx = true} : vector<32x1xf32> -> vector<32x1xf32>
    %314 = vector.broadcast %313 : vector<32x1xf32> to vector<32x32xf32>
    %315 = arith.mulf %310, %314 : vector<32x32xf32>
    %316 = arith.truncf %315 : vector<32x32xf32> to vector<32x32xbf16>
    %cst_183 = arith.constant dense<0.000000e+00> : vector<32x16xf32>
    %317 = tpu.matmul %316, %301, %cst_183 {dimension_numbers = #tpu.dot_dimension_numbers<[1], [0], [0], [1], [0, 0, 1, 1], [], []>} : vector<32x32xbf16>, vector<32x16xbf16>, vector<32x16xf32> -> vector<32x16xf32>
    %318 = vector.extract_strided_slice %279 {offsets = [0, 32], sizes = [32, 16], strides = [1, 1]} : vector<32x192xbf16> to vector<32x16xbf16>
    %319 = vector.extract_strided_slice %279 {offsets = [0, 96], sizes = [32, 16], strides = [1, 1]} : vector<32x192xbf16> to vector<32x16xbf16>
    %320 = vector.extract_strided_slice %279 {offsets = [0, 160], sizes = [32, 16], strides = [1, 1]} : vector<32x192xbf16> to vector<32x16xbf16>
    "tpu.trace_start"() <{level = 10 : i32, message = "qd,kd->qk"}> : () -> ()
    %cst_184 = arith.constant dense<0.000000e+00> : vector<32x32xf32>
    %321 = tpu.matmul %318, %319, %cst_184 {dimension_numbers = #tpu.dot_dimension_numbers<[1], [1], [0], [0], [0, 0, 1, 0], [], []>} : vector<32x16xbf16>, vector<32x16xbf16>, vector<32x32xf32> -> vector<32x32xf32>
    "tpu.trace_stop"() : () -> ()
    %cst_185 = arith.constant 2.500000e-01 : f32
    %322 = vector.broadcast %cst_185 : f32 to vector<32x32xf32>
    %323 = arith.mulf %321, %322 : vector<32x32xf32>
    %324 = arith.addf %323, %104 : vector<32x32xf32>
    %cst_186 = arith.constant dense<0xFF800000> : vector<32xf32>
    %325 = vector.multi_reduction <maximumf>, %324, %cst_186 [1] : vector<32x32xf32> to vector<32xf32>
    %326 = vector.shape_cast %325 : vector<32xf32> to vector<32x1xf32>
    %327 = vector.broadcast %326 : vector<32x1xf32> to vector<32x32xf32>
    %328 = arith.subf %324, %327 : vector<32x32xf32>
    %329 = math.exp %328 : vector<32x32xf32>
    %cst_187 = arith.constant dense<0.000000e+00> : vector<32xf32>
    %330 = vector.multi_reduction <add>, %329, %cst_187 [1] : vector<32x32xf32> to vector<32xf32>
    %331 = vector.shape_cast %330 : vector<32xf32> to vector<32x1xf32>
    %332 = tpu.reciprocal %331 {approx = true} : vector<32x1xf32> -> vector<32x1xf32>
    %333 = vector.broadcast %332 : vector<32x1xf32> to vector<32x32xf32>
    %334 = arith.mulf %329, %333 : vector<32x32xf32>
    %335 = arith.truncf %334 : vector<32x32xf32> to vector<32x32xbf16>
    %cst_188 = arith.constant dense<0.000000e+00> : vector<32x16xf32>
    %336 = tpu.matmul %335, %320, %cst_188 {dimension_numbers = #tpu.dot_dimension_numbers<[1], [0], [0], [1], [0, 0, 1, 1], [], []>} : vector<32x32xbf16>, vector<32x16xbf16>, vector<32x16xf32> -> vector<32x16xf32>
    %337 = vector.extract_strided_slice %279 {offsets = [0, 48], sizes = [32, 16], strides = [1, 1]} : vector<32x192xbf16> to vector<32x16xbf16>
    %338 = vector.extract_strided_slice %279 {offsets = [0, 112], sizes = [32, 16], strides = [1, 1]} : vector<32x192xbf16> to vector<32x16xbf16>
    %339 = vector.extract_strided_slice %279 {offsets = [0, 176], sizes = [32, 16], strides = [1, 1]} : vector<32x192xbf16> to vector<32x16xbf16>
    "tpu.trace_start"() <{level = 10 : i32, message = "qd,kd->qk"}> : () -> ()
    %cst_189 = arith.constant dense<0.000000e+00> : vector<32x32xf32>
    %340 = tpu.matmul %337, %338, %cst_189 {dimension_numbers = #tpu.dot_dimension_numbers<[1], [1], [0], [0], [0, 0, 1, 0], [], []>} : vector<32x16xbf16>, vector<32x16xbf16>, vector<32x32xf32> -> vector<32x32xf32>
    "tpu.trace_stop"() : () -> ()
    %cst_190 = arith.constant 2.500000e-01 : f32
    %341 = vector.broadcast %cst_190 : f32 to vector<32x32xf32>
    %342 = arith.mulf %340, %341 : vector<32x32xf32>
    %343 = arith.addf %342, %104 : vector<32x32xf32>
    %cst_191 = arith.constant dense<0xFF800000> : vector<32xf32>
    %344 = vector.multi_reduction <maximumf>, %343, %cst_191 [1] : vector<32x32xf32> to vector<32xf32>
    %345 = vector.shape_cast %344 : vector<32xf32> to vector<32x1xf32>
    %346 = vector.broadcast %345 : vector<32x1xf32> to vector<32x32xf32>
    %347 = arith.subf %343, %346 : vector<32x32xf32>
    %348 = math.exp %347 : vector<32x32xf32>
    %cst_192 = arith.constant dense<0.000000e+00> : vector<32xf32>
    %349 = vector.multi_reduction <add>, %348, %cst_192 [1] : vector<32x32xf32> to vector<32xf32>
    %350 = vector.shape_cast %349 : vector<32xf32> to vector<32x1xf32>
    %351 = tpu.reciprocal %350 {approx = true} : vector<32x1xf32> -> vector<32x1xf32>
    %352 = vector.broadcast %351 : vector<32x1xf32> to vector<32x32xf32>
    %353 = arith.mulf %348, %352 : vector<32x32xf32>
    %354 = arith.truncf %353 : vector<32x32xf32> to vector<32x32xbf16>
    %cst_193 = arith.constant dense<0.000000e+00> : vector<32x16xf32>
    %355 = tpu.matmul %354, %339, %cst_193 {dimension_numbers = #tpu.dot_dimension_numbers<[1], [0], [0], [1], [0, 0, 1, 1], [], []>} : vector<32x32xbf16>, vector<32x16xbf16>, vector<32x16xf32> -> vector<32x16xf32>
    %356 = tpu.concatenate %298, %317, %336, %355 in 1 : vector<32x16xf32>, vector<32x16xf32>, vector<32x16xf32>, vector<32x16xf32> -> vector<32x64xf32>
    %357 = arith.truncf %356 : vector<32x64xf32> to vector<32x64xbf16>
    %c1_194 = arith.constant 1 : index
    %c0_195 = arith.constant 0 : index
    %c0_196 = arith.constant 0 : index
    %358 = vector.load %arg14[%c1_194, %c0_195, %c0_196] : memref<2x64x64xbf16, #tpu.memory_space<vmem>>, vector<1x64x64xbf16>
    %359 = vector.shape_cast %358 : vector<1x64x64xbf16> to vector<64x64xbf16>
    %cst_197 = arith.constant dense<0.000000e+00> : vector<32x64xf32>
    %360 = tpu.matmul %357, %359, %cst_197 {dimension_numbers = #tpu.dot_dimension_numbers<[1], [0], [0], [1], [0, 0, 1, 1], [], []>} : vector<32x64xbf16>, vector<64x64xbf16>, vector<32x64xf32> -> vector<32x64xf32>
    %c1_198 = arith.constant 1 : index
    %c0_199 = arith.constant 0 : index
    %c0_200 = arith.constant 0 : index
    %361 = vector.load %arg15[%c1_198, %c0_199, %c0_200] : memref<2x1x64xf32, #tpu.memory_space<vmem>>, vector<1x1x64xf32>
    %362 = vector.shape_cast %361 : vector<1x1x64xf32> to vector<1x64xf32>
    %363 = vector.broadcast %362 : vector<1x64xf32> to vector<32x64xf32>
    %364 = arith.addf %360, %363 : vector<32x64xf32>
    %365 = arith.addf %270, %364 : vector<32x64xf32>
    %cst_201 = arith.constant dense<0.000000e+00> : vector<32xf32>
    %366 = vector.multi_reduction <add>, %365, %cst_201 [1] : vector<32x64xf32> to vector<32xf32>
    %367 = vector.shape_cast %366 : vector<32xf32> to vector<32x1xf32>
    %cst_202 = arith.constant 6.400000e+01 : f32
    %368 = vector.broadcast %cst_202 : f32 to vector<32x1xf32>
    %369 = arith.divf %367, %368 : vector<32x1xf32>
    %370 = vector.broadcast %369 : vector<32x1xf32> to vector<32x64xf32>
    %371 = arith.subf %365, %370 : vector<32x64xf32>
    %372 = arith.mulf %371, %371 : vector<32x64xf32>
    %cst_203 = arith.constant dense<0.000000e+00> : vector<32xf32>
    %373 = vector.multi_reduction <add>, %372, %cst_203 [1] : vector<32x64xf32> to vector<32xf32>
    %374 = vector.shape_cast %373 : vector<32xf32> to vector<32x1xf32>
    %cst_204 = arith.constant 6.400000e+01 : f32
    %375 = vector.broadcast %cst_204 : f32 to vector<32x1xf32>
    %376 = arith.divf %374, %375 : vector<32x1xf32>
    %377 = vector.broadcast %369 : vector<32x1xf32> to vector<32x64xf32>
    %378 = arith.subf %365, %377 : vector<32x64xf32>
    %cst_205 = arith.constant 9.99999974E-6 : f32
    %379 = vector.broadcast %cst_205 : f32 to vector<32x1xf32>
    %380 = arith.addf %376, %379 : vector<32x1xf32>
    %381 = math.rsqrt %380 : vector<32x1xf32>
    %382 = vector.broadcast %381 : vector<32x1xf32> to vector<32x64xf32>
    %383 = arith.mulf %378, %382 : vector<32x64xf32>
    %c1_206 = arith.constant 1 : index
    %c0_207 = arith.constant 0 : index
    %c0_208 = arith.constant 0 : index
    %384 = vector.load %arg20[%c1_206, %c0_207, %c0_208] : memref<2x1x64xf32, #tpu.memory_space<vmem>>, vector<1x1x64xf32>
    %385 = vector.shape_cast %384 : vector<1x1x64xf32> to vector<1x64xf32>
    %386 = vector.broadcast %385 : vector<1x64xf32> to vector<32x64xf32>
    %387 = arith.mulf %383, %386 : vector<32x64xf32>
    %c1_209 = arith.constant 1 : index
    %c0_210 = arith.constant 0 : index
    %c0_211 = arith.constant 0 : index
    %388 = vector.load %arg21[%c1_209, %c0_210, %c0_211] : memref<2x1x64xf32, #tpu.memory_space<vmem>>, vector<1x1x64xf32>
    %389 = vector.shape_cast %388 : vector<1x1x64xf32> to vector<1x64xf32>
    %390 = vector.broadcast %389 : vector<1x64xf32> to vector<32x64xf32>
    %391 = arith.addf %387, %390 : vector<32x64xf32>
    %392 = arith.truncf %391 : vector<32x64xf32> to vector<32x64xbf16>
    %c1_212 = arith.constant 1 : index
    %c0_213 = arith.constant 0 : index
    %c0_214 = arith.constant 0 : index
    %393 = vector.load %arg16[%c1_212, %c0_213, %c0_214] : memref<2x64x128xbf16, #tpu.memory_space<vmem>>, vector<1x64x128xbf16>
    %394 = vector.shape_cast %393 : vector<1x64x128xbf16> to vector<64x128xbf16>
    %cst_215 = arith.constant dense<0.000000e+00> : vector<32x128xf32>
    %395 = tpu.matmul %392, %394, %cst_215 {dimension_numbers = #tpu.dot_dimension_numbers<[1], [0], [0], [1], [0, 0, 1, 1], [], []>} : vector<32x64xbf16>, vector<64x128xbf16>, vector<32x128xf32> -> vector<32x128xf32>
    %c1_216 = arith.constant 1 : index
    %c0_217 = arith.constant 0 : index
    %c0_218 = arith.constant 0 : index
    %396 = vector.load %arg17[%c1_216, %c0_217, %c0_218] : memref<2x1x128xf32, #tpu.memory_space<vmem>>, vector<1x1x128xf32>
    %397 = vector.shape_cast %396 : vector<1x1x128xf32> to vector<1x128xf32>
    %398 = vector.broadcast %397 : vector<1x128xf32> to vector<32x128xf32>
    %399 = arith.addf %395, %398 : vector<32x128xf32>
    %cst_219 = arith.constant 0.000000e+00 : f32
    %400 = vector.broadcast %cst_219 : f32 to vector<32x128xf32>
    %401 = arith.maximumf %399, %400 : vector<32x128xf32>
    %402 = arith.truncf %401 : vector<32x128xf32> to vector<32x128xbf16>
    %c1_220 = arith.constant 1 : index
    %c0_221 = arith.constant 0 : index
    %c0_222 = arith.constant 0 : index
    %403 = vector.load %arg18[%c1_220, %c0_221, %c0_222] : memref<2x128x64xbf16, #tpu.memory_space<vmem>>, vector<1x128x64xbf16>
    %404 = vector.shape_cast %403 : vector<1x128x64xbf16> to vector<128x64xbf16>
    %cst_223 = arith.constant dense<0.000000e+00> : vector<32x64xf32>
    %405 = tpu.matmul %402, %404, %cst_223 {dimension_numbers = #tpu.dot_dimension_numbers<[1], [0], [0], [1], [0, 0, 1, 1], [], []>} : vector<32x128xbf16>, vector<128x64xbf16>, vector<32x64xf32> -> vector<32x64xf32>
    %c1_224 = arith.constant 1 : index
    %c0_225 = arith.constant 0 : index
    %c0_226 = arith.constant 0 : index
    %406 = vector.load %arg19[%c1_224, %c0_225, %c0_226] : memref<2x1x64xf32, #tpu.memory_space<vmem>>, vector<1x1x64xf32>
    %407 = vector.shape_cast %406 : vector<1x1x64xf32> to vector<1x64xf32>
    %408 = vector.broadcast %407 : vector<1x64xf32> to vector<32x64xf32>
    %409 = arith.addf %405, %408 : vector<32x64xf32>
    %410 = arith.addf %391, %409 : vector<32x64xf32>
    %cst_227 = arith.constant dense<0.000000e+00> : vector<32xf32>
    %411 = vector.multi_reduction <add>, %410, %cst_227 [1] : vector<32x64xf32> to vector<32xf32>
    %412 = vector.shape_cast %411 : vector<32xf32> to vector<32x1xf32>
    %cst_228 = arith.constant 6.400000e+01 : f32
    %413 = vector.broadcast %cst_228 : f32 to vector<32x1xf32>
    %414 = arith.divf %412, %413 : vector<32x1xf32>
    %415 = vector.broadcast %414 : vector<32x1xf32> to vector<32x64xf32>
    %416 = arith.subf %410, %415 : vector<32x64xf32>
    %417 = arith.mulf %416, %416 : vector<32x64xf32>
    %cst_229 = arith.constant dense<0.000000e+00> : vector<32xf32>
    %418 = vector.multi_reduction <add>, %417, %cst_229 [1] : vector<32x64xf32> to vector<32xf32>
    %419 = vector.shape_cast %418 : vector<32xf32> to vector<32x1xf32>
    %cst_230 = arith.constant 6.400000e+01 : f32
    %420 = vector.broadcast %cst_230 : f32 to vector<32x1xf32>
    %421 = arith.divf %419, %420 : vector<32x1xf32>
    %422 = vector.broadcast %414 : vector<32x1xf32> to vector<32x64xf32>
    %423 = arith.subf %410, %422 : vector<32x64xf32>
    %cst_231 = arith.constant 9.99999974E-6 : f32
    %424 = vector.broadcast %cst_231 : f32 to vector<32x1xf32>
    %425 = arith.addf %421, %424 : vector<32x1xf32>
    %426 = math.rsqrt %425 : vector<32x1xf32>
    %427 = vector.broadcast %426 : vector<32x1xf32> to vector<32x64xf32>
    %428 = arith.mulf %423, %427 : vector<32x64xf32>
    %c1_232 = arith.constant 1 : index
    %c0_233 = arith.constant 0 : index
    %c0_234 = arith.constant 0 : index
    %429 = vector.load %arg22[%c1_232, %c0_233, %c0_234] : memref<2x1x64xf32, #tpu.memory_space<vmem>>, vector<1x1x64xf32>
    %430 = vector.shape_cast %429 : vector<1x1x64xf32> to vector<1x64xf32>
    %431 = vector.broadcast %430 : vector<1x64xf32> to vector<32x64xf32>
    %432 = arith.mulf %428, %431 : vector<32x64xf32>
    %c1_235 = arith.constant 1 : index
    %c0_236 = arith.constant 0 : index
    %c0_237 = arith.constant 0 : index
    %433 = vector.load %arg23[%c1_235, %c0_236, %c0_237] : memref<2x1x64xf32, #tpu.memory_space<vmem>>, vector<1x1x64xf32>
    %434 = vector.shape_cast %433 : vector<1x1x64xf32> to vector<1x64xf32>
    %435 = vector.broadcast %434 : vector<1x64xf32> to vector<32x64xf32>
    %436 = arith.addf %432, %435 : vector<32x64xf32>
    %c0_238 = arith.constant 0 : index
    %c0_239 = arith.constant 0 : index
    %437 = vector.load %arg26[%c0_238, %c0_239] : memref<136x64xf32, #tpu.memory_space<vmem>>, vector<32x64xf32>
    tpu.vector_store %arg26[%c0_238, %c0_239], %436 {strides = array<i32>} : memref<136x64xf32, #tpu.memory_space<vmem>>, vector<32x64xf32>,
    %c0_240 = arith.constant 0 : index
    %c0_241 = arith.constant 0 : index
    %438 = tpu.strided_load %arg26[%c0_240, %c0_241] {strides = array<i32: 16, 1>} : memref<136x64xf32, #tpu.memory_space<vmem>>, vector<2x64xf32>
    %c0_242 = arith.constant 0 : index
    %c0_243 = arith.constant 0 : index
    %439 = vector.load %arg24[%c0_242, %c0_243] : memref<2x64xf32, #tpu.memory_space<vmem>>, vector<2x64xf32>
    tpu.vector_store %arg24[%c0_242, %c0_243], %438 {strides = array<i32>} : memref<2x64xf32, #tpu.memory_space<vmem>>, vector<2x64xf32>,
    return
  }
}

</mosaic_0001>

<bundles_post_ra>
// kernel: tpu_custom_call.1
= control target key start
LH: loop header
LB: loop body
LE: loop exit
PB: predicated region body
PF: predicated region fallthrough
CT: control target
= control target key end

     0   :  { %s7011_s0 = inlined_call_operand.vmem [shape: f32[136,4], index: 0, kind: input, shape index: {}]   ;;  %s7012_s1 = inlined_call_operand.vmem [shape: f32[128,1], index: 1, kind: input, shape index: {}]   ;;  %s7013_s2 = inlined_call_operand.vmem [shape: f32[32,1], index: 2, kind: input, shape index: {}]   ;;  %s7014_s3 = inlined_call_operand.vmem [shape: f32[32,64], index: 3, kind: input, shape index: {}]   ;;  %s7015_s4 = inlined_call_operand.vmem [shape: s32[32,1], index: 4, kind: input, shape index: {}]   ;;  %s7016_s5 = inlined_call_operand.vmem [shape: s32[1,32], index: 5, kind: input, shape index: {}]   ;;  %s7017_s6 = inlined_call_operand.vmem [shape: bf16[12,128], index: 6, kind: input, shape index: {}]   ;;  %s7018_s7 = inlined_call_operand.vmem [shape: f32[1,128], index: 7, kind: input, shape index: {}]   ;;  %s7019_s8 = inlined_call_operand.vmem [shape: bf16[384,64], index: 8, kind: input, shape index: {}]   ;;  %s7020_s9 = inlined_call_operand.vmem [shape: f32[1,64], index: 9, kind: input, shape index: {}]   ;;  %s7021_s10 = inlined_call_operand.vmem [shape: bf16[192,64], index: 10, kind: input, shape index: {}]   ;;  %s7022_s11 = inlined_call_operand.vmem [shape: f32[1,64], index: 11, kind: input, shape index: {}]   ;;  %s7023_s12 = inlined_call_operand.vmem [shape: bf16[2,64,192], index: 12, kind: input, shape index: {}]   ;;  %s7024_s13 = inlined_call_operand.vmem [shape: f32[2,1,192], index: 13, kind: input, shape index: {}]   ;;  %s7025_s14 = inlined_call_operand.vmem [shape: bf16[2,64,64], index: 14, kind: input, shape index: {}]   ;;  %s7026_s15 = inlined_call_operand.vmem [shape: f32[2,1,64], index: 15, kind: input, shape index: {}]   ;;  %s7027_s16 = inlined_call_operand.vmem [shape: bf16[2,64,128], index: 16, kind: input, shape index: {}]   ;;  %s7028_s17 = inlined_call_operand.vmem [shape: f32[2,1,128], index: 17, kind: input, shape index: {}]   ;;  %s7029_s18 = inlined_call_operand.vmem [shape: bf16[2,128,64], index: 18, kind: input, shape index: {}]   ;;  %s7030_s19 = inlined_call_operand.vmem [shape: f32[2,1,64], index: 19, kind: input, shape index: {}]   ;;  %s7031_s20 = inlined_call_operand.vmem [shape: f32[2,1,64], index: 20, kind: input, shape index: {}]   ;;  %s7032_s21 = inlined_call_operand.vmem [shape: f32[2,1,64], index: 21, kind: input, shape index: {}]   ;;  %s7033_s22 = inlined_call_operand.vmem [shape: f32[2,1,64], index: 22, kind: input, shape index: {}]   ;;  %s7034_s23 = inlined_call_operand.vmem [shape: f32[2,1,64], index: 23, kind: input, shape index: {}]   ;;  %s7035_s24 = inlined_call_operand.hbm [shape: f32[2,64], index: 24, kind: output, shape index: {}]  }
   0x1   :  { %7043 = sst [smem:[#allocation7_spill]] %s7011_s0 }
   0x2   :  { %7044 = sst [smem:[#allocation8_spill]] %s7012_s1 }
   0x3   :  { %7045 = sst [smem:[#allocation9_spill]] %s7013_s2 }
   0x4   :  { %7046 = sst [smem:[#allocation10_spill]] %s7014_s3 }
   0x5   :  { %7047 = sst [smem:[#allocation11_spill]] %s7015_s4 }
   0x6   :  { %7048 = sst [smem:[#allocation12_spill]] %s7016_s5 }
   0x7   :  { %7049 = sst [smem:[#allocation13_spill]] %s7017_s6 }
   0x8   :  { %7050 = sst [smem:[#allocation14_spill]] %s7018_s7 }
   0x9   :  { %7051 = sst [smem:[#allocation15_spill]] %s7019_s8 }
   0xa   :  { %s7052_s27 = sld [smem:[#allocation7_spill]]  ;;  %s5237_s25 = smov 4  }
   0xb   :  { %s5238_s28 = smov 8  }
  0x10   :  { %v130_v0 = vld [vmem:[%s7052_s27 + $0x1] sm:$0xff]  ;;  %v131_v1 = vld [vmem:[%s7052_s27 + $0x9] sm:$0xff]  ;;  %v132_v3 = vld [vmem:[%s7052_s27 + $0x11] sm:$0xff] }
  0x11   :  { %v4803_v2 = vpack.i.bf16 %v131_v1, %v130_v0  ;;  %v133_v4 = vld [vmem:[%s7052_s27 + $0x19] sm:$0xff]  ;;  %v134_v6 = vld [vmem:[%s7052_s27 + $0x21] sm:$0xff]  ;;  %v135_v7 = vld [vmem:[%s7052_s27 + $0x29] sm:$0xff] }
  0x12   :  { %v4813_v5 = vpack.i.bf16 %v133_v4, %v132_v3  ;;  %v146_v8 = vld [vmem:[%s7052_s27 + $0x2] sm:$0xff]  ;;  %v147_v9 = vld [vmem:[%s7052_s27 + $0xa] sm:$0xff]  ;;  %v4823_v10 = vpack.i.bf16 %v135_v7, %v134_v6  ;;  %v148_v11 = vld [vmem:[%s7052_s27 + $0x12] sm:$0xff] }
  0x13   :  { %4804 = vrot.lane.b32.xlu0 %v4803_v2, %s5237_s25  ;;  %v149_v12 = vld [vmem:[%s7052_s27 + $0x1a] sm:$0xff]  ;;  %v4808_v13 = vpack.i.bf16 %v147_v9, %v146_v8  ;;  %v150_v14 = vld [vmem:[%s7052_s27 + $0x22] sm:$0xff]  ;;  %v151_v15 = vld [vmem:[%s7052_s27 + $0x2a] sm:$0xff] }
  0x14   :  { %4814 = vrot.lane.b32.xlu1 %v4813_v5, %s5237_s25  ;;  %4824 = vrot.lane.b32.xlu2 %v4823_v10, %s5237_s25  ;;  %v4818_v16 = vpack.i.bf16 %v149_v12, %v148_v11  ;;  %v136_v17 = vld [vmem:[%s7052_s27 + $0x31] sm:$0xff]  ;;  %v137_v18 = vld [vmem:[%s7052_s27 + $0x39] sm:$0xff]  ;;  %v4828_v19 = vpack.i.bf16 %v151_v15, %v150_v14 }
  0x15   :  { %v152_v20 = vld [vmem:[%s7052_s27 + $0x32] sm:$0xff]  ;;  %v153_v21 = vld [vmem:[%s7052_s27 + $0x3a] sm:$0xff]  ;;  %v139_v23 = vld [vmem:[%s7052_s27 + $0x49] sm:$0xff]  ;;  %v4833_v24 = vpack.i.bf16 %v137_v18, %v136_v17 }
  0x16   :  { %v138_v22 = vld [vmem:[%s7052_s27 + $0x41] sm:$0xff] }
  0x1b   :  { %4809 = vrot.lane.b32.xlu0 %v4808_v13, %s5238_s28 }
  0x1c   :  { %4819 = vrot.lane.b32.xlu1 %v4818_v16, %s5238_s28  ;;  %4829 = vrot.lane.b32.xlu2 %v4828_v19, %s5238_s28 }
  0x1d   :  { %29 = vsyncpa [#allocation5], 0  ;;  %v4838_v25 = vpack.i.bf16 %v153_v21, %v152_v20  ;;  %v4843_v26 = vpack.i.bf16 %v139_v23, %v138_v22  ;;  %v154_v27 = vld [vmem:[%s7052_s27 + $0x42] sm:$0xff]  ;;  %v155_v28 = vld [vmem:[%s7052_s27 + $0x4a] sm:$0xff]  ;;  %s7053_s3 = sld [smem:[#allocation8_spill]]  ;;  %v5239_v45 = vmov 0  }
  0x1e   :  { %v140_v29 = vld [vmem:[%s7052_s27 + $0x51] sm:$0xff]  ;;  %v141_v30 = vld [vmem:[%s7052_s27 + $0x59] sm:$0xff]  ;;  %v4848_v31 = vpack.i.bf16 %v155_v28, %v154_v27  ;;  %v142_v36 = vld [vmem:[%s7052_s27 + $0x61] sm:$0xff]  ;;  %4883 = vset.pattern.permute.xlu1 %v5239_v45  ;;  %4885 = vset.pattern.permute.xlu0 %v5239_v45  ;;  %s7054_s2 = sld [smem:[#allocation13_spill]]  ;;  %vm368_vm1 = vcmask 1045504   ;;  %vm290_vm14 = vcmask 31744  }
  0x1f   :  { %v156_v32 = vld [vmem:[%s7052_s27 + $0x52] sm:$0xff]  ;;  %v157_v33 = vld [vmem:[%s7052_s27 + $0x5a] sm:$0xff]  ;;  %v4853_v34 = vpack.i.bf16 %v141_v30, %v140_v29  ;;  %v143_v37 = vld [vmem:[%s7052_s27 + $0x69] sm:$0xff]  ;;  %4884 = vset.pattern.permute.xlu2 %v5239_v45  ;;  %vm307_vm15 = vcmask 64512   ;;  %s5242_s5 = smov 112   ;;  %s5243_s26 = smov 48  }
  0x20   :  { %v4858_v35 = vpack.i.bf16 %v157_v33, %v156_v32  ;;  %v158_v38 = vld [vmem:[%s7052_s27 + $0x62] sm:$0xff]  ;;  %v159_v39 = vld [vmem:[%s7052_s27 + $0x6a] sm:$0xff]  ;;  %v4863_v40 = vpack.i.bf16 %v143_v37, %v142_v36  ;;  %v160_v43 = vld [vmem:[%s7052_s27 + $0x72] sm:$0xff]  ;;  %s7060_s0 = sld [smem:[#allocation12_spill]]  ;;  %s5245_s7 = smov 16  }
  0x21   :  { %v4868_v41 = vpack.i.bf16 %v159_v39, %v158_v38  ;;  %v161_v44 = vld [vmem:[%s7052_s27 + $0x7a] sm:$0xff]  ;;  %v144_v54 = vld [vmem:[%s7052_s27 + $0x71] sm:$0xff]  ;;  %v115_v17 = vld [vmem:[%s7052_s27 + $0x8] sm:$0xff]  ;;  %s5246_s30 = smov 32   ;;  %s5248_s8 = smov 80  }
  0x22   :  { %v4878_v46 = vpack.i.bf16 %v161_v44, %v160_v43  ;;  %v145_v55 = vld [vmem:[%s7052_s27 + $0x79] sm:$0xff]  ;;  %s4177_s6 = sshll.u32 %s7035_s24, 4  ;;  %s4178_s6 = int_to_ptr.hbm [resolvable:$true] %s4177_s6 }
  0x23   :  { %4834 = vrot.lane.b32.xlu0 %v4833_v24, %s5237_s25  ;;  %v469_v42 = vld [vmem:[%s7053_s3] sm:$0xff]  ;;  %v472_v51 = vld [vmem:[%s7053_s3 + $0x18] sm:$0xff]  ;;  %v474_v56 = vld [vmem:[%s7053_s3 + $0x28] sm:$0xff]  ;;  %v4873_v57 = vpack.i.bf16 %v145_v55, %v144_v54 }
  0x24   :  { %4839 = vrot.lane.b32.xlu1 %v4838_v25, %s5238_s28  ;;  %4844 = vrot.lane.b32.xlu2 %v4843_v26, %s5237_s25  ;;  %vm485_vm0 = vcmp.gt.f32.partialorder %v469_v42, 0.0  ;;  %v4188_v48 = vld [vmem:[%s7054_s2] sm:$0xf]  ;;  %v4690_v49 = vld [vmem:[%s7054_s2] sm:$0x30]  ;;  %vm488_vm2 = vcmp.gt.f32.partialorder %v472_v51, 0.0 }
  0x25   :  { %v501_v47 = vsel %vm485_vm0, 1, %v5239_v45  ;;  %v4189_v50 = vor.u32 %v4690_v49, %v4188_v48  ;;  %v504_v53 = vsel %vm488_vm2, 1, %v5239_v45  ;;  %vm490_vm3 = vcmp.gt.f32.partialorder %v474_v56, 0.0  ;;  %v471_v58 = vld [vmem:[%s7053_s3 + $0x10] sm:$0xff]  ;;  %v470_v59 = vld [vmem:[%s7053_s3 + $0x8] sm:$0xff]  ;;  %v476_v62 = vld [vmem:[%s7053_s3 + $0x38] sm:$0xff] }
  0x26   :  { %vm487_vm4 = vcmp.gt.f32.partialorder %v471_v58, 0.0  ;;  %v506_v60 = vsel %vm490_vm3, 1, %v5239_v45  ;;  %vm486_vm5 = vcmp.gt.f32.partialorder %v470_v59, 0.0  ;;  %v477_v63 = vld [vmem:[%s7053_s3 + $0x40] sm:$0xff]  ;;  %vm492_vm6 = vcmp.gt.f32.partialorder %v476_v62, 0.0  ;;  %v480_v4 = vld [vmem:[%s7053_s3 + $0x58] sm:$0xff] }
  0x27   :  { %v370_v52 = vsel %vm368_vm1, %v4189_v50, 0  ;;  %v503_v61 = vsel %vm487_vm4, 1, %v5239_v45  ;;  %v502_v0 = vsel %vm486_vm5, 1, %v5239_v45  ;;  %vm493_vm7 = vcmp.gt.f32.partialorder %v477_v63, 0.0  ;;  %v473_v3 = vld [vmem:[%s7053_s3 + $0x20] sm:$0xff]  ;;  %v479_v5 = vld [vmem:[%s7053_s3 + $0x50] sm:$0xff] }
  0x28   :  { %379 = vmatpush.bf16.msra.mxu0 %v370_v52  ;;  %v508_v1 = vsel %vm492_vm6, 1, %v5239_v45  ;;  %v509_v2 = vsel %vm493_vm7, 1, %v5239_v45  ;;  %vm489_vm8 = vcmp.gt.f32.partialorder %v473_v3, 0.0  ;;  %vm496_vm9 = vcmp.gt.f32.partialorder %v480_v4, 0.0  ;;  %v475_v8 = vld [vmem:[%s7053_s3 + $0x30] sm:$0xff]  ;;  %v482_v11 = vld [vmem:[%s7053_s3 + $0x68] sm:$0xff] }
  0x29   :  { %v505_v7 = vsel %vm489_vm8, 1, %v5239_v45  ;;  %vm495_vm10 = vcmp.gt.f32.partialorder %v479_v5, 0.0  ;;  %v512_v9 = vsel %vm496_vm9, 1, %v5239_v45  ;;  %vm491_vm11 = vcmp.gt.f32.partialorder %v475_v8, 0.0  ;;  %v483_v12 = vld [vmem:[%s7053_s3 + $0x70] sm:$0xff]  ;;  %v114_v16 = vld [vmem:[%s7052_s27] sm:$0xff] }
  0x2a   :  { %v511_v10 = vsel %vm495_vm10, 1, %v5239_v45  ;;  %vm498_vm12 = vcmp.gt.f32.partialorder %v482_v11, 0.0  ;;  %v507_v15 = vsel %vm491_vm11, 1, %v5239_v45  ;;  %vm499_vm13 = vcmp.gt.f32.partialorder %v483_v12, 0.0  ;;  %v478_v29 = vld [vmem:[%s7053_s3 + $0x48] sm:$0xff]  ;;  %v117_v36 = vld [vmem:[%s7052_s27 + $0x18] sm:$0xff] }
  0x2b   :  { %4849 = vrot.lane.b32.xlu0 %v4848_v31, %s5238_s28  ;;  %v514_v18 = vsel %vm498_vm12, 1, %v5239_v45  ;;  %v515_v23 = vsel %vm499_vm13, 1, %v5239_v45  ;;  %vm343_vm0 = vcmask 97280   ;;  %vm494_vm1 = vcmp.gt.f32.partialorder %v478_v29, 0.0  ;;  %v481_v31 = vld [vmem:[%s7053_s3 + $0x60] sm:$0xff]  ;;  %s7056_s2 = sld [smem:[#allocation14_spill]] }
  0x2c   :  { %4854 = vrot.lane.b32.xlu1 %v4853_v34, %s5237_s25  ;;  %4859 = vrot.lane.b32.xlu2 %v4858_v35, %s5238_s28  ;;  %v510_v30 = vsel %vm494_vm1, 1, %v5239_v45  ;;  %v116_v35 = vld [vmem:[%s7052_s27 + $0x10] sm:$0xff]  ;;  %vm497_vm2 = vcmp.gt.f32.partialorder %v481_v31, 0.0  ;;  %v118_v52 = vld [vmem:[%s7052_s27 + $0x20] sm:$0xff] }
  0x33   :  { %4864 = vrot.lane.b32.xlu0 %v4863_v40, %s5237_s25 }
  0x34   :  { %4869 = vrot.lane.b32.xlu1 %v4868_v41, %s5238_s28  ;;  %4874 = vrot.lane.b32.xlu2 %v4873_v57, %s5237_s25  ;;  %v513_v41 = vsel %vm497_vm2, 1, %v5239_v45 }
  0x3b   :  { %4879 = vrot.lane.b32.xlu0 %v4878_v46, %s5238_s28  ;;  %s5247_s28 = smov 96  }
  0x3c   :  { %518 = vperm.xlu1 %4883, %v501_v47   ;;  %521 = vperm.xlu2 %4884, %v502_v0   ;;  %v484_v47 = vld [vmem:[%s7053_s3 + $0x78] sm:$0xff]  ;;  %s7055_s3 = sld [smem:[#allocation15_spill]] }
  0x3d   :  { %vm500_vm3 = vcmp.gt.f32.partialorder %v484_v47, 0.0  ;;  %v127_v47 = vld [vmem:[%s7052_s27 + $0x68] sm:$0xff] }
  0x3e   :  { %v516_v48 = vsel %vm500_vm3, 1, %v5239_v45 }
  0x43   :  { %524 = vperm.xlu0 %4885, %v503_v61  }
  0x44   :  { %527 = vperm.xlu1 %4883, %v504_v53   ;;  %530 = vperm.xlu2 %4884, %v505_v7   ;;  %v119_v53 = vld [vmem:[%s7052_s27 + $0x28] sm:$0xff] }
  0x4b   :  { %539 = vperm.xlu0 %4885, %v508_v1   ;;  %v120_v1 = vld [vmem:[%s7052_s27 + $0x30] sm:$0xff] }
  0x4c   :  { %533 = vperm.xlu1 %4883, %v506_v60   ;;  %536 = vperm.xlu2 %4884, %v507_v15   ;;  %v123_v15 = vld [vmem:[%s7052_s27 + $0x48] sm:$0xff] }
  0x53   :  { %548 = vperm.xlu0 %4885, %v511_v10  }
  0x54   :  { %542 = vperm.xlu1 %4883, %v509_v2   ;;  %545 = vperm.xlu2 %4884, %v510_v30   ;;  %v121_v2 = vld [vmem:[%s7052_s27 + $0x38] sm:$0xff] }
  0x5b   :  { %557 = vperm.xlu0 %4885, %v514_v18  }
  0x5c   :  { %551 = vperm.xlu1 %4883, %v512_v9   ;;  %554 = vperm.xlu2 %4884, %v513_v41  }
  0x64   :  { %560 = vperm.xlu1 %4883, %v515_v23   ;;  %563 = vperm.xlu2 %4884, %v516_v48  }
  0x6e   :  { %v4825_v42 = vpop.permute.xlu2 %4824 }
  0x6f   :  { %v4827_v49 = vunpack.i.h.bf16 %v4825_v42  ;;  %v4826_v50 = vunpack.i.l.bf16 %v4825_v42 }
  0x71   :  { %v295_v56 = vsel %vm290_vm14, %v118_v52, %v4826_v50  ;;  %v296_v57 = vsel %vm290_vm14, %v119_v53, %v4827_v49  ;;  %v4704_v50 = vld [vmem:[%s7055_s3 + $0x68] sm:$0xff] }
  0x76   :  { %v4830_v51 = vpop.permute.xlu2 %4829 }
  0x77   :  { %v4832_v54 = vunpack.i.h.bf16 %v4830_v51  ;;  %v4831_v55 = vunpack.i.l.bf16 %v4830_v51 }
  0x79   :  { %v312_v58 = vsel %vm307_vm15, %v295_v56, %v4831_v55  ;;  %v313_v59 = vsel %vm307_vm15, %v296_v57, %v4832_v54  ;;  %v4703_v55 = vld [vmem:[%s7055_s3 + $0x60] sm:$0xff]  ;;  %v4696_v57 = vld [vmem:[%s7055_s3 + $0x28] sm:$0xff] }
  0x7a   :  { %v326_v60 = vpack.c.bf16 %v313_v59, %v312_v58  ;;  %v4714_v58 = vld [vmem:[%s7055_s3 + $0xb8] sm:$0xff] }
  0x7b   :  { %v4702_v59 = vld [vmem:[%s7055_s3 + $0x58] sm:$0xff]  ;;  %979 = vmatpush.bf16.msra.mxu3 %v4714_v58 }
  0x7e   :  { %v4845_v10 = vpop.permute.xlu2 %4844 }
  0x7f   :  { %v4847_v11 = vunpack.i.h.bf16 %v4845_v10  ;;  %v4846_v12 = vunpack.i.l.bf16 %v4845_v10 }
  0x85   :  { %v4805_v6 = vpop.permute.xlu0 %4804 }
  0x86   :  { %v4807_v13 = vunpack.i.h.bf16 %v4805_v6  ;;  %v4806_v14 = vunpack.i.l.bf16 %v4805_v6  ;;  %v4815_v20 = vpop.permute.xlu1 %4814 }
  0x87   :  { %v4817_v32 = vunpack.i.h.bf16 %v4815_v20  ;;  %v4816_v33 = vunpack.i.l.bf16 %v4815_v20 }
  0x88   :  { %v291_v24 = vsel %vm290_vm14, %v114_v16, %v4806_v14  ;;  %v292_v25 = vsel %vm290_vm14, %v115_v17, %v4807_v13  ;;  %v122_v14 = vld [vmem:[%s7052_s27 + $0x40] sm:$0xff] }
  0x89   :  { %v293_v39 = vsel %vm290_vm14, %v116_v35, %v4816_v33  ;;  %v294_v40 = vsel %vm290_vm14, %v117_v36, %v4817_v32  ;;  %v299_v18 = vsel %vm290_vm14, %v122_v14, %v4846_v12  ;;  %v4706_v36 = vld [vmem:[%s7055_s3 + $0x78] sm:$0xff]  ;;  %v4693_v14 = vld [vmem:[%s7055_s3 + $0x10] sm:$0xff] }
  0x8a   :  { %930 = vmatpush.bf16.msra.mxu2 %v4706_v36 }
  0x8d   :  { %v4810_v19 = vpop.permute.xlu0 %4809 }
  0x8e   :  { %v4812_v21 = vunpack.i.h.bf16 %v4810_v19  ;;  %v4811_v22 = vunpack.i.l.bf16 %v4810_v19  ;;  %v4820_v34 = vpop.permute.xlu1 %4819  ;;  %v300_v19 = vsel %vm290_vm14, %v123_v15, %v4847_v11  ;;  %v4711_v15 = vld [vmem:[%s7055_s3 + $0xa0] sm:$0xff] }
  0x8f   :  { %v4822_v37 = vunpack.i.h.bf16 %v4820_v34  ;;  %v4821_v38 = vunpack.i.l.bf16 %v4820_v34 }
  0x90   :  { %v308_v26 = vsel %vm307_vm15, %v291_v24, %v4811_v22  ;;  %v309_v27 = vsel %vm307_vm15, %v292_v25, %v4812_v21 }
  0x91   :  { %v324_v28 = vpack.c.bf16 %v309_v27, %v308_v26  ;;  %v310_v43 = vsel %vm307_vm15, %v293_v39, %v4821_v38  ;;  %v311_v44 = vsel %vm307_vm15, %v294_v40, %v4822_v37  ;;  %v4860_v26 = vpop.permute.xlu2 %4859  ;;  %v124_v27 = vld [vmem:[%s7052_s27 + $0x50] sm:$0xff]  ;;  %v4698_v38 = vld [vmem:[%s7055_s3 + $0x38] sm:$0xff]  ;;  %v5240_v40 = vmov 0.0  }
  0x92   :  { %v325_v46 = vpack.c.bf16 %v311_v44, %v310_v43  ;;  %v4862_v29 = vunpack.i.h.bf16 %v4860_v26  ;;  %v4861_v30 = vunpack.i.l.bf16 %v4860_v26  ;;  %v4705_v39 = vld [vmem:[%s7055_s3 + $0x70] sm:$0xff]  ;;  %79 = vst [vmem:[#allocation2] sm:$0xff] %v5240_v40  ;;  %881 = vmatpush.bf16.msra.mxu1 %v4698_v38 }
  0x93   :  { %4190 = vmatmul.msk.bf16.vlgmr.msra.gmra.mxu0 %vm343_vm0, %v324_v28  ;;  %v125_v28 = vld [vmem:[%s7052_s27 + $0x58] sm:$0xff]  ;;  %v4697_v44 = vld [vmem:[%s7055_s3 + $0x30] sm:$0xff]  ;;  %80 = vst [vmem:[#allocation2 + $0x8] sm:$0xff] %v5240_v40  ;;  %931 = vmatpush.bf16.msra.mxu2 %v4705_v39 }
  0x94   :  { %81 = vst [vmem:[#allocation2 + $0x10] sm:$0xff] %v5240_v40 }
  0x95   :  { %v4835_v61 = vpop.permute.xlu0 %4834  ;;  %82 = vst [vmem:[#allocation2 + $0x18] sm:$0xff] %v5240_v40 }
  0x96   :  { %v4837_v62 = vunpack.i.h.bf16 %v4835_v61  ;;  %v4836_v63 = vunpack.i.l.bf16 %v4835_v61  ;;  %v4840_v0 = vpop.permute.xlu1 %4839  ;;  %83 = vst [vmem:[#allocation2 + $0x20] sm:$0xff] %v5240_v40  ;;  %882 = vmatpush.bf16.msra.mxu1 %v4697_v44  ;;  %v4695_v61 = vld [vmem:[%s7055_s3 + $0x20] sm:$0xff] }
  0x97   :  { %v4842_v3 = vunpack.i.h.bf16 %v4840_v0  ;;  %v4841_v4 = vunpack.i.l.bf16 %v4840_v0  ;;  %84 = vst [vmem:[#allocation2 + $0x28] sm:$0xff] %v5240_v40  ;;  %932 = vmatpush.bf16.msra.mxu2 %v4704_v50 }
  0x98   :  { %v297_v5 = vsel %vm290_vm14, %v120_v1, %v4836_v63  ;;  %v298_v6 = vsel %vm290_vm14, %v121_v2, %v4837_v62  ;;  %85 = vst [vmem:[#allocation2 + $0x30] sm:$0xff] %v5240_v40  ;;  %v4713_v62 = vld [vmem:[%s7055_s3 + $0xb0] sm:$0xff] }
  0x99   :  { %v314_v7 = vsel %vm307_vm15, %v297_v5, %v4841_v4  ;;  %v315_v8 = vsel %vm307_vm15, %v298_v6, %v4842_v3  ;;  %86 = vst [vmem:[#allocation2 + $0x38] sm:$0xff] %v5240_v40  ;;  %v4701_v63 = vld [vmem:[%s7055_s3 + $0x50] sm:$0xff]  ;;  %v129_v4 = vld [vmem:[%s7052_s27 + $0x78] sm:$0xff]  ;;  %980 = vmatpush.bf16.msra.mxu3 %v4713_v62 }
  0x9a   :  { %v327_v9 = vpack.c.bf16 %v315_v8, %v314_v7  ;;  %87 = vst [vmem:[#allocation2 + $0x40] sm:$0xff] %v5240_v40  ;;  %883 = vmatpush.bf16.msra.mxu1 %v4696_v57  ;;  %v128_v3 = vld [vmem:[%s7052_s27 + $0x70] sm:$0xff]  ;;  %v4694_v7 = vld [vmem:[%s7055_s3 + $0x18] sm:$0xff]  ;;  %v4712_v8 = vld [vmem:[%s7055_s3 + $0xa8] sm:$0xff] }
  0x9b   :  { %88 = vst [vmem:[#allocation2 + $0x48] sm:$0xff] %v5240_v40  ;;  %933 = vmatpush.bf16.msra.mxu2 %v4703_v55 }
  0x9c   :  { %89 = vst [vmem:[#allocation2 + $0x50] sm:$0xff] %v5240_v40 }
  0x9d   :  { %v4850_v13 = vpop.permute.xlu0 %4849  ;;  %90 = vst [vmem:[#allocation2 + $0x58] sm:$0xff] %v5240_v40  ;;  %981 = vmatpush.bf16.msra.mxu3 %v4712_v8 }
  0x9e   :  { %v4852_v16 = vunpack.i.h.bf16 %v4850_v13  ;;  %v4851_v17 = vunpack.i.l.bf16 %v4850_v13  ;;  %v4855_v23 = vpop.permute.xlu1 %4854  ;;  %91 = vst [vmem:[#allocation2 + $0x60] sm:$0xff] %v5240_v40  ;;  %884 = vmatpush.bf16.msra.mxu1 %v4695_v61 }
  0x9f   :  { %v4857_v24 = vunpack.i.h.bf16 %v4855_v23  ;;  %v4856_v25 = vunpack.i.l.bf16 %v4855_v23  ;;  %92 = vst [vmem:[#allocation2 + $0x68] sm:$0xff] %v5240_v40  ;;  %934 = vmatpush.bf16.msra.mxu2 %v4702_v59  ;;  %v4707_v23 = vld [vmem:[%s7055_s3 + $0x80] sm:$0xff] }
  0xa0   :  { %v316_v20 = vsel %vm307_vm15, %v299_v18, %v4851_v17  ;;  %v317_v21 = vsel %vm307_vm15, %v300_v19, %v4852_v16  ;;  %93 = vst [vmem:[#allocation2 + $0x70] sm:$0xff] %v5240_v40  ;;  %v4699_v16 = vld [vmem:[%s7055_s3 + $0x40] sm:$0xff]  ;;  %v4692_v18 = vld [vmem:[%s7055_s3 + $0x8] sm:$0xff]  ;;  %v4710_v19 = vld [vmem:[%s7055_s3 + $0x98] sm:$0xff] }
  0xa1   :  { %v328_v22 = vpack.c.bf16 %v317_v21, %v316_v20  ;;  %v301_v31 = vsel %vm290_vm14, %v124_v27, %v4856_v25  ;;  %v302_v32 = vsel %vm290_vm14, %v125_v28, %v4857_v24  ;;  %94 = vst [vmem:[#allocation2 + $0x78] sm:$0xff] %v5240_v40  ;;  %982 = vmatpush.bf16.msra.mxu3 %v4711_v15  ;;  %v4691_v20 = vld [vmem:[%s7055_s3] sm:$0xff]  ;;  %v4709_v21 = vld [vmem:[%s7055_s3 + $0x90] sm:$0xff] }
  0xa2   :  { %v318_v33 = vsel %vm307_vm15, %v301_v31, %v4861_v30  ;;  %v319_v34 = vsel %vm307_vm15, %v302_v32, %v4862_v29  ;;  %95 = vst [vmem:[#allocation2 + $0x80] sm:$0xff] %v5240_v40  ;;  %885 = vmatpush.bf16.msra.mxu1 %v4694_v7  ;;  %v5741_v24 = vld [vmem:[%s7056_s2] ss:$0 sm:$0xff] }
  0xa3   :  { %4191 = vmatmul.msk.bf16.gmra.mxu0 %vm343_vm0, %v325_v46  ;;  %v329_v35 = vpack.c.bf16 %v319_v34, %v318_v33  ;;  %v126_v46 = vld [vmem:[%s7052_s27 + $0x60] sm:$0xff]  ;;  %935 = vmatpush.bf16.msra.mxu2 %v4701_v63  ;;  %s7057_s27 = sld [smem:[#allocation9_spill]] }
  0xa5   :  { %v4865_v37 = vpop.permute.xlu0 %4864  ;;  %983 = vmatpush.bf16.msra.mxu3 %v4710_v19 }
  0xa6   :  { %v4867_v41 = vunpack.i.h.bf16 %v4865_v37  ;;  %v4866_v42 = vunpack.i.l.bf16 %v4865_v37  ;;  %v4870_v43 = vpop.permute.xlu1 %4869  ;;  %886 = vmatpush.bf16.msra.mxu1 %v4693_v14 }
  0xa7   :  { %v4872_v48 = vunpack.i.h.bf16 %v4870_v43  ;;  %v4871_v49 = vunpack.i.l.bf16 %v4870_v43 }
  0xa8   :  { %v303_v51 = vsel %vm290_vm14, %v126_v46, %v4866_v42  ;;  %v304_v52 = vsel %vm290_vm14, %v127_v47, %v4867_v41 }
  0xa9   :  { %v320_v53 = vsel %vm307_vm15, %v303_v51, %v4871_v49  ;;  %v321_v54 = vsel %vm307_vm15, %v304_v52, %v4872_v48  ;;  %984 = vmatpush.bf16.msra.mxu3 %v4709_v21 }
  0xaa   :  { %v330_v56 = vpack.c.bf16 %v321_v54, %v320_v53  ;;  %887 = vmatpush.bf16.msra.mxu1 %v4692_v18 }
  0xad   :  { %v4880_v2 = vpop.permute.xlu0 %4879 }
  0xae   :  { %v4882_v5 = vunpack.i.h.bf16 %v4880_v2  ;;  %v4881_v6 = vunpack.i.l.bf16 %v4880_v2  ;;  %888 = vmatpush.bf16.msra.mxu1 %v4691_v20  ;;  %v519_v27 = vpop.permute.xlu1 %518 }
  0xaf   :  { %vm565_vm4 = vcmp.eq.s32.totalorder %v519_v27, 1 }
  0xb3   :  { %4192 = vmatmul.msk.bf16.gmra.mxu0 %vm343_vm0, %v326_v60  ;;  %v4875_v60 = vpop.permute.xlu2 %4874 }
  0xb4   :  { %v4877_v0 = vunpack.i.h.bf16 %v4875_v60  ;;  %v4876_v1 = vunpack.i.l.bf16 %v4875_v60 }
  0xb5   :  { %v525_v41 = vpop.permute.xlu0 %524 }
  0xb6   :  { %v305_v10 = vsel %vm290_vm14, %v128_v3, %v4876_v1  ;;  %v306_v11 = vsel %vm290_vm14, %v129_v4, %v4877_v0  ;;  %vm567_vm9 = vcmp.eq.s32.totalorder %v525_v41, 1  ;;  %v528_v52 = vpop.permute.xlu1 %527 }
  0xb7   :  { %v322_v12 = vsel %vm307_vm15, %v305_v10, %v4881_v6  ;;  %v323_v13 = vsel %vm307_vm15, %v306_v11, %v4882_v5  ;;  %vm568_vm12 = vcmp.eq.s32.totalorder %v528_v52, 1 }
  0xb8   :  { %v331_v17 = vpack.c.bf16 %v323_v13, %v322_v12  ;;  %vm5190_vm13 = vmpackc.low %vm568_vm12, %vm567_vm9 }
  0xbb   :  { %v522_v33 = vpop.permute.xlu2 %521 }
  0xbc   :  { %vm566_vm6 = vcmp.eq.s32.totalorder %v522_v33, 1 }
  0xbd   :  { %vm5187_vm8 = vmpackc.low %vm566_vm6, %vm565_vm4  ;;  %v540_v27 = vpop.permute.xlu0 %539 }
  0xbe   :  { %v534_v7 = vpop.permute.xlu1 %533 }
  0xbf   :  { %vm570_vm1 = vcmp.eq.s32.totalorder %v534_v7, 1 }
  0xc3   :  { %4193 = vmatmul.msk.bf16.gmra.mxu0 %vm343_vm0, %v327_v9  ;;  %v4700_v9 = vld [vmem:[%s7055_s3 + $0x48] sm:$0xff]  ;;  %v531_v62 = vpop.permute.xlu2 %530 }
  0xc4   :  { %936 = vmatpush.bf16.msra.mxu2 %v4700_v9  ;;  %vm569_vm15 = vcmp.eq.s32.totalorder %v531_v62, 1 }
  0xc5   :  { %vm5193_vm2 = vmpackc.low %vm570_vm1, %vm569_vm15 }
  0xc8   :  { %937 = vmatpush.bf16.msra.mxu2 %v4699_v16 }
  0xd3   :  { %4194 = vmatmul.msk.bf16.gmra.mxu0 %vm343_vm0, %v328_v22  ;;  %v4708_v22 = vld [vmem:[%s7055_s3 + $0x88] sm:$0xff] }
  0xd4   :  { %985 = vmatpush.bf16.msra.mxu3 %v4708_v22 }
  0xd8   :  { %986 = vmatpush.bf16.msra.mxu3 %v4707_v23 }
  0xe3   :  { %4195 = vmatmul.msk.bf16.gmra.mxu0 %vm343_vm0, %v329_v35 }
  0xf3   :  { %4196 = vmatmul.msk.bf16.gmra.mxu0 %vm343_vm0, %v330_v56 }
 0x103   :  { %4197 = vmatmul.msk.bf16.gmra.mxu0 %vm343_vm0, %v331_v17  ;;  %v537_v17 = vpop.permute.xlu2 %536 }
 0x110   :  { %v381_v25 = vpop.f32.mrf.mxu0 }
 0x111   :  { %v382_v26 = vadd.f32 %v5741_v24, %v381_v25 }
 0x113   :  { %vm421_vm5 = vcmp.gt.f32.partialorder %v382_v26, 0.0  ;;  %v437_v28 = vmul.f32 0.01, %v382_v26 }
 0x115   :  { %v453_v29 = vsel %vm421_vm5, %v382_v26, %v437_v28 }
 0x116   :  { %v581_v30 = vsel %vm565_vm4, %v453_v29, 0.0  ;;  %vm571_vm4 = vcmp.eq.s32.totalorder %v537_v17, 1 }
 0x117   :  { %597 = vst [vmem:[#allocation2 + $0x1] sm:$0xff] %v581_v30 }
 0x118   :  { %v383_v31 = vpop.f32.mrf.mxu0 }
 0x119   :  { %v384_v32 = vadd.f32 %v5741_v24, %v383_v31 }
 0x11b   :  { %vm422_vm7 = vcmp.gt.f32.partialorder %v384_v32, 0.0  ;;  %v438_v34 = vmul.f32 0.01, %v384_v32 }
 0x11d   :  { %v454_v35 = vsel %vm422_vm7, %v384_v32, %v438_v34 }
 0x11e   :  { %v582_v36 = vsel %vm566_vm6, %v454_v35, 0.0  ;;  %v5188_v39 = vpack.c.bf16 %v454_v35, %v453_v29  ;;  %v613_v46 = vld [vmem:[#allocation2] sm:$0xff]  ;;  %vm572_vm6 = vcmp.eq.s32.totalorder %v540_v27, 1 }
 0x11f   :  { %598 = vst [vmem:[#allocation2 + $0x9] sm:$0xff] %v582_v36  ;;  %vm5196_vm7 = vmpackc.low %vm572_vm6, %vm571_vm4 }
 0x120   :  { %v386_v37 = vpop.f32.mrf.mxu0  ;;  %5189 = vmatmul.msk.bf16.vlgmr.msra.gmra.mxu2 %vm5187_vm8, %v5188_v39 }
 0x121   :  { %v387_v38 = vadd.f32 %v5741_v24, %v386_v37  ;;  %v543_v37 = vpop.permute.xlu1 %542 }
 0x123   :  { %vm423_vm10 = vcmp.gt.f32.partialorder %v387_v38, 0.0  ;;  %v439_v42 = vmul.f32 0.01, %v387_v38 }
 0x125   :  { %v455_v43 = vsel %vm423_vm10, %v387_v38, %v439_v42 }
 0x126   :  { %v583_v44 = vsel %vm567_vm9, %v455_v43, 0.0  ;;  %v614_v47 = vld [vmem:[#allocation2 + $0x8] sm:$0xff]  ;;  %vm573_vm9 = vcmp.eq.s32.totalorder %v543_v37, 1 }
 0x127   :  { %599 = vst [vmem:[#allocation2 + $0x11] sm:$0xff] %v583_v44  ;;  %v661_v48 = vpack.c.bf16 %v614_v47, %v613_v46  ;;  %v645_v55 = vld [vmem:[#allocation2 + $0x2] sm:$0xff] }
 0x128   :  { %v388_v49 = vpop.f32.mrf.mxu0 }
 0x129   :  { %v389_v50 = vadd.f32 %v5741_v24, %v388_v49  ;;  %889 = vmatmul.bf16.vlgmr.msra.gmra.mxu1 %v661_v48  ;;  %v546_v48 = vpop.permute.xlu2 %545 }
 0x12b   :  { %vm424_vm11 = vcmp.gt.f32.partialorder %v389_v50, 0.0  ;;  %v440_v51 = vmul.f32 0.01, %v389_v50 }
 0x12d   :  { %v456_v53 = vsel %vm424_vm11, %v389_v50, %v440_v51  ;;  %vm574_vm11 = vcmp.eq.s32.totalorder %v546_v48, 1 }
 0x12e   :  { %v584_v54 = vsel %vm568_vm12, %v456_v53, 0.0  ;;  %v646_v56 = vld [vmem:[#allocation2 + $0xa] sm:$0xff]  ;;  %v5191_v60 = vpack.c.bf16 %v456_v53, %v455_v43  ;;  %vm5199_vm12 = vmpackc.low %vm574_vm11, %vm573_vm9 }
 0x12f   :  { %600 = vst [vmem:[#allocation2 + $0x19] sm:$0xff] %v584_v54  ;;  %v663_v57 = vpack.c.bf16 %v646_v56, %v645_v55  ;;  %v615_v1 = vld [vmem:[#allocation2 + $0x10] sm:$0xff] }
 0x130   :  { %v391_v58 = vpop.f32.mrf.mxu0  ;;  %5192 = vmatmul.msk.bf16.gmra.mxu2 %vm5190_vm13, %v5191_v60 }
 0x131   :  { %v392_v59 = vadd.f32 %v5741_v24, %v391_v58  ;;  %987 = vmatmul.bf16.vlgmr.msra.gmra.mxu3 %v663_v57  ;;  %v549_v58 = vpop.permute.xlu0 %548 }
 0x133   :  { %vm425_vm14 = vcmp.gt.f32.partialorder %v392_v59, 0.0  ;;  %v441_v61 = vmul.f32 0.01, %v392_v59 }
 0x135   :  { %v457_v63 = vsel %vm425_vm14, %v392_v59, %v441_v61  ;;  %vm575_vm14 = vcmp.eq.s32.totalorder %v549_v58, 1 }
 0x136   :  { %v585_v0 = vsel %vm569_vm15, %v457_v63, 0.0  ;;  %v616_v2 = vld [vmem:[#allocation2 + $0x18] sm:$0xff] }
 0x137   :  { %601 = vst [vmem:[#allocation2 + $0x21] sm:$0xff] %v585_v0  ;;  %v664_v3 = vpack.c.bf16 %v616_v2, %v615_v1  ;;  %v647_v10 = vld [vmem:[#allocation2 + $0x12] sm:$0xff] }
 0x138   :  { %v393_v4 = vpop.f32.mrf.mxu0 }
 0x139   :  { %v394_v5 = vadd.f32 %v5741_v24, %v393_v4  ;;  %894 = vmatmul.bf16.gmra.mxu1 %v664_v3  ;;  %v552_v3 = vpop.permute.xlu1 %551 }
 0x13b   :  { %vm426_vm0 = vcmp.gt.f32.partialorder %v394_v5, 0.0  ;;  %v442_v6 = vmul.f32 0.01, %v394_v5 }
 0x13d   :  { %v458_v8 = vsel %vm426_vm0, %v394_v5, %v442_v6  ;;  %vm576_vm0 = vcmp.eq.s32.totalorder %v552_v3, 1 }
 0x13e   :  { %v586_v9 = vsel %vm570_vm1, %v458_v8, 0.0  ;;  %v648_v11 = vld [vmem:[#allocation2 + $0x1a] sm:$0xff]  ;;  %v5194_v15 = vpack.c.bf16 %v458_v8, %v457_v63  ;;  %vm5202_vm1 = vmpackc.low %vm576_vm0, %vm575_vm14 }
 0x13f   :  { %602 = vst [vmem:[#allocation2 + $0x29] sm:$0xff] %v586_v9  ;;  %v666_v12 = vpack.c.bf16 %v648_v11, %v647_v10  ;;  %v617_v20 = vld [vmem:[#allocation2 + $0x20] sm:$0xff] }
 0x140   :  { %v396_v13 = vpop.f32.mrf.mxu0  ;;  %5195 = vmatmul.msk.bf16.gmra.mxu2 %vm5193_vm2, %v5194_v15 }
 0x141   :  { %v397_v14 = vadd.f32 %v5741_v24, %v396_v13  ;;  %992 = vmatmul.bf16.gmra.mxu3 %v666_v12  ;;  %v555_v13 = vpop.permute.xlu2 %554 }
 0x143   :  { %vm427_vm3 = vcmp.gt.f32.partialorder %v397_v14, 0.0  ;;  %v443_v16 = vmul.f32 0.01, %v397_v14 }
 0x145   :  { %v459_v18 = vsel %vm427_vm3, %v397_v14, %v443_v16  ;;  %vm577_vm3 = vcmp.eq.s32.totalorder %v555_v13, 1 }
 0x146   :  { %v587_v19 = vsel %vm571_vm4, %v459_v18, 0.0  ;;  %v618_v21 = vld [vmem:[#allocation2 + $0x28] sm:$0xff] }
 0x147   :  { %603 = vst [vmem:[#allocation2 + $0x31] sm:$0xff] %v587_v19  ;;  %v667_v22 = vpack.c.bf16 %v618_v21, %v617_v20  ;;  %v649_v30 = vld [vmem:[#allocation2 + $0x22] sm:$0xff]  ;;  %v558_v21 = vpop.permute.xlu0 %557 }
 0x148   :  { %v398_v23 = vpop.f32.mrf.mxu0 }
 0x149   :  { %v399_v25 = vadd.f32 %v5741_v24, %v398_v23  ;;  %899 = vmatmul.bf16.gmra.mxu1 %v667_v22 }
 0x14b   :  { %vm428_vm5 = vcmp.gt.f32.partialorder %v399_v25, 0.0  ;;  %v444_v26 = vmul.f32 0.01, %v399_v25 }
 0x14d   :  { %v460_v28 = vsel %vm428_vm5, %v399_v25, %v444_v26  ;;  %vm578_vm5 = vcmp.eq.s32.totalorder %v558_v21, 1 }
 0x14e   :  { %v588_v29 = vsel %vm572_vm6, %v460_v28, 0.0  ;;  %v650_v31 = vld [vmem:[#allocation2 + $0x2a] sm:$0xff]  ;;  %v5197_v35 = vpack.c.bf16 %v460_v28, %v459_v18  ;;  %vm5205_vm6 = vmpackc.low %vm578_vm5, %vm577_vm3 }
 0x14f   :  { %604 = vst [vmem:[#allocation2 + $0x39] sm:$0xff] %v588_v29  ;;  %v669_v32 = vpack.c.bf16 %v650_v31, %v649_v30  ;;  %v619_v41 = vld [vmem:[#allocation2 + $0x30] sm:$0xff] }
 0x150   :  { %v401_v33 = vpop.f32.mrf.mxu0  ;;  %5198 = vmatmul.msk.bf16.gmra.mxu2 %vm5196_vm7, %v5197_v35 }
 0x151   :  { %v402_v34 = vadd.f32 %v5741_v24, %v401_v33  ;;  %997 = vmatmul.bf16.gmra.mxu3 %v669_v32  ;;  %v561_v32 = vpop.permute.xlu1 %560 }
 0x153   :  { %vm429_vm8 = vcmp.gt.f32.partialorder %v402_v34, 0.0  ;;  %v445_v36 = vmul.f32 0.01, %v402_v34 }
 0x155   :  { %v461_v38 = vsel %vm429_vm8, %v402_v34, %v445_v36  ;;  %vm579_vm8 = vcmp.eq.s32.totalorder %v561_v32, 1 }
 0x156   :  { %v589_v39 = vsel %vm573_vm9, %v461_v38, 0.0  ;;  %v620_v42 = vld [vmem:[#allocation2 + $0x38] sm:$0xff] }
 0x157   :  { %605 = vst [vmem:[#allocation2 + $0x41] sm:$0xff] %v589_v39  ;;  %v670_v43 = vpack.c.bf16 %v620_v42, %v619_v41  ;;  %v651_v51 = vld [vmem:[#allocation2 + $0x32] sm:$0xff]  ;;  %v564_v42 = vpop.permute.xlu2 %563 }
 0x158   :  { %v403_v44 = vpop.f32.mrf.mxu0 }
 0x159   :  { %v404_v46 = vadd.f32 %v5741_v24, %v403_v44  ;;  %904 = vmatmul.bf16.gmra.mxu1 %v670_v43 }
 0x15b   :  { %vm430_vm10 = vcmp.gt.f32.partialorder %v404_v46, 0.0  ;;  %v446_v47 = vmul.f32 0.01, %v404_v46 }
 0x15d   :  { %v462_v49 = vsel %vm430_vm10, %v404_v46, %v446_v47  ;;  %vm580_vm10 = vcmp.eq.s32.totalorder %v564_v42, 1 }
 0x15e   :  { %v590_v50 = vsel %vm574_vm11, %v462_v49, 0.0  ;;  %v652_v52 = vld [vmem:[#allocation2 + $0x3a] sm:$0xff]  ;;  %v5200_v56 = vpack.c.bf16 %v462_v49, %v461_v38  ;;  %vm5208_vm11 = vmpackc.low %vm580_vm10, %vm579_vm8 }
 0x15f   :  { %606 = vst [vmem:[#allocation2 + $0x49] sm:$0xff] %v590_v50  ;;  %v672_v53 = vpack.c.bf16 %v652_v52, %v651_v51  ;;  %v621_v61 = vld [vmem:[#allocation2 + $0x40] sm:$0xff] }
 0x160   :  { %v406_v54 = vpop.f32.mrf.mxu0  ;;  %5201 = vmatmul.msk.bf16.gmra.mxu2 %vm5199_vm12, %v5200_v56  ;;  %vm96_vm12 = vcmask 523264   ;;  %v4726_v56 = vld [vmem:[%s7021_s10 + $0x58] sm:$0xff] }
 0x161   :  { %v407_v55 = vadd.f32 %v5741_v24, %v406_v54  ;;  %1002 = vmatmul.bf16.gmra.mxu3 %v672_v53  ;;  %97 = vst.msk [vmem:[#allocation3] sm:$0xff] %vm96_vm12, %v5240_v40  ;;  %1413 = vmatpush.bf16.msrb.mxu1 %v4726_v56 }
 0x162   :  { %98 = vst.msk [vmem:[#allocation3 + $0x8] sm:$0xff] %vm96_vm12, %v5240_v40 }
 0x163   :  { %vm431_vm13 = vcmp.gt.f32.partialorder %v407_v55, 0.0  ;;  %v447_v57 = vmul.f32 0.01, %v407_v55  ;;  %99 = vst.msk [vmem:[#allocation3 + $0x10] sm:$0xff] %vm96_vm12, %v5240_v40 }
 0x164   :  { %100 = vst.msk [vmem:[#allocation3 + $0x18] sm:$0xff] %vm96_vm12, %v5240_v40 }
 0x165   :  { %v463_v59 = vsel %vm431_vm13, %v407_v55, %v447_v57  ;;  %101 = vst.msk [vmem:[#allocation3 + $0x20] sm:$0xff] %vm96_vm12, %v5240_v40 }
 0x166   :  { %v591_v60 = vsel %vm575_vm14, %v463_v59, 0.0  ;;  %v622_v62 = vld [vmem:[#allocation2 + $0x48] sm:$0xff]  ;;  %102 = vst.msk [vmem:[#allocation3 + $0x28] sm:$0xff] %vm96_vm12, %v5240_v40 }
 0x167   :  { %607 = vst [vmem:[#allocation2 + $0x51] sm:$0xff] %v591_v60  ;;  %v673_v63 = vpack.c.bf16 %v622_v62, %v621_v61  ;;  %v653_v6 = vld [vmem:[#allocation2 + $0x42] sm:$0xff]  ;;  %v5818_v60 = vld [vmem:[%s7020_s9] ss:$0 sm:$0xff]  ;;  %s5241_s9 = smov 64  }
 0x168   :  { %v408_v0 = vpop.f32.mrf.mxu0  ;;  %103 = vst.msk [vmem:[#allocation3 + $0x30] sm:$0xff] %vm96_vm12, %v5240_v40  ;;  %v4724_v61 = vld [vmem:[%s7021_s10 + $0x48] sm:$0xff] }
 0x169   :  { %v409_v1 = vadd.f32 %v5741_v24, %v408_v0  ;;  %909 = vmatmul.bf16.gmra.mxu1 %v673_v63  ;;  %104 = vst.msk [vmem:[#allocation3 + $0x38] sm:$0xff] %vm96_vm12, %v5240_v40 }
 0x16a   :  { %105 = vst.msk [vmem:[#allocation3 + $0x40] sm:$0xff] %vm96_vm12, %v5240_v40 }
 0x16b   :  { %vm432_vm15 = vcmp.gt.f32.partialorder %v409_v1, 0.0  ;;  %v448_v2 = vmul.f32 0.01, %v409_v1  ;;  %106 = vst.msk [vmem:[#allocation3 + $0x48] sm:$0xff] %vm96_vm12, %v5240_v40 }
 0x16c   :  { %107 = vst.msk [vmem:[#allocation3 + $0x50] sm:$0xff] %vm96_vm12, %v5240_v40 }
 0x16d   :  { %v464_v4 = vsel %vm432_vm15, %v409_v1, %v448_v2  ;;  %108 = vst.msk [vmem:[#allocation3 + $0x58] sm:$0xff] %vm96_vm12, %v5240_v40  ;;  %v4723_v1 = vld [vmem:[%s7021_s10 + $0x40] sm:$0xff] }
 0x16e   :  { %v592_v5 = vsel %vm576_vm0, %v464_v4, 0.0  ;;  %v654_v7 = vld [vmem:[#allocation2 + $0x4a] sm:$0xff]  ;;  %v5203_v11 = vpack.c.bf16 %v464_v4, %v463_v59  ;;  %109 = vst.msk [vmem:[#allocation3 + $0x60] sm:$0xff] %vm96_vm12, %v5240_v40 }
 0x16f   :  { %608 = vst [vmem:[#allocation2 + $0x59] sm:$0xff] %v592_v5  ;;  %v675_v8 = vpack.c.bf16 %v654_v7, %v653_v6  ;;  %v623_v16 = vld [vmem:[#allocation2 + $0x50] sm:$0xff] }
 0x170   :  { %v411_v9 = vpop.f32.mrf.mxu0  ;;  %5204 = vmatmul.msk.bf16.gmra.mxu2 %vm5202_vm1, %v5203_v11  ;;  %110 = vst.msk [vmem:[#allocation3 + $0x68] sm:$0xff] %vm96_vm12, %v5240_v40  ;;  %v4725_v59 = vld [vmem:[%s7021_s10 + $0x50] sm:$0xff] }
 0x171   :  { %v412_v10 = vadd.f32 %v5741_v24, %v411_v9  ;;  %1007 = vmatmul.bf16.gmra.mxu3 %v675_v8  ;;  %111 = vst.msk [vmem:[#allocation3 + $0x70] sm:$0xff] %vm96_vm12, %v5240_v40  ;;  %1414 = vmatpush.bf16.msrb.mxu1 %v4725_v59 }
 0x172   :  { %112 = vst.msk [vmem:[#allocation3 + $0x78] sm:$0xff] %vm96_vm12, %v5240_v40 }
 0x173   :  { %vm433_vm2 = vcmp.gt.f32.partialorder %v412_v10, 0.0  ;;  %v449_v12 = vmul.f32 0.01, %v412_v10  ;;  %113 = vst.msk [vmem:[#allocation3 + $0x80] sm:$0xff] %vm96_vm12, %v5240_v40 }
 0x175   :  { %v465_v14 = vsel %vm433_vm2, %v412_v10, %v449_v12  ;;  %1415 = vmatpush.bf16.msrb.mxu1 %v4724_v61 }
 0x176   :  { %v593_v15 = vsel %vm577_vm3, %v465_v14, 0.0  ;;  %v624_v17 = vld [vmem:[#allocation2 + $0x58] sm:$0xff] }
 0x177   :  { %609 = vst [vmem:[#allocation2 + $0x61] sm:$0xff] %v593_v15  ;;  %v676_v18 = vpack.c.bf16 %v624_v17, %v623_v16  ;;  %v655_v26 = vld [vmem:[#allocation2 + $0x52] sm:$0xff] }
 0x178   :  { %v413_v19 = vpop.f32.mrf.mxu0 }
 0x179   :  { %v414_v20 = vadd.f32 %v5741_v24, %v413_v19  ;;  %914 = vmatmul.bf16.gmra.mxu1 %v676_v18 }
 0x17a   :  { %1416 = vmatpush.bf16.msrb.mxu1 %v4723_v1 }
 0x17b   :  { %vm434_vm4 = vcmp.gt.f32.partialorder %v414_v20, 0.0  ;;  %v450_v22 = vmul.f32 0.01, %v414_v20 }
 0x17d   :  { %v466_v23 = vsel %vm434_vm4, %v414_v20, %v450_v22 }
 0x17e   :  { %v594_v25 = vsel %vm578_vm5, %v466_v23, 0.0  ;;  %v656_v27 = vld [vmem:[#allocation2 + $0x5a] sm:$0xff]  ;;  %v5206_v31 = vpack.c.bf16 %v466_v23, %v465_v14 }
 0x17f   :  { %610 = vst [vmem:[#allocation2 + $0x69] sm:$0xff] %v594_v25  ;;  %v678_v28 = vpack.c.bf16 %v656_v27, %v655_v26  ;;  %v625_v36 = vld [vmem:[#allocation2 + $0x60] sm:$0xff] }
 0x180   :  { %v416_v29 = vpop.f32.mrf.mxu0  ;;  %5207 = vmatmul.msk.bf16.gmra.mxu2 %vm5205_vm6, %v5206_v31 }
 0x181   :  { %v417_v30 = vadd.f32 %v5741_v24, %v416_v29  ;;  %1012 = vmatmul.bf16.gmra.mxu3 %v678_v28 }
 0x183   :  { %vm435_vm7 = vcmp.gt.f32.partialorder %v417_v30, 0.0  ;;  %v451_v33 = vmul.f32 0.01, %v417_v30 }
 0x185   :  { %v467_v34 = vsel %vm435_vm7, %v417_v30, %v451_v33 }
 0x186   :  { %v595_v35 = vsel %vm579_vm8, %v467_v34, 0.0  ;;  %v626_v37 = vld [vmem:[#allocation2 + $0x68] sm:$0xff] }
 0x187   :  { %611 = vst [vmem:[#allocation2 + $0x71] sm:$0xff] %v595_v35  ;;  %v679_v38 = vpack.c.bf16 %v626_v37, %v625_v36  ;;  %v657_v47 = vld [vmem:[#allocation2 + $0x62] sm:$0xff] }
 0x188   :  { %v418_v39 = vpop.f32.mrf.mxu0 }
 0x189   :  { %v419_v41 = vadd.f32 %v5741_v24, %v418_v39  ;;  %919 = vmatmul.bf16.gmra.mxu1 %v679_v38 }
 0x18b   :  { %vm436_vm9 = vcmp.gt.f32.partialorder %v419_v41, 0.0  ;;  %v452_v43 = vmul.f32 0.01, %v419_v41 }
 0x18d   :  { %v468_v44 = vsel %vm436_vm9, %v419_v41, %v452_v43 }
 0x18e   :  { %v596_v46 = vsel %vm580_vm10, %v468_v44, 0.0  ;;  %v658_v48 = vld [vmem:[#allocation2 + $0x6a] sm:$0xff]  ;;  %v5209_v50 = vpack.c.bf16 %v468_v44, %v467_v34 }
 0x18f   :  { %612 = vst [vmem:[#allocation2 + $0x79] sm:$0xff] %v596_v46  ;;  %v681_v49 = vpack.c.bf16 %v658_v48, %v657_v47  ;;  %v627_v24 = vld [vmem:[#allocation2 + $0x70] sm:$0xff] }
 0x190   :  { %5210 = vmatmul.msk.bf16.gmra.mxu2 %vm5208_vm11, %v5209_v50 }
 0x191   :  { %1017 = vmatmul.bf16.gmra.mxu3 %v681_v49 }
 0x196   :  { %v628_v51 = vld [vmem:[#allocation2 + $0x78] sm:$0xff] }
 0x197   :  { %v682_v52 = vpack.c.bf16 %v628_v51, %v627_v24  ;;  %v659_v53 = vld [vmem:[#allocation2 + $0x72] sm:$0xff]  ;;  %v660_v54 = vld [vmem:[#allocation2 + $0x7a] sm:$0xff] }
 0x198   :  { %v684_v55 = vpack.c.bf16 %v660_v54, %v659_v53 }
 0x199   :  { %924 = vmatmul.bf16.gmra.mxu1 %v682_v52 }
 0x1a1   :  { %1022 = vmatmul.bf16.gmra.mxu3 %v684_v55 }
 0x1a3   :  { %v939_v57 = vpop.f32.mrf.mxu2 }
 0x1a6   :  { %v890_v58 = vpop.f32.mrf.mxu1 }
 0x1a7   :  { %v891_v0 = vadd.f32 %v5818_v60, %v890_v58 }
 0x1a9   :  { %v940_v2 = vadd.f32 %v939_v57, %v891_v0 }
 0x1ab   :  { %v941_v62 = vpop.f32.mrf.mxu2 }
 0x1ae   :  { %v892_v63 = vpop.f32.mrf.mxu1 }
 0x1af   :  { %v893_v7 = vadd.f32 %v5818_v60, %v892_v63 }
 0x1b1   :  { %v942_v10 = vadd.f32 %v941_v62, %v893_v7 }
 0x1b3   :  { %v944_v4 = vpop.f32.mrf.mxu2 }
 0x1b4   :  { %v988_v3 = vpop.f32.mrf.mxu3 }
 0x1b5   :  { %v989_v5 = vadd.f32 %v988_v3, %v940_v2 }
 0x1b6   :  { %v895_v6 = vpop.f32.mrf.mxu1 }
 0x1b7   :  { %vm1028_vm13 = vcmp.gt.f32.partialorder %v989_v5, 0.0  ;;  %v1044_v8 = vmul.f32 0.01, %v989_v5  ;;  %v896_v15 = vadd.f32 %v5818_v60, %v895_v6 }
 0x1b9   :  { %v1060_v9 = vsel %vm1028_vm13, %v989_v5, %v1044_v8  ;;  %v945_v18 = vadd.f32 %v944_v4, %v896_v15 }
 0x1ba   :  { %1076 = vst.msk [vmem:[#allocation3] sm:$0xff] %vm96_vm12, %v1060_v9 }
 0x1bb   :  { %v946_v12 = vpop.f32.mrf.mxu2 }
 0x1bc   :  { %v990_v11 = vpop.f32.mrf.mxu3 }
 0x1bd   :  { %v991_v13 = vadd.f32 %v990_v11, %v942_v10 }
 0x1be   :  { %v897_v14 = vpop.f32.mrf.mxu1 }
 0x1bf   :  { %vm1029_vm14 = vcmp.gt.f32.partialorder %v991_v13, 0.0  ;;  %v1045_v16 = vmul.f32 0.01, %v991_v13  ;;  %v898_v23 = vadd.f32 %v5818_v60, %v897_v14 }
 0x1c1   :  { %v1061_v17 = vsel %vm1029_vm14, %v991_v13, %v1045_v16  ;;  %v947_v27 = vadd.f32 %v946_v12, %v898_v23 }
 0x1c2   :  { %1077 = vst.msk [vmem:[#allocation3 + $0x8] sm:$0xff] %vm96_vm12, %v1061_v17 }
 0x1c3   :  { %v949_v20 = vpop.f32.mrf.mxu2 }
 0x1c4   :  { %v993_v19 = vpop.f32.mrf.mxu3 }
 0x1c5   :  { %v994_v21 = vadd.f32 %v993_v19, %v945_v18 }
 0x1c6   :  { %v900_v22 = vpop.f32.mrf.mxu1 }
 0x1c7   :  { %vm1030_vm15 = vcmp.gt.f32.partialorder %v994_v21, 0.0  ;;  %v1046_v25 = vmul.f32 0.01, %v994_v21  ;;  %v901_v32 = vadd.f32 %v5818_v60, %v900_v22 }
 0x1c9   :  { %v1062_v26 = vsel %vm1030_vm15, %v994_v21, %v1046_v25  ;;  %v1124_v34 = vld [vmem:[#allocation3 + $0x2] sm:$0xff]  ;;  %v950_v42 = vadd.f32 %v949_v20, %v901_v32 }
 0x1ca   :  { %1078 = vst.msk [vmem:[#allocation3 + $0x10] sm:$0xff] %vm96_vm12, %v1062_v26  ;;  %v1108_v37 = vld [vmem:[#allocation3 + $0x1] sm:$0xff] }
 0x1cb   :  { %v951_v29 = vpop.f32.mrf.mxu2 }
 0x1cc   :  { %v995_v28 = vpop.f32.mrf.mxu3 }
 0x1cd   :  { %v996_v30 = vadd.f32 %v995_v28, %v947_v27 }
 0x1ce   :  { %v902_v31 = vpop.f32.mrf.mxu1 }
 0x1cf   :  { %vm1031_vm0 = vcmp.gt.f32.partialorder %v996_v30, 0.0  ;;  %v1047_v33 = vmul.f32 0.01, %v996_v30  ;;  %v903_v48 = vadd.f32 %v5818_v60, %v902_v31 }
 0x1d1   :  { %v1063_v35 = vsel %vm1031_vm0, %v996_v30, %v1047_v33  ;;  %v1125_v36 = vld [vmem:[#allocation3 + $0xa] sm:$0xff]  ;;  %v952_v24 = vadd.f32 %v951_v29, %v903_v48 }
 0x1d2   :  { %v1109_v38 = vld [vmem:[#allocation3 + $0x9] sm:$0xff]  ;;  %1079 = vst.msk [vmem:[#allocation3 + $0x18] sm:$0xff] %vm96_vm12, %v1063_v35  ;;  %v1221_v39 = vpack.c.bf16 %v1125_v36, %v1124_v34 }
 0x1d3   :  { %v4886_v41 = vpack.i.bf16 %v1109_v38, %v1108_v37  ;;  %v954_v44 = vpop.f32.mrf.mxu2 }
 0x1d4   :  { %v998_v43 = vpop.f32.mrf.mxu3  ;;  %4342 = vmatmul.msk.bf16.vlgmr.msrb.gmra.mxu1 %vm96_vm12, %v1221_v39 }
 0x1d5   :  { %4887 = vrot.lane.b32.xlu0 %v4886_v41, %s5241_s9  ;;  %v999_v46 = vadd.f32 %v998_v43, %v950_v42 }
 0x1d6   :  { %v905_v47 = vpop.f32.mrf.mxu1 }
 0x1d7   :  { %vm1032_vm1 = vcmp.gt.f32.partialorder %v999_v46, 0.0  ;;  %v1048_v49 = vmul.f32 0.01, %v999_v46  ;;  %v906_v55 = vadd.f32 %v5818_v60, %v905_v47 }
 0x1d9   :  { %v1064_v50 = vsel %vm1032_vm1, %v999_v46, %v1048_v49  ;;  %v1110_v57 = vld [vmem:[#allocation3 + $0x11] sm:$0xff]  ;;  %v955_v1 = vadd.f32 %v954_v44, %v906_v55 }
 0x1da   :  { %1080 = vst.msk [vmem:[#allocation3 + $0x20] sm:$0xff] %vm96_vm12, %v1064_v50  ;;  %v1126_v61 = vld [vmem:[#allocation3 + $0x12] sm:$0xff] }
 0x1db   :  { %v956_v52 = vpop.f32.mrf.mxu2  ;;  %v4722_v55 = vld [vmem:[%s7021_s10 + $0x38] sm:$0xff] }
 0x1dc   :  { %v1000_v51 = vpop.f32.mrf.mxu3  ;;  %1360 = vmatpush.bf16.msrb.mxu0 %v4722_v55 }
 0x1dd   :  { %v1001_v53 = vadd.f32 %v1000_v51, %v952_v24 }
 0x1de   :  { %v907_v54 = vpop.f32.mrf.mxu1 }
 0x1df   :  { %vm1033_vm2 = vcmp.gt.f32.partialorder %v1001_v53, 0.0  ;;  %v1049_v56 = vmul.f32 0.01, %v1001_v53  ;;  %v908_v6 = vadd.f32 %v5818_v60, %v907_v54 }
 0x1e1   :  { %v1065_v58 = vsel %vm1033_vm2, %v1001_v53, %v1049_v56  ;;  %v1111_v59 = vld [vmem:[#allocation3 + $0x19] sm:$0xff]  ;;  %v957_v9 = vadd.f32 %v956_v52, %v908_v6 }
 0x1e2   :  { %v1127_v62 = vld [vmem:[#allocation3 + $0x1a] sm:$0xff]  ;;  %1081 = vst.msk [vmem:[#allocation3 + $0x28] sm:$0xff] %vm96_vm12, %v1065_v58  ;;  %v4891_v63 = vpack.i.bf16 %v1111_v59, %v1110_v57 }
 0x1e3   :  { %v1223_v0 = vpack.c.bf16 %v1127_v62, %v1126_v61  ;;  %v959_v3 = vpop.f32.mrf.mxu2  ;;  %v4721_v62 = vld [vmem:[%s7021_s10 + $0x30] sm:$0xff] }
 0x1e4   :  { %v1003_v2 = vpop.f32.mrf.mxu3  ;;  %4892 = vrot.lane.b32.xlu1 %v4891_v63, %s5241_s9  ;;  %1361 = vmatpush.bf16.msrb.mxu0 %v4721_v62 }
 0x1e5   :  { %4343 = vmatmul.msk.bf16.gmra.mxu1 %vm96_vm12, %v1223_v0  ;;  %v1004_v4 = vadd.f32 %v1003_v2, %v955_v1 }
 0x1e6   :  { %v910_v5 = vpop.f32.mrf.mxu1 }
 0x1e7   :  { %vm1034_vm3 = vcmp.gt.f32.partialorder %v1004_v4, 0.0  ;;  %v1050_v7 = vmul.f32 0.01, %v1004_v4  ;;  %v911_v14 = vadd.f32 %v5818_v60, %v910_v5 }
 0x1e9   :  { %v1066_v8 = vsel %vm1034_vm3, %v1004_v4, %v1050_v7  ;;  %v1112_v16 = vld [vmem:[#allocation3 + $0x21] sm:$0xff]  ;;  %v960_v23 = vadd.f32 %v959_v3, %v911_v14 }
 0x1ea   :  { %1082 = vst.msk [vmem:[#allocation3 + $0x30] sm:$0xff] %vm96_vm12, %v1066_v8  ;;  %v1128_v19 = vld [vmem:[#allocation3 + $0x22] sm:$0xff] }
 0x1eb   :  { %v961_v13 = vpop.f32.mrf.mxu2  ;;  %v4720_v8 = vld [vmem:[%s7021_s10 + $0x28] sm:$0xff] }
 0x1ec   :  { %v1005_v10 = vpop.f32.mrf.mxu3  ;;  %1362 = vmatpush.bf16.msrb.mxu0 %v4720_v8  ;;  %v1094_v8 = vld [vmem:[#allocation3 + $0x10] sm:$0xff] }
 0x1ed   :  { %v1006_v11 = vadd.f32 %v1005_v10, %v957_v9 }
 0x1ee   :  { %v912_v12 = vpop.f32.mrf.mxu1 }
 0x1ef   :  { %vm1035_vm4 = vcmp.gt.f32.partialorder %v1006_v11, 0.0  ;;  %v1051_v15 = vmul.f32 0.01, %v1006_v11  ;;  %v913_v28 = vadd.f32 %v5818_v60, %v912_v12 }
 0x1f1   :  { %v1067_v17 = vsel %vm1035_vm4, %v1006_v11, %v1051_v15  ;;  %v1113_v18 = vld [vmem:[#allocation3 + $0x29] sm:$0xff]  ;;  %v962_v32 = vadd.f32 %v961_v13, %v913_v28  ;;  %v4719_v11 = vld [vmem:[%s7021_s10 + $0x20] sm:$0xff] }
 0x1f2   :  { %v1129_v20 = vld [vmem:[#allocation3 + $0x2a] sm:$0xff]  ;;  %1083 = vst.msk [vmem:[#allocation3 + $0x38] sm:$0xff] %vm96_vm12, %v1067_v17  ;;  %v4896_v21 = vpack.i.bf16 %v1113_v18, %v1112_v16  ;;  %1363 = vmatpush.bf16.msrb.mxu0 %v4719_v11 }
 0x1f3   :  { %v1225_v22 = vpack.c.bf16 %v1129_v20, %v1128_v19  ;;  %v964_v30 = vpop.f32.mrf.mxu2  ;;  %v4718_v18 = vld [vmem:[%s7021_s10 + $0x18] sm:$0xff] }
 0x1f4   :  { %v1008_v25 = vpop.f32.mrf.mxu3  ;;  %4897 = vrot.lane.b32.xlu2 %v4896_v21, %s5241_s9  ;;  %v4717_v21 = vld [vmem:[%s7021_s10 + $0x10] sm:$0xff] }
 0x1f5   :  { %4344 = vmatmul.msk.bf16.gmra.mxu1 %vm96_vm12, %v1225_v22  ;;  %v1009_v26 = vadd.f32 %v1008_v25, %v960_v23 }
 0x1f6   :  { %v915_v27 = vpop.f32.mrf.mxu1  ;;  %1364 = vmatpush.bf16.msrb.mxu0 %v4718_v18 }
 0x1f7   :  { %vm1036_vm5 = vcmp.gt.f32.partialorder %v1009_v26, 0.0  ;;  %v1052_v29 = vmul.f32 0.01, %v1009_v26  ;;  %v916_v36 = vadd.f32 %v5818_v60, %v915_v27 }
 0x1f9   :  { %v1068_v31 = vsel %vm1036_vm5, %v1009_v26, %v1052_v29  ;;  %v1130_v38 = vld [vmem:[#allocation3 + $0x32] sm:$0xff]  ;;  %v965_v48 = vadd.f32 %v964_v30, %v916_v36  ;;  %v4716_v36 = vld [vmem:[%s7021_s10 + $0x8] sm:$0xff] }
 0x1fa   :  { %1084 = vst.msk [vmem:[#allocation3 + $0x40] sm:$0xff] %vm96_vm12, %v1068_v31  ;;  %v1114_v42 = vld [vmem:[#allocation3 + $0x31] sm:$0xff]  ;;  %1365 = vmatpush.bf16.msrb.mxu0 %v4717_v21 }
 0x1fb   :  { %v966_v44 = vpop.f32.mrf.mxu2 }
 0x1fc   :  { %v1010_v33 = vpop.f32.mrf.mxu3 }
 0x1fd   :  { %v1011_v34 = vadd.f32 %v1010_v33, %v962_v32 }
 0x1fe   :  { %v917_v35 = vpop.f32.mrf.mxu1  ;;  %1366 = vmatpush.bf16.msrb.mxu0 %v4716_v36 }
 0x1ff   :  { %vm1037_vm6 = vcmp.gt.f32.partialorder %v1011_v34, 0.0  ;;  %v1053_v37 = vmul.f32 0.01, %v1011_v34  ;;  %v918_v51 = vadd.f32 %v5818_v60, %v917_v35 }
 0x201   :  { %v1069_v39 = vsel %vm1037_vm6, %v1011_v34, %v1053_v37  ;;  %v1131_v41 = vld [vmem:[#allocation3 + $0x3a] sm:$0xff]  ;;  %v967_v54 = vadd.f32 %v966_v44, %v918_v51 }
 0x202   :  { %v1115_v43 = vld [vmem:[#allocation3 + $0x39] sm:$0xff]  ;;  %1085 = vst.msk [vmem:[#allocation3 + $0x48] sm:$0xff] %vm96_vm12, %v1069_v39  ;;  %v1227_v46 = vpack.c.bf16 %v1131_v41, %v1130_v38 }
 0x203   :  { %v4901_v47 = vpack.i.bf16 %v1115_v43, %v1114_v42  ;;  %v969_v56 = vpop.f32.mrf.mxu2  ;;  %v4715_v41 = vld [vmem:[%s7021_s10] sm:$0xff] }
 0x204   :  { %v1013_v49 = vpop.f32.mrf.mxu3  ;;  %1367 = vmatpush.bf16.msrb.mxu0 %v4715_v41 }
 0x205   :  { %4345 = vmatmul.msk.bf16.gmra.mxu1 %vm96_vm12, %v1227_v46  ;;  %4902 = vrot.lane.b32.xlu0 %v4901_v47, %s5241_s9  ;;  %v1014_v50 = vadd.f32 %v1013_v49, %v965_v48 }
 0x206   :  { %v920_v24 = vpop.f32.mrf.mxu1 }
 0x207   :  { %vm1038_vm7 = vcmp.gt.f32.partialorder %v1014_v50, 0.0  ;;  %v1054_v52 = vmul.f32 0.01, %v1014_v50  ;;  %v921_v59 = vadd.f32 %v5818_v60, %v920_v24 }
 0x209   :  { %v1070_v53 = vsel %vm1038_vm7, %v1014_v50, %v1054_v52  ;;  %v1116_v0 = vld [vmem:[#allocation3 + $0x41] sm:$0xff]  ;;  %v970_v7 = vadd.f32 %v969_v56, %v921_v59 }
 0x20a   :  { %1086 = vst.msk [vmem:[#allocation3 + $0x50] sm:$0xff] %vm96_vm12, %v1070_v53  ;;  %v1132_v3 = vld [vmem:[#allocation3 + $0x42] sm:$0xff] }
 0x20b   :  { %v971_v12 = vpop.f32.mrf.mxu2 }
 0x20c   :  { %v1015_v57 = vpop.f32.mrf.mxu3 }
 0x20d   :  { %v1016_v58 = vadd.f32 %v1015_v57, %v967_v54 }
 0x20e   :  { %v922_v63 = vpop.f32.mrf.mxu1 }
 0x20f   :  { %vm1039_vm8 = vcmp.gt.f32.partialorder %v1016_v58, 0.0  ;;  %v1055_v61 = vmul.f32 0.01, %v1016_v58  ;;  %v923_v13 = vadd.f32 %v5818_v60, %v922_v63 }
 0x211   :  { %v1071_v1 = vsel %vm1039_vm8, %v1016_v58, %v1055_v61  ;;  %v1117_v2 = vld [vmem:[#allocation3 + $0x49] sm:$0xff]  ;;  %v972_v17 = vadd.f32 %v971_v12, %v923_v13 }
 0x212   :  { %v1133_v4 = vld [vmem:[#allocation3 + $0x4a] sm:$0xff]  ;;  %1087 = vst.msk [vmem:[#allocation3 + $0x58] sm:$0xff] %vm96_vm12, %v1071_v1  ;;  %v4906_v5 = vpack.i.bf16 %v1117_v2, %v1116_v0  ;;  %v1092_v0 = vld [vmem:[#allocation3] sm:$0xff] }
 0x213   :  { %v1229_v6 = vpack.c.bf16 %v1133_v4, %v1132_v3  ;;  %v974_v25 = vpop.f32.mrf.mxu2  ;;  %v1093_v1 = vld [vmem:[#allocation3 + $0x8] sm:$0xff] }
 0x214   :  { %v1018_v9 = vpop.f32.mrf.mxu3  ;;  %4907 = vrot.lane.b32.xlu1 %v4906_v5, %s5241_s9 }
 0x215   :  { %4346 = vmatmul.msk.bf16.gmra.mxu1 %vm96_vm12, %v1229_v6  ;;  %v1019_v10 = vadd.f32 %v1018_v9, %v970_v7  ;;  %v1095_v9 = vld [vmem:[#allocation3 + $0x18] sm:$0xff] }
 0x216   :  { %v925_v16 = vpop.f32.mrf.mxu1 }
 0x217   :  { %vm1040_vm9 = vcmp.gt.f32.partialorder %v1019_v10, 0.0  ;;  %v1056_v14 = vmul.f32 0.01, %v1019_v10  ;;  %v926_v22 = vadd.f32 %v5818_v60, %v925_v16  ;;  %v1096_v16 = vld [vmem:[#allocation3 + $0x20] sm:$0xff] }
 0x219   :  { %v1072_v15 = vsel %vm1040_vm9, %v1019_v10, %v1056_v14  ;;  %v1118_v26 = vld [vmem:[#allocation3 + $0x51] sm:$0xff]  ;;  %v975_v33 = vadd.f32 %v974_v25, %v926_v22 }
 0x21a   :  { %1088 = vst.msk [vmem:[#allocation3 + $0x60] sm:$0xff] %vm96_vm12, %v1072_v15  ;;  %v1134_v29 = vld [vmem:[#allocation3 + $0x52] sm:$0xff] }
 0x21b   :  { %v976_v43 = vpop.f32.mrf.mxu2  ;;  %v1098_v25 = vld [vmem:[#allocation3 + $0x30] sm:$0xff] }
 0x21c   :  { %v1020_v19 = vpop.f32.mrf.mxu3 }
 0x21d   :  { %v1021_v20 = vadd.f32 %v1020_v19, %v972_v17  ;;  %v1097_v17 = vld [vmem:[#allocation3 + $0x28] sm:$0xff] }
 0x21e   :  { %v927_v34 = vpop.f32.mrf.mxu1 }
 0x21f   :  { %vm1041_vm10 = vcmp.gt.f32.partialorder %v1021_v20, 0.0  ;;  %v1057_v23 = vmul.f32 0.01, %v1021_v20  ;;  %v928_v38 = vadd.f32 %v5818_v60, %v927_v34  ;;  %v1101_v34 = vld [vmem:[#allocation3 + $0x48] sm:$0xff] }
 0x221   :  { %v1073_v27 = vsel %vm1041_vm10, %v1021_v20, %v1057_v23  ;;  %v1119_v28 = vld [vmem:[#allocation3 + $0x59] sm:$0xff]  ;;  %v977_v44 = vadd.f32 %v976_v43, %v928_v38 }
 0x222   :  { %v1135_v30 = vld [vmem:[#allocation3 + $0x5a] sm:$0xff]  ;;  %1089 = vst.msk [vmem:[#allocation3 + $0x68] sm:$0xff] %vm96_vm12, %v1073_v27  ;;  %v4911_v31 = vpack.i.bf16 %v1119_v28, %v1118_v26 }
 0x223   :  { %v1231_v32 = vpack.c.bf16 %v1135_v30, %v1134_v29  ;;  %v1099_v26 = vld [vmem:[#allocation3 + $0x38] sm:$0xff] }
 0x224   :  { %v1023_v35 = vpop.f32.mrf.mxu3  ;;  %4912 = vrot.lane.b32.xlu2 %v4911_v31, %s5241_s9  ;;  %v1103_v43 = vld [vmem:[#allocation3 + $0x58] sm:$0xff] }
 0x225   :  { %4347 = vmatmul.msk.bf16.gmra.mxu1 %vm96_vm12, %v1231_v32  ;;  %v1024_v37 = vadd.f32 %v1023_v35, %v975_v33  ;;  %v1100_v33 = vld [vmem:[#allocation3 + $0x40] sm:$0xff] }
 0x227   :  { %vm1042_vm11 = vcmp.gt.f32.partialorder %v1024_v37, 0.0  ;;  %v1058_v39 = vmul.f32 0.01, %v1024_v37 }
 0x229   :  { %v1074_v42 = vsel %vm1042_vm11, %v1024_v37, %v1058_v39  ;;  %v1136_v49 = vld [vmem:[#allocation3 + $0x62] sm:$0xff] }
 0x22a   :  { %1090 = vst.msk [vmem:[#allocation3 + $0x70] sm:$0xff] %vm96_vm12, %v1074_v42  ;;  %v1120_v60 = vld [vmem:[#allocation3 + $0x61] sm:$0xff]  ;;  %v1102_v42 = vld [vmem:[#allocation3 + $0x50] sm:$0xff] }
 0x22c   :  { %v1025_v46 = vpop.f32.mrf.mxu3 }
 0x22d   :  { %v1026_v47 = vadd.f32 %v1025_v46, %v977_v44 }
 0x22f   :  { %vm1043_vm13 = vcmp.gt.f32.partialorder %v1026_v47, 0.0  ;;  %v1059_v48 = vmul.f32 0.01, %v1026_v47 }
 0x231   :  { %v1075_v50 = vsel %vm1043_vm13, %v1026_v47, %v1059_v48  ;;  %v1137_v24 = vld [vmem:[#allocation3 + $0x6a] sm:$0xff] }
 0x232   :  { %v1121_v51 = vld [vmem:[#allocation3 + $0x69] sm:$0xff]  ;;  %1091 = vst.msk [vmem:[#allocation3 + $0x78] sm:$0xff] %vm96_vm12, %v1075_v50  ;;  %v1233_v52 = vpack.c.bf16 %v1137_v24, %v1136_v49  ;;  %v1104_v24 = vld [vmem:[#allocation3 + $0x60] sm:$0xff] }
 0x233   :  { %v4916_v53 = vpack.i.bf16 %v1121_v51, %v1120_v60  ;;  %v1105_v60 = vld [vmem:[#allocation3 + $0x68] sm:$0xff] }
 0x235   :  { %4348 = vmatmul.msk.bf16.gmra.mxu1 %vm96_vm12, %v1233_v52  ;;  %4917 = vrot.lane.b32.xlu0 %v4916_v53, %s5241_s9 }
 0x239   :  { %v1122_v54 = vld [vmem:[#allocation3 + $0x71] sm:$0xff]  ;;  %v1123_v55 = vld [vmem:[#allocation3 + $0x79] sm:$0xff] }
 0x23a   :  { %v4921_v56 = vpack.i.bf16 %v1123_v55, %v1122_v54  ;;  %v1138_v57 = vld [vmem:[#allocation3 + $0x72] sm:$0xff]  ;;  %v1139_v58 = vld [vmem:[#allocation3 + $0x7a] sm:$0xff] }
 0x23b   :  { %v1235_v59 = vpack.c.bf16 %v1139_v58, %v1138_v57  ;;  %v1106_v58 = vld [vmem:[#allocation3 + $0x70] sm:$0xff] }
 0x23c   :  { %4922 = vrot.lane.b32.xlu1 %v4921_v56, %s5241_s9 }
 0x245   :  { %4349 = vmatmul.msk.bf16.gmra.mxu1 %vm96_vm12, %v1235_v59  ;;  %v1107_v59 = vld [vmem:[#allocation3 + $0x78] sm:$0xff] }
 0x247   :  { %v4888_v61 = vpop.permute.xlu0 %4887 }
 0x248   :  { %v4890_v62 = vunpack.i.h.bf16 %v4888_v61  ;;  %v4889_v63 = vunpack.i.l.bf16 %v4888_v61 }
 0x24a   :  { %v1204_v2 = vsel %vm96_vm12, %v1092_v0, %v4889_v63  ;;  %v1205_v3 = vsel %vm96_vm12, %v1093_v1, %v4890_v62 }
 0x24b   :  { %v1220_v4 = vpack.c.bf16 %v1205_v3, %v1204_v2  ;;  %v5917_v2 = vld [vmem:[%s7022_s11] ss:$0 sm:$0xff] }
 0x24d   :  { %1368 = vmatmul.bf16.vlgmr.msrb.gmra.mxu0 %v1220_v4 }
 0x24e   :  { %v4898_v13 = vpop.permute.xlu2 %4897 }
 0x24f   :  { %v4900_v14 = vunpack.i.h.bf16 %v4898_v13  ;;  %v4899_v15 = vunpack.i.l.bf16 %v4898_v13 }
 0x251   :  { %v1208_v18 = vsel %vm96_vm12, %v1096_v16, %v4899_v15  ;;  %v1209_v19 = vsel %vm96_vm12, %v1097_v17, %v4900_v14  ;;  %v1418_v54 = vpop.f32.mrf.mxu1 }
 0x252   :  { %v1224_v20 = vpack.c.bf16 %v1209_v19, %v1208_v18  ;;  %v4738_v18 = vld [vmem:[%s7021_s10 + $0x58] sm:$0xff] }
 0x253   :  { %1786 = vmatpush.bf16.msrb.mxu3 %v4738_v18 }
 0x256   :  { %v4893_v5 = vpop.permute.xlu1 %4892 }
 0x257   :  { %v4895_v6 = vunpack.i.h.bf16 %v4893_v5  ;;  %v4894_v7 = vunpack.i.l.bf16 %v4893_v5 }
 0x259   :  { %v1206_v10 = vsel %vm96_vm12, %v1094_v8, %v4894_v7  ;;  %v1207_v11 = vsel %vm96_vm12, %v1095_v9, %v4895_v6  ;;  %v1420_v61 = vpop.f32.mrf.mxu1 }
 0x25a   :  { %v1222_v12 = vpack.c.bf16 %v1207_v11, %v1206_v10 }
 0x25d   :  { %1373 = vmatmul.bf16.gmra.mxu0 %v1222_v12 }
 0x262   :  { %v1423_v1 = vpop.f32.mrf.mxu1 }
 0x26a   :  { %v1425_v5 = vpop.f32.mrf.mxu1 }
 0x26d   :  { %1378 = vmatmul.bf16.gmra.mxu0 %v1224_v20 }
 0x272   :  { %v1428_v12 = vpop.f32.mrf.mxu1 }
 0x277   :  { %v4903_v21 = vpop.permute.xlu0 %4902 }
 0x278   :  { %v4905_v22 = vunpack.i.h.bf16 %v4903_v21  ;;  %v4904_v23 = vunpack.i.l.bf16 %v4903_v21 }
 0x27a   :  { %v1210_v27 = vsel %vm96_vm12, %v1098_v25, %v4904_v23  ;;  %v1211_v28 = vsel %vm96_vm12, %v1099_v26, %v4905_v22  ;;  %v1430_v20 = vpop.f32.mrf.mxu1  ;;  %v4737_v26 = vld [vmem:[%s7021_s10 + $0x50] sm:$0xff] }
 0x27b   :  { %v1226_v29 = vpack.c.bf16 %v1211_v28, %v1210_v27  ;;  %1787 = vmatpush.bf16.msrb.mxu3 %v4737_v26 }
 0x27d   :  { %1383 = vmatmul.bf16.gmra.mxu0 %v1226_v29 }
 0x27e   :  { %v4913_v38 = vpop.permute.xlu2 %4912 }
 0x27f   :  { %v4915_v39 = vunpack.i.h.bf16 %v4913_v38  ;;  %v4914_v41 = vunpack.i.l.bf16 %v4913_v38 }
 0x281   :  { %v1214_v44 = vsel %vm96_vm12, %v1102_v42, %v4914_v41  ;;  %v1215_v46 = vsel %vm96_vm12, %v1103_v43, %v4915_v39 }
 0x282   :  { %v1230_v47 = vpack.c.bf16 %v1215_v46, %v1214_v44 }
 0x286   :  { %v4908_v30 = vpop.permute.xlu1 %4907 }
 0x287   :  { %v4910_v31 = vunpack.i.h.bf16 %v4908_v30  ;;  %v4909_v32 = vunpack.i.l.bf16 %v4908_v30  ;;  %v4736_v30 = vld [vmem:[%s7021_s10 + $0x48] sm:$0xff] }
 0x288   :  { %1788 = vmatpush.bf16.msrb.mxu3 %v4736_v30 }
 0x289   :  { %v1212_v35 = vsel %vm96_vm12, %v1100_v33, %v4909_v32  ;;  %v1213_v36 = vsel %vm96_vm12, %v1101_v34, %v4910_v31  ;;  %v1433_v33 = vpop.f32.mrf.mxu1 }
 0x28a   :  { %v1228_v37 = vpack.c.bf16 %v1213_v36, %v1212_v35  ;;  %v4735_v35 = vld [vmem:[%s7021_s10 + $0x40] sm:$0xff] }
 0x28c   :  { %1789 = vmatpush.bf16.msrb.mxu3 %v4735_v35 }
 0x28d   :  { %1388 = vmatmul.bf16.gmra.mxu0 %v1228_v37 }
 0x29d   :  { %1393 = vmatmul.bf16.gmra.mxu0 %v1230_v47  ;;  %v1435_v47 = vpop.f32.mrf.mxu1 }
 0x2a7   :  { %v4918_v48 = vpop.permute.xlu0 %4917 }
 0x2a8   :  { %v4920_v49 = vunpack.i.h.bf16 %v4918_v48  ;;  %v4919_v50 = vunpack.i.l.bf16 %v4918_v48 }
 0x2aa   :  { %v1216_v51 = vsel %vm96_vm12, %v1104_v24, %v4919_v50  ;;  %v1217_v52 = vsel %vm96_vm12, %v1105_v60, %v4920_v49 }
 0x2ab   :  { %v1232_v53 = vpack.c.bf16 %v1217_v52, %v1216_v51  ;;  %v1438_v52 = vpop.f32.mrf.mxu1 }
 0x2ad   :  { %1398 = vmatmul.bf16.gmra.mxu0 %v1232_v53 }
 0x2ae   :  { %v4923_v55 = vpop.permute.xlu1 %4922 }
 0x2af   :  { %v4925_v56 = vunpack.i.h.bf16 %v4923_v55  ;;  %v4924_v57 = vunpack.i.l.bf16 %v4923_v55 }
 0x2b1   :  { %v1218_v62 = vsel %vm96_vm12, %v1106_v58, %v4924_v57  ;;  %v1219_v63 = vsel %vm96_vm12, %v1107_v59, %v4925_v56 }
 0x2b2   :  { %v1234_v0 = vpack.c.bf16 %v1219_v63, %v1218_v62 }
 0x2b3   :  { %v1440_v63 = vpop.f32.mrf.mxu1 }
 0x2bd   :  { %1403 = vmatmul.bf16.gmra.mxu0 %v1234_v0 }
 0x2ca   :  { %v1369_v3 = vpop.f32.mrf.mxu0 }
 0x2cb   :  { %v1370_v4 = vadd.f32 %v5917_v2, %v1369_v3 }
 0x2cd   :  { %v1419_v6 = vadd.f32 %v1418_v54, %v1370_v4 }
 0x2cf   :  { %vm1458_vm14 = vcmp.gt.f32.partialorder %v1419_v6, 0.0  ;;  %v1474_v7 = vmul.f32 0.01, %v1419_v6 }
 0x2d1   :  { %v1490_v8 = vsel %vm1458_vm14, %v1419_v6, %v1474_v7 }
 0x2d2   :  { %1506 = vst.msk [vmem:[#allocation3] sm:$0xff] %vm96_vm12, %v1490_v8  ;;  %v1371_v9 = vpop.f32.mrf.mxu0 }
 0x2d3   :  { %v1372_v10 = vadd.f32 %v5917_v2, %v1371_v9 }
 0x2d5   :  { %v1421_v11 = vadd.f32 %v1420_v61, %v1372_v10 }
 0x2d7   :  { %vm1459_vm15 = vcmp.gt.f32.partialorder %v1421_v11, 0.0  ;;  %v1475_v13 = vmul.f32 0.01, %v1421_v11 }
 0x2d9   :  { %v1491_v14 = vsel %vm1459_vm15, %v1421_v11, %v1475_v13 }
 0x2da   :  { %1507 = vst.msk [vmem:[#allocation3 + $0x8] sm:$0xff] %vm96_vm12, %v1491_v14  ;;  %v1374_v15 = vpop.f32.mrf.mxu0 }
 0x2db   :  { %v1375_v16 = vadd.f32 %v5917_v2, %v1374_v15  ;;  %v1443_v15 = vpop.f32.mrf.mxu1 }
 0x2dd   :  { %v1424_v17 = vadd.f32 %v1423_v1, %v1375_v16 }
 0x2df   :  { %vm1460_vm0 = vcmp.gt.f32.partialorder %v1424_v17, 0.0  ;;  %v1476_v19 = vmul.f32 0.01, %v1424_v17 }
 0x2e1   :  { %v1522_v21 = vld [vmem:[#allocation3] ss:$2 sm:$0xff]  ;;  %v1538_v22 = vld [vmem:[#allocation3 + $0x1] ss:$2 sm:$0xff]  ;;  %v1492_v23 = vsel %vm1460_vm0, %v1424_v17, %v1476_v19 }
 0x2e2   :  { %1508 = vst.msk [vmem:[#allocation3 + $0x10] sm:$0xff] %vm96_vm12, %v1492_v23  ;;  %v1376_v25 = vpop.f32.mrf.mxu0  ;;  %v1553_v27 = vmax.f32 %v1522_v21, %v1538_v22 }
 0x2e3   :  { %v1377_v28 = vadd.f32 %v5917_v2, %v1376_v25  ;;  %v1445_v25 = vpop.f32.mrf.mxu1 }
 0x2e4   :  { %1561 = vst.msk [vmem:[#allocation3] sm:$0xff] %vm96_vm12, %v1553_v27 }
 0x2e5   :  { %v1426_v29 = vadd.f32 %v1425_v5, %v1377_v28 }
 0x2e7   :  { %vm1461_vm1 = vcmp.gt.f32.partialorder %v1426_v29, 0.0  ;;  %v1477_v31 = vmul.f32 0.01, %v1426_v29 }
 0x2e9   :  { %v1493_v32 = vsel %vm1461_vm1, %v1426_v29, %v1477_v31 }
 0x2ea   :  { %1509 = vst.msk [vmem:[#allocation3 + $0x18] sm:$0xff] %vm96_vm12, %v1493_v32  ;;  %v1379_v34 = vpop.f32.mrf.mxu0 }
 0x2eb   :  { %v1380_v36 = vadd.f32 %v5917_v2, %v1379_v34  ;;  %v1448_v35 = vpop.f32.mrf.mxu1 }
 0x2ed   :  { %v1429_v37 = vadd.f32 %v1428_v12, %v1380_v36 }
 0x2ef   :  { %vm1462_vm2 = vcmp.gt.f32.partialorder %v1429_v37, 0.0  ;;  %v1478_v38 = vmul.f32 0.01, %v1429_v37 }
 0x2f1   :  { %v1524_v39 = vld [vmem:[#allocation3 + $0x10] ss:$2 sm:$0xff]  ;;  %v1540_v41 = vld [vmem:[#allocation3 + $0x11] ss:$2 sm:$0xff]  ;;  %v1494_v42 = vsel %vm1462_vm2, %v1429_v37, %v1478_v38 }
 0x2f2   :  { %v1554_v43 = vmax.f32 %v1524_v39, %v1540_v41  ;;  %1510 = vst.msk [vmem:[#allocation3 + $0x20] sm:$0xff] %vm96_vm12, %v1494_v42  ;;  %v1381_v44 = vpop.f32.mrf.mxu0 }
 0x2f3   :  { %v1382_v46 = vadd.f32 %v5917_v2, %v1381_v44 }
 0x2f4   :  { %1562 = vst.msk [vmem:[#allocation3 + $0x8] sm:$0xff] %vm96_vm12, %v1554_v43 }
 0x2f5   :  { %v1431_v48 = vadd.f32 %v1430_v20, %v1382_v46 }
 0x2f7   :  { %vm1463_vm3 = vcmp.gt.f32.partialorder %v1431_v48, 0.0  ;;  %v1479_v49 = vmul.f32 0.01, %v1431_v48 }
 0x2f9   :  { %v1495_v50 = vsel %vm1463_vm3, %v1431_v48, %v1479_v49  ;;  %v1865_v49 = vld [vmem:[%s7057_s27] sm:$0xff] }
 0x2fa   :  { %1511 = vst.msk [vmem:[#allocation3 + $0x28] sm:$0xff] %vm96_vm12, %v1495_v50  ;;  %v1384_v24 = vpop.f32.mrf.mxu0  ;;  %v4734_v50 = vld [vmem:[%s7021_s10 + $0x38] sm:$0xff]  ;;  %vm1869_vm11 = vcmp.gt.f32.partialorder %v1865_v49, 0.0 }
 0x2fb   :  { %v1385_v60 = vadd.f32 %v5917_v2, %v1384_v24  ;;  %v1585_v3 = vld [vmem:[#allocation3 + $0x2] sm:$0xff]  ;;  %1753 = vmatpush.bf16.msrb.mxu2 %v4734_v50 }
 0x2fc   :  { %v1577_v6 = vld [vmem:[#allocation3 + $0x1] sm:$0xff] }
 0x2fd   :  { %v1434_v51 = vadd.f32 %v1433_v33, %v1385_v60  ;;  %v1450_v60 = vpop.f32.mrf.mxu1 }
 0x2ff   :  { %vm1464_vm4 = vcmp.gt.f32.partialorder %v1434_v51, 0.0  ;;  %v1480_v53 = vmul.f32 0.01, %v1434_v51 }
 0x301   :  { %v1526_v54 = vld [vmem:[#allocation3 + $0x20] ss:$2 sm:$0xff]  ;;  %v1542_v55 = vld [vmem:[#allocation3 + $0x21] ss:$2 sm:$0xff]  ;;  %v1496_v56 = vsel %vm1464_vm4, %v1434_v51, %v1480_v53 }
 0x302   :  { %v1555_v57 = vmax.f32 %v1526_v54, %v1542_v55  ;;  %1512 = vst.msk [vmem:[#allocation3 + $0x30] sm:$0xff] %vm96_vm12, %v1496_v56  ;;  %v1386_v58 = vpop.f32.mrf.mxu0  ;;  %v4733_v56 = vld [vmem:[%s7021_s10 + $0x30] sm:$0xff] }
 0x303   :  { %v1387_v59 = vadd.f32 %v5917_v2, %v1386_v58  ;;  %v1877_v58 = vsel %vm1869_vm11, 1, %v5239_v45  ;;  %1754 = vmatpush.bf16.msrb.mxu2 %v4733_v56 }
 0x304   :  { %1563 = vst.msk [vmem:[#allocation3 + $0x10] sm:$0xff] %vm96_vm12, %v1555_v57 }
 0x305   :  { %v1436_v61 = vadd.f32 %v1435_v47, %v1387_v59 }
 0x307   :  { %vm1465_vm5 = vcmp.gt.f32.partialorder %v1436_v61, 0.0  ;;  %v1481_v62 = vmul.f32 0.01, %v1436_v61 }
 0x309   :  { %v1497_v0 = vsel %vm1465_vm5, %v1436_v61, %v1481_v62  ;;  %v1868_v61 = vld [vmem:[%s7057_s27 + $0x18] sm:$0xff]  ;;  %v4732_v62 = vld [vmem:[%s7021_s10 + $0x28] sm:$0xff]  ;;  %vm1855_vm5 = vcmask 516096  }
 0x30a   :  { %1513 = vst.msk [vmem:[#allocation3 + $0x38] sm:$0xff] %vm96_vm12, %v1497_v0  ;;  %v1389_v1 = vpop.f32.mrf.mxu0  ;;  %vm1872_vm14 = vcmp.gt.f32.partialorder %v1868_v61, 0.0  ;;  %1755 = vmatpush.bf16.msrb.mxu2 %v4732_v62  ;;  %v4731_v0 = vld [vmem:[%s7021_s10 + $0x20] sm:$0xff] }
 0x30b   :  { %v1390_v4 = vadd.f32 %v5917_v2, %v1389_v1  ;;  %v1586_v5 = vld [vmem:[#allocation3 + $0xa] sm:$0xff] }
 0x30c   :  { %v1578_v7 = vld [vmem:[#allocation3 + $0x9] sm:$0xff]  ;;  %v1634_v8 = vpack.c.bf16 %v1586_v5, %v1585_v3  ;;  %v1453_v3 = vpop.f32.mrf.mxu1 }
 0x30d   :  { %v4926_v9 = vpack.i.bf16 %v1578_v7, %v1577_v6  ;;  %v1439_v10 = vadd.f32 %v1438_v52, %v1390_v4  ;;  %v1880_v6 = vsel %vm1872_vm14, 1, %v5239_v45 }
 0x30e   :  { %4398 = vmatmul.msk.bf16.vlgmr.msrb.gmra.mxu3 %vm96_vm12, %v1634_v8  ;;  %1756 = vmatpush.bf16.msrb.mxu2 %v4731_v0  ;;  %v4730_v8 = vld [vmem:[%s7021_s10 + $0x18] sm:$0xff] }
 0x30f   :  { %4927 = vrot.lane.b32.xlu2 %v4926_v9, %s5241_s9  ;;  %vm1466_vm6 = vcmp.gt.f32.partialorder %v1439_v10, 0.0  ;;  %v1482_v11 = vmul.f32 0.01, %v1439_v10 }
 0x311   :  { %v1528_v12 = vld [vmem:[#allocation3 + $0x30] ss:$2 sm:$0xff]  ;;  %v1544_v13 = vld [vmem:[#allocation3 + $0x31] ss:$2 sm:$0xff]  ;;  %v1498_v14 = vsel %vm1466_vm6, %v1439_v10, %v1482_v11  ;;  %v4729_v10 = vld [vmem:[%s7021_s10 + $0x10] sm:$0xff] }
 0x312   :  { %v1556_v16 = vmax.f32 %v1528_v12, %v1544_v13  ;;  %1514 = vst.msk [vmem:[#allocation3 + $0x40] sm:$0xff] %vm96_vm12, %v1498_v14  ;;  %v1391_v17 = vpop.f32.mrf.mxu0  ;;  %1757 = vmatpush.bf16.msrb.mxu2 %v4730_v8 }
 0x313   :  { %v1392_v18 = vadd.f32 %v5917_v2, %v1391_v17 }
 0x314   :  { %1564 = vst.msk [vmem:[#allocation3 + $0x18] sm:$0xff] %vm96_vm12, %v1556_v16  ;;  %v1455_v17 = vpop.f32.mrf.mxu1 }
 0x315   :  { %v1441_v19 = vadd.f32 %v1440_v63, %v1392_v18 }
 0x316   :  { %1758 = vmatpush.bf16.msrb.mxu2 %v4729_v10 }
 0x317   :  { %vm1467_vm7 = vcmp.gt.f32.partialorder %v1441_v19, 0.0  ;;  %v1483_v20 = vmul.f32 0.01, %v1441_v19 }
 0x319   :  { %v1499_v21 = vsel %vm1467_vm7, %v1441_v19, %v1483_v20  ;;  %v4728_v19 = vld [vmem:[%s7021_s10 + $0x8] sm:$0xff] }
 0x31a   :  { %1515 = vst.msk [vmem:[#allocation3 + $0x48] sm:$0xff] %vm96_vm12, %v1499_v21  ;;  %v1394_v22 = vpop.f32.mrf.mxu0  ;;  %1759 = vmatpush.bf16.msrb.mxu2 %v4728_v19 }
 0x31b   :  { %v1395_v23 = vadd.f32 %v5917_v2, %v1394_v22  ;;  %v1579_v39 = vld [vmem:[#allocation3 + $0x11] sm:$0xff] }
 0x31c   :  { %v1587_v43 = vld [vmem:[#allocation3 + $0x12] sm:$0xff] }
 0x31d   :  { %v1444_v26 = vadd.f32 %v1443_v15, %v1395_v23  ;;  %v4727_v22 = vld [vmem:[%s7021_s10] sm:$0xff]  ;;  %s7059_s10 = sld [smem:[#allocation11_spill]] }
 0x31e   :  { %1760 = vmatpush.bf16.msrb.mxu2 %v4727_v22 }
 0x31f   :  { %vm1468_vm8 = vcmp.gt.f32.partialorder %v1444_v26, 0.0  ;;  %v1484_v27 = vmul.f32 0.01, %v1444_v26 }
 0x321   :  { %v1530_v28 = vld [vmem:[#allocation3 + $0x40] ss:$2 sm:$0xff]  ;;  %v1546_v29 = vld [vmem:[#allocation3 + $0x41] ss:$2 sm:$0xff]  ;;  %v1500_v30 = vsel %vm1468_vm8, %v1444_v26, %v1484_v27 }
 0x322   :  { %v1557_v31 = vmax.f32 %v1530_v28, %v1546_v29  ;;  %1516 = vst.msk [vmem:[#allocation3 + $0x50] sm:$0xff] %vm96_vm12, %v1500_v30  ;;  %v1396_v32 = vpop.f32.mrf.mxu0  ;;  %v1866_v29 = vld [vmem:[%s7057_s27 + $0x8] sm:$0xff] }
 0x323   :  { %v1397_v33 = vadd.f32 %v5917_v2, %v1396_v32  ;;  %vm1870_vm1 = vcmp.gt.f32.partialorder %v1866_v29, 0.0  ;;  %v4745_v29 = vld [vmem:[%s7023_s12 + $0x34] sm:$0xf] }
 0x324   :  { %1565 = vst.msk [vmem:[#allocation3 + $0x20] sm:$0xff] %vm96_vm12, %v1557_v31 }
 0x325   :  { %v1446_v34 = vadd.f32 %v1445_v25, %v1397_v33  ;;  %v1878_v33 = vsel %vm1870_vm1, 1, %v5239_v45  ;;  %vm2053_vm1 = vcmask 130048  }
 0x327   :  { %vm1469_vm9 = vcmp.gt.f32.partialorder %v1446_v34, 0.0  ;;  %v1485_v36 = vmul.f32 0.01, %v1446_v34 }
 0x329   :  { %v1501_v37 = vsel %vm1469_vm9, %v1446_v34, %v1485_v36 }
 0x32a   :  { %1517 = vst.msk [vmem:[#allocation3 + $0x58] sm:$0xff] %vm96_vm12, %v1501_v37  ;;  %v1399_v38 = vpop.f32.mrf.mxu0 }
 0x32b   :  { %v1400_v41 = vadd.f32 %v5917_v2, %v1399_v38  ;;  %v1580_v42 = vld [vmem:[#allocation3 + $0x19] sm:$0xff] }
 0x32c   :  { %v1588_v44 = vld [vmem:[#allocation3 + $0x1a] sm:$0xff]  ;;  %v4931_v46 = vpack.i.bf16 %v1580_v42, %v1579_v39 }
 0x32d   :  { %v1636_v47 = vpack.c.bf16 %v1588_v44, %v1587_v43  ;;  %v1449_v48 = vadd.f32 %v1448_v35, %v1400_v41  ;;  %v1867_v41 = vld [vmem:[%s7057_s27 + $0x10] sm:$0xff]  ;;  %v1573_v61 = vld [vmem:[#allocation3 + $0x20] sm:$0xff] }
 0x32e   :  { %4932 = vrot.lane.b32.xlu0 %v4931_v46, %s5241_s9  ;;  %vm1871_vm2 = vcmp.gt.f32.partialorder %v1867_v41, 0.0  ;;  %v4412_v41 = vld [vmem:[%s7023_s12 + $0x10] sm:$0xf] }
 0x32f   :  { %4399 = vmatmul.msk.bf16.gmra.mxu3 %vm96_vm12, %v1636_v47  ;;  %vm1470_vm10 = vcmp.gt.f32.partialorder %v1449_v48, 0.0  ;;  %v1486_v24 = vmul.f32 0.01, %v1449_v48  ;;  %v1879_v42 = vsel %vm1871_vm2, 1, %v5239_v45  ;;  %v1569_v47 = vld [vmem:[#allocation3] sm:$0xff] }
 0x331   :  { %v1532_v51 = vld [vmem:[#allocation3 + $0x50] ss:$2 sm:$0xff]  ;;  %v1548_v52 = vld [vmem:[#allocation3 + $0x51] ss:$2 sm:$0xff]  ;;  %v1502_v53 = vsel %vm1470_vm10, %v1449_v48, %v1486_v24  ;;  %v1570_v48 = vld [vmem:[#allocation3 + $0x8] sm:$0xff] }
 0x332   :  { %v1558_v54 = vmax.f32 %v1532_v51, %v1548_v52  ;;  %1518 = vst.msk [vmem:[#allocation3 + $0x60] sm:$0xff] %vm96_vm12, %v1502_v53  ;;  %v1401_v55 = vpop.f32.mrf.mxu0  ;;  %v1571_v53 = vld [vmem:[#allocation3 + $0x10] sm:$0xff] }
 0x333   :  { %v1402_v57 = vadd.f32 %v5917_v2, %v1401_v55 }
 0x334   :  { %1566 = vst.msk [vmem:[#allocation3 + $0x28] sm:$0xff] %vm96_vm12, %v1558_v54  ;;  %v1572_v54 = vld [vmem:[#allocation3 + $0x18] sm:$0xff] }
 0x335   :  { %v1451_v59 = vadd.f32 %v1450_v60, %v1402_v57 }
 0x336   :  { %1882 = vperm.xlu0 %4885, %v1877_v58  }
 0x337   :  { %vm1471_vm13 = vcmp.gt.f32.partialorder %v1451_v59, 0.0  ;;  %v1487_v63 = vmul.f32 0.01, %v1451_v59 }
 0x339   :  { %v1503_v1 = vsel %vm1471_vm13, %v1451_v59, %v1487_v63 }
 0x33a   :  { %1519 = vst.msk [vmem:[#allocation3 + $0x68] sm:$0xff] %vm96_vm12, %v1503_v1  ;;  %v1404_v4 = vpop.f32.mrf.mxu0 }
 0x33b   :  { %v1405_v5 = vadd.f32 %v5917_v2, %v1404_v4  ;;  %v1589_v25 = vld [vmem:[#allocation3 + $0x22] sm:$0xff] }
 0x33c   :  { %v1574_v62 = vld [vmem:[#allocation3 + $0x28] sm:$0xff] }
 0x33d   :  { %v1454_v7 = vadd.f32 %v1453_v3, %v1405_v5 }
 0x33e   :  { %1891 = vperm.xlu0 %4885, %v1880_v6  }
 0x33f   :  { %vm1472_vm15 = vcmp.gt.f32.partialorder %v1454_v7, 0.0  ;;  %v1488_v9 = vmul.f32 0.01, %v1454_v7 }
 0x341   :  { %v1534_v11 = vld [vmem:[#allocation3 + $0x60] ss:$2 sm:$0xff]  ;;  %v1550_v12 = vld [vmem:[#allocation3 + $0x61] ss:$2 sm:$0xff]  ;;  %v1504_v13 = vsel %vm1472_vm15, %v1454_v7, %v1488_v9 }
 0x342   :  { %v1559_v14 = vmax.f32 %v1534_v11, %v1550_v12  ;;  %1520 = vst.msk [vmem:[#allocation3 + $0x70] sm:$0xff] %vm96_vm12, %v1504_v13  ;;  %v1406_v15 = vpop.f32.mrf.mxu0  ;;  %v6030_v11 = vld [vmem:[%s7022_s11] ss:$0 sm:$0xff]  ;;  %s7058_s11 = sld [smem:[#allocation10_spill]] }
 0x343   :  { %v1407_v16 = vadd.f32 %v5917_v2, %v1406_v15  ;;  %v1581_v2 = vld [vmem:[#allocation3 + $0x21] sm:$0xff] }
 0x344   :  { %1567 = vst.msk [vmem:[#allocation3 + $0x30] sm:$0xff] %vm96_vm12, %v1559_v14 }
 0x345   :  { %v1456_v18 = vadd.f32 %v1455_v17, %v1407_v16 }
 0x347   :  { %vm1473_vm0 = vcmp.gt.f32.partialorder %v1456_v18, 0.0  ;;  %v1489_v20 = vmul.f32 0.01, %v1456_v18 }
 0x349   :  { %v1505_v21 = vsel %vm1473_vm0, %v1456_v18, %v1489_v20 }
 0x34a   :  { %1521 = vst.msk [vmem:[#allocation3 + $0x78] sm:$0xff] %vm96_vm12, %v1505_v21 }
 0x34b   :  { %v1582_v23 = vld [vmem:[#allocation3 + $0x29] sm:$0xff] }
 0x34c   :  { %v1590_v26 = vld [vmem:[#allocation3 + $0x2a] sm:$0xff]  ;;  %v4936_v27 = vpack.i.bf16 %v1582_v23, %v1581_v2 }
 0x34d   :  { %v1638_v28 = vpack.c.bf16 %v1590_v26, %v1589_v25  ;;  %v1575_v6 = vld [vmem:[#allocation3 + $0x30] sm:$0xff] }
 0x34e   :  { %4937 = vrot.lane.b32.xlu1 %v4936_v27, %s5241_s9  ;;  %v4428_v27 = vld [vmem:[%s7023_s12 + $0x30] sm:$0xf] }
 0x34f   :  { %4400 = vmatmul.msk.bf16.gmra.mxu3 %vm96_vm12, %v1638_v28  ;;  %v4746_v28 = vld [vmem:[%s7023_s12 + $0x34] sm:$0xf0] }
 0x351   :  { %v1536_v30 = vld [vmem:[#allocation3 + $0x70] ss:$2 sm:$0xff]  ;;  %v1552_v31 = vld [vmem:[#allocation3 + $0x71] ss:$2 sm:$0xff] }
 0x352   :  { %v1560_v32 = vmax.f32 %v1536_v30, %v1552_v31  ;;  %v4429_v30 = vor.u32 %v4746_v28, %v4428_v27  ;;  %v4430_v31 = vld [vmem:[%s7023_s12 + $0x38] sm:$0xf0] }
 0x354   :  { %1568 = vst.msk [vmem:[#allocation3 + $0x38] sm:$0xff] %vm96_vm12, %v1560_v32  ;;  %v4744_v32 = vld [vmem:[%s7023_s12 + $0x24] sm:$0xf0]  ;;  %2001 = vmatpush.bf16.msra.mxu2 %v4429_v30 }
 0x356   :  { %1885 = vperm.xlu1 %4883, %v1878_v33   ;;  %v4433_v33 = vor.u32 %v4745_v29, %v4430_v31 }
 0x358   :  { %2020 = vmatpush.bf16.msra.mxu3 %v4433_v33 }
 0x35b   :  { %v1591_v34 = vld [vmem:[#allocation3 + $0x32] sm:$0xff]  ;;  %v1592_v35 = vld [vmem:[#allocation3 + $0x3a] sm:$0xff] }
 0x35c   :  { %v1583_v36 = vld [vmem:[#allocation3 + $0x31] sm:$0xff]  ;;  %v1640_v37 = vpack.c.bf16 %v1592_v35, %v1591_v34  ;;  %v1584_v38 = vld [vmem:[#allocation3 + $0x39] sm:$0xff]  ;;  %v4422_v35 = vld [vmem:[%s7023_s12 + $0x28] sm:$0xf0] }
 0x35d   :  { %v4941_v39 = vpack.i.bf16 %v1584_v38, %v1583_v36  ;;  %v1576_v7 = vld [vmem:[#allocation3 + $0x38] sm:$0xff] }
 0x35e   :  { %v4743_v34 = vld [vmem:[%s7023_s12 + $0x24] sm:$0xf] }
 0x35f   :  { %4401 = vmatmul.msk.bf16.gmra.mxu3 %vm96_vm12, %v1640_v37  ;;  %4942 = vrot.lane.b32.xlu2 %v4941_v39, %s5241_s9  ;;  %v4425_v37 = vor.u32 %v4743_v34, %v4422_v35 }
 0x361   :  { %2021 = vmatpush.bf16.msra.mxu3 %v4425_v37 }
 0x367   :  { %1888 = vperm.xlu2 %4884, %v1879_v42   ;;  %v4742_v42 = vld [vmem:[%s7023_s12 + $0x14] sm:$0xf0] }
 0x369   :  { %v4928_v43 = vpop.permute.xlu2 %4927 }
 0x36a   :  { %v4930_v44 = vunpack.i.h.bf16 %v4928_v43  ;;  %v4929_v46 = vunpack.i.l.bf16 %v4928_v43  ;;  %v4741_v43 = vld [vmem:[%s7023_s12 + $0x14] sm:$0xf] }
 0x36c   :  { %v1625_v49 = vsel %vm96_vm12, %v1569_v47, %v4929_v46  ;;  %v1626_v50 = vsel %vm96_vm12, %v1570_v48, %v4930_v44  ;;  %v4413_v46 = vor.u32 %v4742_v42, %v4412_v41  ;;  %v4414_v47 = vld [vmem:[%s7023_s12 + $0x18] sm:$0xf0] }
 0x36d   :  { %v1633_v24 = vpack.c.bf16 %v1626_v50, %v1625_v49  ;;  %v4417_v48 = vor.u32 %v4741_v43, %v4414_v47  ;;  %v4404_v50 = vld [vmem:[%s7023_s12] sm:$0xf] }
 0x36f   :  { %1761 = vmatmul.bf16.vlgmr.msrb.gmra.mxu2 %v1633_v24  ;;  %2022 = vmatpush.bf16.msra.mxu3 %v4417_v48  ;;  %v4740_v24 = vld [vmem:[%s7023_s12 + $0x4] sm:$0xf0] }
 0x391   :  { %v1791_v12 = vpop.f32.mrf.mxu3 }
 0x399   :  { %v1793_v20 = vpop.f32.mrf.mxu3 }
 0x3a0   :  { %v4933_v60 = vpop.permute.xlu0 %4932 }
 0x3a1   :  { %v4935_v51 = vunpack.i.h.bf16 %v4933_v60  ;;  %v4934_v52 = vunpack.i.l.bf16 %v4933_v60  ;;  %v4739_v60 = vld [vmem:[%s7023_s12 + $0x4] sm:$0xf] }
 0x3a3   :  { %v1627_v55 = vsel %vm96_vm12, %v1571_v53, %v4934_v52  ;;  %v1628_v45 = vsel %vm96_vm12, %v1572_v54, %v4935_v51  ;;  %v4405_v52 = vor.u32 %v4740_v24, %v4404_v50  ;;  %v4406_v53 = vld [vmem:[%s7023_s12 + $0x8] sm:$0xf0] }
 0x3a4   :  { %v1635_v56 = vpack.c.bf16 %v1628_v45, %v1627_v55  ;;  %v4409_v54 = vor.u32 %v4739_v60, %v4406_v53 }
 0x3a6   :  { %1766 = vmatmul.bf16.gmra.mxu2 %v1635_v56  ;;  %2023 = vmatpush.bf16.msra.mxu3 %v4409_v54 }
 0x3b2   :  { %v1796_v38 = vpop.f32.mrf.mxu3 }
 0x3b9   :  { %v4943_v3 = vpop.permute.xlu2 %4942 }
 0x3ba   :  { %v4945_v4 = vunpack.i.h.bf16 %v4943_v3  ;;  %v4944_v5 = vunpack.i.l.bf16 %v4943_v3 }
 0x3bc   :  { %v1631_v8 = vsel %vm96_vm12, %v1575_v6, %v4944_v5  ;;  %v1632_v9 = vsel %vm96_vm12, %v1576_v7, %v4945_v4  ;;  %v1883_v4 = vpop.permute.xlu0 %1882 }
 0x3bd   :  { %v1639_v10 = vpack.c.bf16 %v1632_v9, %v1631_v8  ;;  %vm1893_vm8 = vcmp.eq.s32.totalorder %v1883_v4, 1 }
 0x3c0   :  { %v4938_v57 = vpop.permute.xlu1 %4937 }
 0x3c1   :  { %v4940_v58 = vunpack.i.h.bf16 %v4938_v57  ;;  %v4939_v59 = vunpack.i.l.bf16 %v4938_v57  ;;  %v1798_v57 = vpop.f32.mrf.mxu3  ;;  %v1889_v48 = vpop.permute.xlu2 %1888 }
 0x3c2   :  { %vm1895_vm15 = vcmp.eq.s32.totalorder %v1889_v48, 1  ;;  %v6179_v48 = vld [vmem:[%s7060_s0] ss:$0 sm:$0xff] }
 0x3c3   :  { %v1629_v63 = vsel %vm96_vm12, %v1573_v61, %v4939_v59  ;;  %v1630_v0 = vsel %vm96_vm12, %v1574_v62, %v4940_v58 }
 0x3c4   :  { %v1637_v1 = vpack.c.bf16 %v1630_v0, %v1629_v63  ;;  %v1892_v50 = vpop.permute.xlu0 %1891 }
 0x3c5   :  { %vm1896_vm0 = vcmp.eq.s32.totalorder %v1892_v50, 1 }
 0x3c6   :  { %1771 = vmatmul.bf16.gmra.mxu2 %v1637_v1 }
 0x3c8   :  { %v1886_v6 = vpop.permute.xlu1 %1885 }
 0x3c9   :  { %vm1894_vm9 = vcmp.eq.s32.totalorder %v1886_v6, 1 }
 0x3d2   :  { %v1801_v3 = vpop.f32.mrf.mxu3 }
 0x3d6   :  { %1776 = vmatmul.bf16.gmra.mxu2 %v1639_v10 }
 0x3f2   :  { %v1762_v13 = vpop.f32.mrf.mxu2 }
 0x3f3   :  { %v1763_v14 = vadd.f32 %v6030_v11, %v1762_v13  ;;  %v1901_v13 = vld [vmem:[%s7058_s11] sm:$0xff] }
 0x3f5   :  { %v1792_v15 = vadd.f32 %v1791_v12, %v1763_v14  ;;  %v1902_v14 = vld [vmem:[%s7058_s11 + $0x8] sm:$0xff] }
 0x3f7   :  { %vm1811_vm3 = vcmp.gt.f32.partialorder %v1792_v15, 0.0  ;;  %v1819_v16 = vmul.f32 0.01, %v1792_v15 }
 0x3f9   :  { %v1827_v17 = vsel %vm1811_vm3, %v1792_v15, %v1819_v16  ;;  %vm2093_vm3 = vcmask 261120  }
 0x3fa   :  { %1835 = vst.msk [vmem:[#allocation3] sm:$0xff] %vm96_vm12, %v1827_v17  ;;  %v1764_v18 = vpop.f32.mrf.mxu2 }
 0x3fb   :  { %v1765_v19 = vadd.f32 %v6030_v11, %v1764_v18 }
 0x3fd   :  { %v1794_v21 = vadd.f32 %v1793_v20, %v1765_v19  ;;  %v1803_v20 = vpop.f32.mrf.mxu3 }
 0x3ff   :  { %vm1812_vm4 = vcmp.gt.f32.partialorder %v1794_v21, 0.0  ;;  %v1820_v22 = vmul.f32 0.01, %v1794_v21 }
 0x401   :  { %v1828_v2 = vsel %vm1812_vm4, %v1794_v21, %v1820_v22 }
 0x402   :  { %1836 = vst.msk [vmem:[#allocation3 + $0x8] sm:$0xff] %vm96_vm12, %v1828_v2 }
 0x405   :  { %v1806_v28 = vpop.f32.mrf.mxu3 }
 0x409   :  { %v1843_v23 = vld [vmem:[#allocation3] ss:$2 sm:$0xff]  ;;  %v1847_v25 = vld [vmem:[#allocation3 + $0x1] ss:$2 sm:$0xff] }
 0x40a   :  { %v1851_v26 = vmax.f32 %v1843_v23, %v1847_v25  ;;  %1856 = vst.msk [vmem:[#allocation3] sm:$0x1] %vm1855_vm5, %v5240_v40  ;;  %v4420_v40 = vld [vmem:[%s7023_s12 + $0x20] sm:$0xf] }
 0x40b   :  { %v4421_v36 = vor.u32 %v4744_v32, %v4420_v40 }
 0x40c   :  { %1857 = vst.msk [vmem:[#allocation3 + $0x1] sm:$0xff] %vm96_vm12, %v1851_v26 }
 0x40d   :  { %2002 = vmatpush.bf16.msra.mxu2 %v4421_v36 }
 0x411   :  { %2003 = vmatpush.bf16.msra.mxu2 %v4413_v46 }
 0x413   :  { %v1861_v1 = vld [vmem:[#allocation3] sm:$0xff] }
 0x414   :  { %v1873_v5 = vmul.f32 8.0, %v1861_v1 }
 0x415   :  { %2004 = vmatpush.bf16.msra.mxu2 %v4405_v52  ;;  %v1904_v52 = vld [vmem:[%s7058_s11 + $0x18] sm:$0xff] }
 0x416   :  { %v1897_v12 = vsel %vm1893_vm8, %v1873_v5, 0.0 }
 0x417   :  { %v6098_v18 = vadd.f32 %v1901_v13, %v1897_v12  ;;  %v1911_v12 = vld [vmem:[%s7059_s10 + $0x10] sm:$0xff] }
 0x429   :  { %v1767_v39 = vpop.f32.mrf.mxu2 }
 0x42a   :  { %v1768_v44 = vadd.f32 %v6030_v11, %v1767_v39 }
 0x42c   :  { %v1797_v49 = vadd.f32 %v1796_v38, %v1768_v44  ;;  %v1808_v38 = vpop.f32.mrf.mxu3 }
 0x42e   :  { %vm1813_vm6 = vcmp.gt.f32.partialorder %v1797_v49, 0.0  ;;  %v1821_v51 = vmul.f32 0.01, %v1797_v49 }
 0x430   :  { %v1829_v55 = vsel %vm1813_vm6, %v1797_v49, %v1821_v51  ;;  %v1903_v51 = vld [vmem:[%s7058_s11 + $0x10] sm:$0xff] }
 0x431   :  { %1837 = vst.msk [vmem:[#allocation3 + $0x10] sm:$0xff] %vm96_vm12, %v1829_v55  ;;  %v1769_v45 = vpop.f32.mrf.mxu2 }
 0x432   :  { %v1770_v56 = vadd.f32 %v6030_v11, %v1769_v45 }
 0x434   :  { %v1799_v58 = vadd.f32 %v1798_v57, %v1770_v56  ;;  %v1945_v56 = vld [vmem:[%s7024_s13] sm:$0x3] }
 0x436   :  { %vm1814_vm7 = vcmp.gt.f32.partialorder %v1799_v58, 0.0  ;;  %v1822_v59 = vmul.f32 0.01, %v1799_v58 }
 0x438   :  { %v1830_v61 = vsel %vm1814_vm7, %v1799_v58, %v1822_v59  ;;  %v1947_v59 = vperm.slane %v1945_v56, 0  ;;  %vm2601_vm7 = vcmask 392192  }
 0x439   :  { %1838 = vst.msk [vmem:[#allocation3 + $0x18] sm:$0xff] %vm96_vm12, %v1830_v61  ;;  %v1948_v61 = vperm.slane %v1945_v56, 1 }
 0x440   :  { %v1844_v62 = vld [vmem:[#allocation3 + $0x10] ss:$2 sm:$0xff]  ;;  %v1848_v63 = vld [vmem:[#allocation3 + $0x11] ss:$2 sm:$0xff] }
 0x441   :  { %v1852_v0 = vmax.f32 %v1844_v62, %v1848_v63 }
 0x443   :  { %1858 = vst.msk [vmem:[#allocation3 + $0x9] sm:$0xff] %vm96_vm12, %v1852_v0 }
 0x449   :  { %v1772_v7 = vpop.f32.mrf.mxu2 }
 0x44a   :  { %v1773_v8 = vadd.f32 %v6030_v11, %v1772_v7  ;;  %v1862_v9 = vld [vmem:[#allocation3 + $0x8] sm:$0xff] }
 0x44b   :  { %v1874_v10 = vmul.f32 8.0, %v1862_v9 }
 0x44c   :  { %v1802_v15 = vadd.f32 %v1801_v3, %v1773_v8 }
 0x44d   :  { %v1898_v16 = vsel %vm1894_vm9, %v1874_v10, 0.0  ;;  %v1912_v10 = vld [vmem:[%s7059_s10 + $0x18] sm:$0xff] }
 0x44e   :  { %vm1815_vm10 = vcmp.gt.f32.partialorder %v1802_v15, 0.0  ;;  %v1823_v17 = vmul.f32 0.01, %v1802_v15  ;;  %v6100_v19 = vadd.f32 %v1902_v14, %v1898_v16 }
 0x450   :  { %v1831_v21 = vsel %vm1815_vm10, %v1802_v15, %v1823_v17  ;;  %v1935_v22 = vpack.c.bf16 %v6100_v19, %v6098_v18 }
 0x451   :  { %1839 = vst.msk [vmem:[#allocation3 + $0x20] sm:$0xff] %vm96_vm12, %v1831_v21  ;;  %v1774_v2 = vpop.f32.mrf.mxu2 }
 0x452   :  { %v1775_v23 = vadd.f32 %v6030_v11, %v1774_v2  ;;  %4434 = vmatmul.msk.bf16.vlgmr.msra.gmra.mxu2 %vm96_vm12, %v1935_v22  ;;  %4436 = vmatmul.msk.bf16.vlgmr.msra.gmra.mxu3 %vm96_vm12, %v1935_v22 }
 0x454   :  { %v1804_v25 = vadd.f32 %v1803_v20, %v1775_v23 }
 0x456   :  { %vm1816_vm11 = vcmp.gt.f32.partialorder %v1804_v25, 0.0  ;;  %v1824_v26 = vmul.f32 0.01, %v1804_v25 }
 0x458   :  { %v1832_v27 = vsel %vm1816_vm11, %v1804_v25, %v1824_v26 }
 0x459   :  { %1840 = vst.msk [vmem:[#allocation3 + $0x28] sm:$0xff] %vm96_vm12, %v1832_v27  ;;  %v1777_v29 = vpop.f32.mrf.mxu2 }
 0x45a   :  { %v1778_v30 = vadd.f32 %v6030_v11, %v1777_v29 }
 0x45c   :  { %v1807_v31 = vadd.f32 %v1806_v28, %v1778_v30 }
 0x45e   :  { %vm1817_vm13 = vcmp.gt.f32.partialorder %v1807_v31, 0.0  ;;  %v1825_v40 = vmul.f32 0.01, %v1807_v31 }
 0x460   :  { %v1845_v32 = vld [vmem:[#allocation3 + $0x20] ss:$2 sm:$0xff]  ;;  %v1849_v33 = vld [vmem:[#allocation3 + $0x21] ss:$2 sm:$0xff]  ;;  %v1833_v34 = vsel %vm1817_vm13, %v1807_v31, %v1825_v40 }
 0x461   :  { %v1853_v35 = vmax.f32 %v1845_v32, %v1849_v33  ;;  %1841 = vst.msk [vmem:[#allocation3 + $0x30] sm:$0xff] %vm96_vm12, %v1833_v34  ;;  %v1779_v36 = vpop.f32.mrf.mxu2 }
 0x462   :  { %v1780_v37 = vadd.f32 %v6030_v11, %v1779_v36 }
 0x463   :  { %1859 = vst.msk [vmem:[#allocation3 + $0x11] sm:$0xff] %vm96_vm12, %v1853_v35 }
 0x464   :  { %v1809_v39 = vadd.f32 %v1808_v38, %v1780_v37 }
 0x466   :  { %vm1818_vm14 = vcmp.gt.f32.partialorder %v1809_v39, 0.0  ;;  %v1826_v41 = vmul.f32 0.01, %v1809_v39 }
 0x468   :  { %v1834_v42 = vsel %vm1818_vm14, %v1809_v39, %v1826_v41 }
 0x469   :  { %1842 = vst.msk [vmem:[#allocation3 + $0x38] sm:$0xff] %vm96_vm12, %v1834_v42 }
 0x46a   :  { %v1863_v47 = vld [vmem:[#allocation3 + $0x10] sm:$0xff] }
 0x46b   :  { %v1875_v49 = vmul.f32 8.0, %v1863_v47 }
 0x46d   :  { %v1899_v60 = vsel %vm1895_vm15, %v1875_v49, 0.0 }
 0x46e   :  { %v6121_v54 = vadd.f32 %v1903_v51, %v1899_v60 }
 0x470   :  { %v1846_v43 = vld [vmem:[#allocation3 + $0x30] ss:$2 sm:$0xff]  ;;  %v1850_v44 = vld [vmem:[#allocation3 + $0x31] ss:$2 sm:$0xff] }
 0x471   :  { %v1854_v46 = vmax.f32 %v1846_v43, %v1850_v44 }
 0x473   :  { %1860 = vst.msk [vmem:[#allocation3 + $0x19] sm:$0xff] %vm96_vm12, %v1854_v46 }
 0x47a   :  { %v1864_v11 = vld [vmem:[#allocation3 + $0x18] sm:$0xff] }
 0x47b   :  { %v1876_v24 = vmul.f32 8.0, %v1864_v11 }
 0x47d   :  { %v1900_v53 = vsel %vm1896_vm0, %v1876_v24, 0.0  ;;  %v5244_v24 = vmov -1e+30  }
 0x47e   :  { %v6123_v55 = vadd.f32 %v1904_v52, %v1900_v53 }
 0x480   :  { %v1936_v45 = vpack.c.bf16 %v6123_v55, %v6121_v54 }
 0x482   :  { %4435 = vmatmul.msk.bf16.gmra.mxu2 %vm96_vm12, %v1936_v45  ;;  %4437 = vmatmul.msk.bf16.gmra.mxu3 %vm96_vm12, %v1936_v45 }
 0x4d5   :  { %v2006_v57 = vpop.f32.mrf.mxu2  ;;  %v2025_v58 = vpop.f32.mrf.mxu3 }
 0x4d6   :  { %v2007_v62 = vadd.f32 %v2006_v57, %v1947_v59  ;;  %v2026_v63 = vadd.f32 %v2025_v58, %v1948_v61 }
 0x4d8   :  { %v2035_v3 = vpack.c.bf16 %v2026_v63, %v2007_v62 }
 0x4da   :  { %v2043_v7 = vunpack.c.l.b16 %v2035_v3  ;;  %v2140_v14 = vunpack.c.h.b16 %v2035_v3 }
 0x4dd   :  { %v2008_v0 = vpop.f32.mrf.mxu2  ;;  %v2027_v1 = vpop.f32.mrf.mxu3 }
 0x4de   :  { %v2009_v4 = vadd.f32 %v2008_v0, %v1947_v59  ;;  %v2028_v5 = vadd.f32 %v2027_v1, %v1948_v61 }
 0x4e0   :  { %v2036_v6 = vpack.c.bf16 %v2028_v5, %v2009_v4 }
 0x4e2   :  { %v2044_v8 = vunpack.c.l.b16 %v2036_v6  ;;  %v2141_v13 = vunpack.c.h.b16 %v2036_v6 }
 0x4e4   :  { %v6132_v9 = vpack.c.b16 %v2044_v8, %v2043_v7  ;;  %v6144_v15 = vpack.c.b16 %v2141_v13, %v2140_v14  ;;  %v1910_v14 = vld [vmem:[%s7059_s10 + $0x8] sm:$0xff] }
 0x4e6   :  { %2173 = vrot.lane.b32.xlu0 %v6132_v9, %s5242_s5  ;;  %2177 = vrot.lane.b32.xlu2 %v6132_v9, %s5243_s26 }
 0x4ee   :  { %1924 = vperm.xlu0 %4885, %v1912_v10   ;;  %1921 = vperm.xlu2 %4884, %v1911_v12  }
 0x4f6   :  { %2266 = vrot.lane.b32.xlu2 %v6144_v15, %s5242_s5 }
 0x505   :  { %v2011_v16 = vpop.f32.mrf.mxu2  ;;  %v2030_v17 = vpop.f32.mrf.mxu3 }
 0x506   :  { %v2012_v20 = vadd.f32 %v2011_v16, %v1947_v59  ;;  %v2031_v21 = vadd.f32 %v2030_v17, %v1948_v61 }
 0x508   :  { %v2037_v23 = vpack.c.bf16 %v2031_v21, %v2012_v20 }
 0x50a   :  { %v2045_v28 = vunpack.c.l.b16 %v2037_v23  ;;  %v2142_v29 = vunpack.c.h.b16 %v2037_v23 }
 0x50d   :  { %v2013_v22 = vpop.f32.mrf.mxu2  ;;  %v2032_v2 = vpop.f32.mrf.mxu3 }
 0x50e   :  { %v2014_v25 = vadd.f32 %v2013_v22, %v1947_v59  ;;  %v2033_v26 = vadd.f32 %v2032_v2, %v1948_v61  ;;  %v1909_v59 = vld [vmem:[%s7059_s10] sm:$0xff] }
 0x510   :  { %v2038_v27 = vpack.c.bf16 %v2033_v26, %v2014_v25 }
 0x512   :  { %v2046_v30 = vunpack.c.l.b16 %v2038_v27  ;;  %v2143_v31 = vunpack.c.h.b16 %v2038_v27 }
 0x514   :  { %v6148_v40 = vpack.c.b16 %v2046_v30, %v2045_v28  ;;  %v6150_v32 = vpack.c.b16 %v2143_v31, %v2142_v29 }
 0x516   :  { %2160 = vmatpush.bf16.msrb.mxu3 %v6150_v32  ;;  %2179 = vrot.lane.b32.xlu1 %v6148_v40, %s5243_s26 }
 0x517   :  { %2051 = vrot.lane.b32.xlu0 %v6148_v40, %s5241_s9 }
 0x51a   :  { %2161 = vmatpush.bf16.msrb.mxu3 %v6144_v15 }
 0x51e   :  { %2175 = vrot.lane.b32.xlu1 %v6148_v40, %s5242_s5 }
 0x51f   :  { %2049 = vrot.lane.b32.xlu0 %v6132_v9, %s5241_s9 }
 0x540   :  { %v2178_v39 = vpop.permute.xlu2 %2177 }
 0x541   :  { %v2188_v42 = vsel %vm2053_vm1, %v2178_v39, 0 }
 0x548   :  { %v1922_v49 = vpop.permute.xlu2 %1921 }
 0x549   :  { %vm1929_vm2 = vcmp.eq.s32.totalorder %v1922_v49, %v6179_v48 }
 0x54a   :  { %v6183_v60 = vsel %vm1929_vm2, 0.0, %v5244_v24 }
 0x550   :  { %v2267_v61 = vpop.permute.xlu2 %2266 }
 0x558   :  { %v2174_v33 = vpop.permute.xlu0 %2173 }
 0x560   :  { %v1925_v34 = vpop.permute.xlu0 %1924 }
 0x561   :  { %vm1930_vm4 = vcmp.eq.s32.totalorder %v1925_v34, %v6179_v48 }
 0x562   :  { %v6189_v56 = vsel %vm1930_vm4, 0.0, %v5244_v24 }
 0x588   :  { %v2180_v35 = vpop.permute.xlu1 %2179 }
 0x589   :  { %v2191_v36 = vsel %vm2053_vm1, %v2180_v35, 0  ;;  %v2052_v37 = vpop.permute.xlu0 %2051 }
 0x58a   :  { %v2064_v38 = vsel %vm2053_vm1, %v2052_v37, 0  ;;  %2199 = vmatpush.bf16.xpose.msra.mxu0 %v2191_v36 }
 0x58b   :  { %2072 = vmatpush.bf16.xpose.msrb.mxu2 %v2064_v38 }
 0x590   :  { %v2176_v44 = vpop.permute.xlu1 %2175 }
 0x591   :  { %v2050_v41 = vpop.permute.xlu0 %2049 }
 0x592   :  { %v2061_v43 = vsel %vm2053_vm1, %v2050_v41, 0  ;;  %2200 = vmatpush.bf16.xpose.msra.mxu0 %v2188_v42 }
 0x593   :  { %2073 = vmatpush.bf16.xpose.msrb.mxu2 %v2061_v43 }
 0x599   :  { %4442 = vmatmul.msk.bf16.vlgmr.msra.gmra.mxu0 %vm2053_vm1, %v2174_v33 }
 0x59a   :  { %4438 = vmatmul.msk.bf16.vlgmr.msrb.gmra.mxu2 %vm2053_vm1, %v6132_v9 }
 0x5a9   :  { %4443 = vmatmul.msk.bf16.gmra.mxu0 %vm2053_vm1, %v2176_v44 }
 0x5aa   :  { %4439 = vmatmul.msk.bf16.gmra.mxu2 %vm2053_vm1, %v6148_v40 }
 0x616   :  { %v6172_v46 = vpop.f32.mrf.mxu0 }
 0x61d   :  { %v2075_v17 = vpop.f32.mrf.mxu2 }
 0x61e   :  { %v6174_v47 = vpop.f32.mrf.mxu0  ;;  %v2085_v27 = vmul.f32 0.25, %v2075_v17 }
 0x625   :  { %v2077_v21 = vpop.f32.mrf.mxu2 }
 0x626   :  { %v2207_v50 = vpop.f32.mrf.mxu0 }
 0x627   :  { %v2214_v11 = vmul.f32 0.25, %v2207_v50 }
 0x629   :  { %v2218_v51 = vadd.f32 %v2214_v11, %v6183_v60 }
 0x62b   :  { %v2226_v52 = vsel %vm2093_vm3, %v2218_v51, -inf }
 0x62c   :  { %2227 = vmax.xlane.f32.xlu1 %v2226_v52 }
 0x62d   :  { %v2080_v2 = vpop.f32.mrf.mxu2 }
 0x62e   :  { %v2209_v53 = vpop.f32.mrf.mxu0  ;;  %v2087_v25 = vmul.f32 0.25, %v2080_v2 }
 0x62f   :  { %v2215_v45 = vmul.f32 0.25, %v2209_v53  ;;  %v2213_v53 = vmul.f32 0.25, %v6174_v47  ;;  %v2212_v47 = vmul.f32 0.25, %v6172_v46 }
 0x630   :  { %v6225_v26 = vadd.f32 %v2087_v25, %v6183_v60 }
 0x631   :  { %v2219_v57 = vadd.f32 %v2215_v45, %v6189_v56  ;;  %v2086_v45 = vmul.f32 0.25, %v2077_v21 }
 0x632   :  { %v2100_v30 = vsel %vm2093_vm3, %v6225_v26, -inf }
 0x633   :  { %v2229_v58 = vsel %vm2093_vm3, %v2219_v57, -inf }
 0x634   :  { %2230 = vmax.xlane.f32.xlu2 %v2229_v58 }
 0x635   :  { %v2082_v29 = vpop.f32.mrf.mxu2 }
 0x636   :  { %v2088_v31 = vmul.f32 0.25, %v2082_v29 }
 0x638   :  { %v6232_v33 = vadd.f32 %v2088_v31, %v6189_v56 }
 0x63a   :  { %v2103_v34 = vsel %vm2093_vm3, %v6232_v33, -inf }
 0x645   :  { %2268 = vrot.lane.b32.xlu1 %v6150_v32, %s5242_s5 }
 0x64c   :  { %2427 = vrot.lane.b32.xlu2 %v6148_v40, %s5245_s7 }
 0x64d   :  { %2301 = vrot.lane.b32.xlu1 %v6132_v9, %s5246_s30 }
 0x655   :  { %2297 = vrot.lane.b32.xlu1 %v6132_v9, %s5247_s28 }
 0x65d   :  { %2421 = vrot.lane.b32.xlu1 %v6132_v9, %s5248_s8 }
 0x665   :  { %1915 = vperm.xlu1 %4883, %v1909_v59  }
 0x69f   :  { %v2228_v62 = vpop.xlane.xlu1 %2227 }
 0x6a0   :  { %v2234_v63 = vsub.f32 %v2218_v51, %v2228_v62 }
 0x6a2   :  { %v2240_v0 = vmul.f32 1.442695, %v2234_v63 }
 0x6a4   :  { %5025 = vpow2.f32 %v2240_v0 }
 0x6a7   :  { %v2231_v1 = vpop.xlane.xlu2 %2230 }
 0x6a8   :  { %v2235_v3 = vsub.f32 %v2219_v57, %v2231_v1 }
 0x6aa   :  { %v5026_v4 = vpop.eup %5025  ;;  %v2242_v5 = vmul.f32 1.442695, %v2235_v3 }
 0x6ab   :  { %v2250_v6 = vsel %vm2093_vm3, %v5026_v4, 0.0 }
 0x6ac   :  { %5027 = vpow2.f32 %v2242_v5  ;;  %2251 = vadd.xlane.f32.xlu0 %v2250_v6 }
 0x6af   :  { %v2428_v7 = vpop.permute.xlu2 %2427 }
 0x6b0   :  { %v2439_v8 = vsel %vm2053_vm1, %v2428_v7, 0 }
 0x6b1   :  { %2447 = vmatpush.bf16.xpose.msrb.mxu0 %v2439_v8 }
 0x6b2   :  { %v5028_v10 = vpop.eup %5027 }
 0x6b3   :  { %v2253_v12 = vsel %vm2093_vm3, %v5028_v10, 0.0 }
 0x6b4   :  { %2254 = vadd.xlane.f32.xlu2 %v2253_v12 }
 0x6b7   :  { %v2269_v13 = vpop.permute.xlu1 %2268 }
 0x6b8   :  { %2284 = vmatpush.bf16.msra.mxu1 %v2269_v13  ;;  %4787 = vmatpush.bf16.msra.mxu2 %v2269_v13 }
 0x6bc   :  { %2285 = vmatpush.bf16.msra.mxu1 %v2267_v61  ;;  %4788 = vmatpush.bf16.msra.mxu2 %v2267_v61 }
 0x6bf   :  { %v2302_v16 = vpop.permute.xlu1 %2301 }
 0x6c0   :  { %2303 = vrot.lane.b32.xlu0 %v6148_v40, %s5246_s30  ;;  %v2312_v51 = vsel %vm2053_vm1, %v2302_v16, 0 }
 0x6c7   :  { %v2298_v20 = vpop.permute.xlu1 %2297 }
 0x6c8   :  { %2299 = vrot.lane.b32.xlu0 %v6148_v40, %s5247_s28 }
 0x6cc   :  { %2425 = vrot.lane.b32.xlu2 %v6132_v9, %s5245_s7 }
 0x6cf   :  { %v2422_v22 = vpop.permute.xlu1 %2421 }
 0x6d0   :  { %1918 = vperm.xlu0 %4885, %v1910_v14  }
 0x6d4   :  { %2423 = vrot.lane.b32.xlu2 %v6148_v40, %s5248_s8 }
 0x6d7   :  { %v1916_v23 = vpop.permute.xlu1 %1915 }
 0x6d8   :  { %vm1927_vm5 = vcmp.eq.s32.totalorder %v1916_v23, %v6179_v48 }
 0x6d9   :  { %v6222_v9 = vsel %vm1927_vm5, 0.0, %v5244_v24 }
 0x6da   :  { %v2089_v28 = vadd.f32 %v2085_v27, %v6222_v9 }
 0x6dc   :  { %v2094_v40 = vsel %vm2093_vm3, %v2089_v28, -inf }
 0x6fa   :  { %2101 = vmax.xlane.f32.xlu0 %v2100_v30 }
 0x6fd   :  { %2095 = vmax.xlane.f32.xlu2 %v2094_v40 }
 0x705   :  { %2104 = vmax.xlane.f32.xlu2 %v2103_v34 }
 0x71f   :  { %v2252_v35 = vpop.xlane.xlu0 %2251 }
 0x720   :  { %5029 = vrcp.f32 %v2252_v35 }
 0x726   :  { %v5030_v37 = vpop.eup %5029 }
 0x727   :  { %v2255_v36 = vpop.xlane.xlu2 %2254  ;;  %v2262_v39 = vmul.f32 %v5030_v37, %v5026_v4 }
 0x728   :  { %5031 = vrcp.f32 %v2255_v36 }
 0x72e   :  { %v5032_v38 = vpop.eup %5031 }
 0x72f   :  { %v2263_v41 = vmul.f32 %v5032_v38, %v5028_v10  ;;  %v2426_v42 = vpop.permute.xlu2 %2425 }
 0x730   :  { %v2436_v43 = vsel %vm2053_vm1, %v2426_v42, 0 }
 0x731   :  { %v2265_v44 = vpack.c.bf16 %v2263_v41, %v2262_v39  ;;  %2448 = vmatpush.bf16.xpose.msrb.mxu0 %v2436_v43 }
 0x732   :  { %v2304_v49 = vpop.permute.xlu0 %2303 }
 0x733   :  { %v2315_v50 = vsel %vm2053_vm1, %v2304_v49, 0  ;;  %4445 = vmatmul.msk.bf16.vlgmr.msra.gmra.mxu2 %vm2093_vm3, %v2265_v44 }
 0x734   :  { %2323 = vmatpush.bf16.xpose.msrb.mxu2 %v2315_v50 }
 0x737   :  { %v2424_v63 = vpop.permute.xlu2 %2423 }
 0x738   :  { %4450 = vmatmul.msk.bf16.vlgmr.msrb.gmra.mxu0 %vm2053_vm1, %v2422_v22 }
 0x73a   :  { %v2300_v11 = vpop.permute.xlu0 %2299 }
 0x73c   :  { %2324 = vmatpush.bf16.xpose.msrb.mxu2 %v2312_v51 }
 0x742   :  { %v1919_v52 = vpop.permute.xlu0 %1918 }
 0x743   :  { %vm1928_vm6 = vcmp.eq.s32.totalorder %v1919_v52, %v6179_v48  ;;  %4446 = vmatmul.msk.bf16.vlgmr.msrb.gmra.mxu2 %vm2053_vm1, %v2298_v20  ;;  %v2216_v48 = vadd.f32 %v2212_v47, %v6222_v9 }
 0x744   :  { %v6245_v57 = vsel %vm1928_vm6, 0.0, %v5244_v24 }
 0x745   :  { %v2090_v58 = vadd.f32 %v2086_v45, %v6245_v57  ;;  %v2217_v59 = vadd.f32 %v2213_v53, %v6245_v57  ;;  %v2220_v24 = vsel %vm2093_vm3, %v2216_v48, -inf }
 0x747   :  { %v2097_v61 = vsel %vm2093_vm3, %v2090_v58, -inf  ;;  %v2223_v62 = vsel %vm2093_vm3, %v2217_v59, -inf }
 0x748   :  { %2098 = vmax.xlane.f32.xlu1 %v2097_v61  ;;  %2224 = vmax.xlane.f32.xlu0 %v2223_v62 }
 0x749   :  { %4451 = vmatmul.msk.bf16.gmra.mxu0 %vm2053_vm1, %v2424_v63 }
 0x750   :  { %2221 = vmax.xlane.f32.xlu1 %v2220_v24 }
 0x753   :  { %4447 = vmatmul.msk.bf16.gmra.mxu2 %vm2053_vm1, %v2300_v11 }
 0x76d   :  { %v2102_v7 = vpop.xlane.xlu0 %2101 }
 0x76e   :  { %v2108_v14 = vsub.f32 %v6225_v26, %v2102_v7 }
 0x770   :  { %v2096_v0 = vpop.xlane.xlu2 %2095  ;;  %v2114_v23 = vmul.f32 1.442695, %v2108_v14 }
 0x771   :  { %v2106_v6 = vsub.f32 %v2089_v28, %v2096_v0 }
 0x773   :  { %v2110_v12 = vmul.f32 1.442695, %v2106_v6 }
 0x778   :  { %v2105_v21 = vpop.xlane.xlu2 %2104 }
 0x779   :  { %v2109_v25 = vsub.f32 %v6232_v33, %v2105_v21 }
 0x77b   :  { %v2116_v29 = vmul.f32 1.442695, %v2109_v25 }
 0x7b5   :  { %v2450_v1 = vpop.f32.mrf.mxu0 }
 0x7b6   :  { %v2460_v3 = vmul.f32 0.25, %v2450_v1  ;;  %v6256_v4 = vpop.f32.mrf.mxu2 }
 0x7b8   :  { %v6259_v5 = vadd.f32 %v2460_v3, %v6222_v9 }
 0x7ba   :  { %v2468_v46 = vsel %vm2093_vm3, %v6259_v5, -inf }
 0x7bb   :  { %v2099_v8 = vpop.xlane.xlu1 %2098  ;;  %2469 = vmax.xlane.f32.xlu0 %v2468_v46  ;;  %v2225_v26 = vpop.xlane.xlu0 %2224 }
 0x7bc   :  { %v2107_v10 = vsub.f32 %v2090_v58, %v2099_v8  ;;  %v2233_v30 = vsub.f32 %v2217_v59, %v2225_v26 }
 0x7bd   :  { %v2452_v13 = vpop.f32.mrf.mxu0 }
 0x7be   :  { %v2112_v16 = vmul.f32 1.442695, %v2107_v10  ;;  %v2461_v17 = vmul.f32 0.25, %v2452_v13  ;;  %v6264_v20 = vpop.f32.mrf.mxu2  ;;  %v2238_v38 = vmul.f32 1.442695, %v2233_v30 }
 0x7bf   :  { %v4961_v22 = vpack.i.bf16 %v6264_v20, %v6256_v4 }
 0x7c0   :  { %5033 = vpow2.f32 %v2112_v16  ;;  %v6269_v2 = vadd.f32 %v2461_v17, %v6245_v57 }
 0x7c1   :  { %5035 = vpow2.f32 %v2110_v12 }
 0x7c2   :  { %v2471_v27 = vsel %vm2093_vm3, %v6269_v2, -inf  ;;  %5037 = vpow2.f32 %v2114_v23 }
 0x7c3   :  { %2472 = vmax.xlane.f32.xlu2 %v2471_v27  ;;  %v2222_v34 = vpop.xlane.xlu1 %2221  ;;  %5039 = vpow2.f32 %v2116_v29 }
 0x7c4   :  { %v2232_v39 = vsub.f32 %v2216_v48, %v2222_v34  ;;  %5041 = vpow2.f32 %v2238_v38 }
 0x7c6   :  { %v6274_v28 = vpop.eup %5033  ;;  %v2455_v31 = vpop.f32.mrf.mxu0  ;;  %v2236_v44 = vmul.f32 1.442695, %v2232_v39 }
 0x7c7   :  { %v6276_v40 = vpop.eup %5035  ;;  %v2462_v35 = vmul.f32 0.25, %v2455_v31  ;;  %v2121_v36 = vsel %vm2093_vm3, %v6274_v28, 0.0  ;;  %v2326_v37 = vpop.f32.mrf.mxu2 }
 0x7c8   :  { %2122 = vadd.xlane.f32.xlu1 %v2121_v36  ;;  %v2118_v41 = vsel %vm2093_vm3, %v6276_v40, 0.0  ;;  %v6287_v43 = vpop.eup %5037  ;;  %5043 = vpow2.f32 %v2236_v44  ;;  %v2336_v47 = vmul.f32 0.25, %v2326_v37 }
 0x7c9   :  { %v6281_v33 = vadd.f32 %v2462_v35, %v6183_v60  ;;  %v2124_v11 = vsel %vm2093_vm3, %v6287_v43, 0.0  ;;  %v6291_v51 = vpop.eup %5039 }
 0x7ca   :  { %v2127_v58 = vsel %vm2093_vm3, %v6291_v51, 0.0  ;;  %v6300_v59 = vpop.eup %5041  ;;  %v2340_v6 = vadd.f32 %v2336_v47, %v6222_v9 }
 0x7cb   :  { %v2474_v42 = vsel %vm2093_vm3, %v6281_v33, -inf  ;;  %2119 = vadd.xlane.f32.xlu2 %v2118_v41  ;;  %v2247_v62 = vsel %vm2093_vm3, %v6300_v59, 0.0 }
 0x7cc   :  { %2475 = vmax.xlane.f32.xlu0 %v2474_v42  ;;  %v2344_v46 = vsel %vm2093_vm3, %v2340_v6, -inf }
 0x7ce   :  { %v2457_v49 = vpop.f32.mrf.mxu0  ;;  %v6304_v63 = vpop.eup %5043 }
 0x7cf   :  { %v2463_v50 = vmul.f32 0.25, %v2457_v49  ;;  %v2328_v53 = vpop.f32.mrf.mxu2  ;;  %v2244_v48 = vsel %vm2093_vm3, %v6304_v63, 0.0 }
 0x7d0   :  { %2125 = vadd.xlane.f32.xlu1 %v2124_v11  ;;  %v2337_v61 = vmul.f32 0.25, %v2328_v53 }
 0x7d1   :  { %v6294_v52 = vadd.f32 %v2463_v50, %v6189_v56 }
 0x7d2   :  { %v6309_v24 = vadd.f32 %v2337_v61, %v6245_v57 }
 0x7d3   :  { %v2477_v45 = vsel %vm2093_vm3, %v6294_v52, -inf }
 0x7d4   :  { %2478 = vmax.xlane.f32.xlu2 %v2477_v45  ;;  %2128 = vadd.xlane.f32.xlu0 %v2127_v58  ;;  %v2347_v3 = vsel %vm2093_vm3, %v6309_v24, -inf }
 0x7d7   :  { %v2331_v0 = vpop.f32.mrf.mxu2 }
 0x7d8   :  { %2248 = vadd.xlane.f32.xlu1 %v2247_v62  ;;  %v2338_v1 = vmul.f32 0.25, %v2331_v0 }
 0x7da   :  { %v6316_v7 = vadd.f32 %v2338_v1, %v6183_v60 }
 0x7dc   :  { %2245 = vadd.xlane.f32.xlu2 %v2244_v48  ;;  %v2350_v8 = vsel %vm2093_vm3, %v6316_v7, -inf }
 0x7df   :  { %v2333_v16 = vpop.f32.mrf.mxu2 }
 0x7e0   :  { %2348 = vmax.xlane.f32.xlu1 %v2347_v3  ;;  %v2339_v25 = vmul.f32 0.25, %v2333_v16 }
 0x7e4   :  { %2345 = vmax.xlane.f32.xlu2 %v2344_v46 }
 0x7e8   :  { %2351 = vmax.xlane.f32.xlu1 %v2350_v8 }
 0x801   :  { %2392 = vrot.lane.b32.xlu1 %v6150_v32, %s5247_s28 }
 0x82e   :  { %v2470_v10 = vpop.xlane.xlu0 %2469 }
 0x82f   :  { %v2480_v12 = vsub.f32 %v6259_v5, %v2470_v10  ;;  %v6329_v5 = vadd.f32 %v2339_v25, %v6189_v56 }
 0x831   :  { %v2484_v13 = vmul.f32 1.442695, %v2480_v12 }
 0x833   :  { %5045 = vpow2.f32 %v2484_v13 }
 0x836   :  { %v2473_v14 = vpop.xlane.xlu2 %2472 }
 0x837   :  { %v2481_v17 = vsub.f32 %v6269_v2, %v2473_v14  ;;  %v2353_v2 = vsel %vm2093_vm3, %v6329_v5, -inf }
 0x839   :  { %v6324_v21 = vpop.eup %5045  ;;  %v2486_v23 = vmul.f32 1.442695, %v2481_v17 }
 0x83a   :  { %v2492_v27 = vsel %vm2093_vm3, %v6324_v21, 0.0 }
 0x83b   :  { %5047 = vpow2.f32 %v2486_v23  ;;  %v2123_v26 = vpop.xlane.xlu1 %2122  ;;  %2493 = vadd.xlane.f32.xlu0 %v2492_v27 }
 0x83c   :  { %5049 = vrcp.f32 %v2123_v26 }
 0x83e   :  { %v2120_v29 = vpop.xlane.xlu2 %2119 }
 0x83f   :  { %v6331_v30 = vpop.xlane.xlu0 %2475  ;;  %5051 = vrcp.f32 %v2120_v29 }
 0x840   :  { %v2482_v27 = vsub.f32 %v6281_v33, %v6331_v30 }
 0x841   :  { %v6333_v31 = vpop.eup %5047 }
 0x842   :  { %v2495_v34 = vsel %vm2093_vm3, %v6333_v31, 0.0  ;;  %v5050_v35 = vpop.eup %5049 }
 0x843   :  { %v2126_v36 = vpop.xlane.xlu1 %2125  ;;  %2354 = vmax.xlane.f32.xlu0 %v2353_v2  ;;  %2496 = vadd.xlane.f32.xlu2 %v2495_v34  ;;  %v2135_v38 = vmul.f32 %v5050_v35, %v6274_v28 }
 0x845   :  { %v5052_v37 = vpop.eup %5051 }
 0x846   :  { %v2134_v39 = vmul.f32 %v5052_v37, %v6276_v40 }
 0x847   :  { %v2479_v41 = vpop.xlane.xlu2 %2478  ;;  %v2129_v44 = vpop.xlane.xlu0 %2128 }
 0x848   :  { %v2138_v42 = vpack.c.bf16 %v2135_v38, %v2134_v39  ;;  %5053 = vrcp.f32 %v2129_v44 }
 0x849   :  { %5055 = vrcp.f32 %v2126_v36 }
 0x84a   :  { %4440 = vmatmul.msk.bf16.vlgmr.msrb.gmra.mxu3 %vm2093_vm3, %v2138_v42 }
 0x84b   :  { %v2249_v49 = vpop.xlane.xlu1 %2248 }
 0x84c   :  { %5057 = vrcp.f32 %v2249_v49 }
 0x84e   :  { %v5054_v11 = vpop.eup %5053 }
 0x84f   :  { %v2246_v50 = vpop.xlane.xlu2 %2245  ;;  %v5056_v53 = vpop.eup %5055  ;;  %v2137_v61 = vmul.f32 %v5054_v11, %v6291_v51  ;;  %v2483_v51 = vsub.f32 %v6294_v52, %v2479_v41 }
 0x850   :  { %5059 = vrcp.f32 %v2246_v50  ;;  %v2136_v40 = vmul.f32 %v5056_v53, %v6287_v43 }
 0x852   :  { %v5058_v58 = vpop.eup %5057  ;;  %v2139_v1 = vpack.c.bf16 %v2137_v61, %v2136_v40 }
 0x853   :  { %v2349_v45 = vpop.xlane.xlu1 %2348  ;;  %v2261_v62 = vmul.f32 %v5058_v58, %v6300_v59 }
 0x854   :  { %v2357_v52 = vsub.f32 %v6309_v24, %v2349_v45  ;;  %v2488_v24 = vmul.f32 1.442695, %v2482_v27 }
 0x856   :  { %v5060_v28 = vpop.eup %5059  ;;  %v2362_v16 = vmul.f32 1.442695, %v2357_v52 }
 0x857   :  { %v2260_v47 = vmul.f32 %v5060_v28, %v6304_v63  ;;  %v2346_v48 = vpop.xlane.xlu2 %2345 }
 0x858   :  { %v2356_v0 = vsub.f32 %v2340_v6, %v2346_v48  ;;  %v2490_v6 = vmul.f32 1.442695, %v2483_v51 }
 0x859   :  { %v2264_v3 = vpack.c.bf16 %v2261_v62, %v2260_v47 }
 0x85a   :  { %v2360_v46 = vmul.f32 1.442695, %v2356_v0  ;;  %4441 = vmatmul.msk.bf16.gmra.mxu3 %vm2093_vm3, %v2139_v1 }
 0x85b   :  { %4444 = vmatmul.msk.bf16.vlgmr.msra.gmra.mxu1 %vm2093_vm3, %v2264_v3  ;;  %v2352_v8 = vpop.xlane.xlu1 %2351  ;;  %2516 = vrot.lane.b32.xlu2 %v6150_v32, %s5248_s8 }
 0x85c   :  { %5061 = vpow2.f32 %v2360_v46  ;;  %v2358_v43 = vsub.f32 %v6316_v7, %v2352_v8 }
 0x85e   :  { %v2364_v59 = vmul.f32 1.442695, %v2358_v43 }
 0x860   :  { %5063 = vpow2.f32 %v2364_v59 }
 0x861   :  { %5065 = vpow2.f32 %v2490_v6 }
 0x862   :  { %v5062_v63 = vpop.eup %5061  ;;  %5067 = vpow2.f32 %v2362_v16 }
 0x863   :  { %v2368_v10 = vsel %vm2093_vm3, %v5062_v63, 0.0 }
 0x864   :  { %2369 = vadd.xlane.f32.xlu0 %v2368_v10 }
 0x866   :  { %v6353_v12 = vpop.eup %5063 }
 0x867   :  { %v2374_v13 = vsel %vm2093_vm3, %v6353_v12, 0.0  ;;  %v6357_v32 = vpop.eup %5065 }
 0x868   :  { %2375 = vadd.xlane.f32.xlu1 %v2374_v13  ;;  %v2501_v7 = vsel %vm2093_vm3, %v6357_v32, 0.0  ;;  %v5068_v17 = vpop.eup %5067 }
 0x869   :  { %v2371_v23 = vsel %vm2093_vm3, %v5068_v17, 0.0 }
 0x870   :  { %2502 = vadd.xlane.f32.xlu1 %v2501_v7 }
 0x873   :  { %v2393_v14 = vpop.permute.xlu1 %2392 }
 0x874   :  { %2408 = vmatpush.bf16.msra.mxu3 %v2393_v14 }
 0x878   :  { %2390 = vrot.lane.b32.xlu0 %v6144_v15, %s5247_s28 }
 0x884   :  { %2372 = vadd.xlane.f32.xlu2 %v2371_v23  ;;  %v4750_v23 = vld [vmem:[%s7025_s14 + $0x18] sm:$0xff] }
 0x885   :  { %2654 = vmatpush.bf16.msra.mxu2 %v4750_v23  ;;  %v5249_v23 = vmov 64.0  }
 0x89c   :  { %2514 = vrot.lane.b32.xlu2 %v6144_v15, %s5248_s8 }
 0x8ae   :  { %v2494_v25 = vpop.xlane.xlu0 %2493 }
 0x8af   :  { %5069 = vrcp.f32 %v2494_v25  ;;  %v4749_v25 = vld [vmem:[%s7025_s14 + $0x10] sm:$0xff] }
 0x8b0   :  { %2655 = vmatpush.bf16.msra.mxu2 %v4749_v25 }
 0x8b5   :  { %v5070_v35 = vpop.eup %5069 }
 0x8b6   :  { %v2355_v26 = vpop.xlane.xlu0 %2354  ;;  %v2497_v29 = vpop.xlane.xlu2 %2496  ;;  %v2508_v37 = vmul.f32 %v5070_v35, %v6324_v21 }
 0x8b7   :  { %v2359_v2 = vsub.f32 %v6329_v5, %v2355_v26  ;;  %5071 = vrcp.f32 %v2497_v29  ;;  %v4748_v26 = vld [vmem:[%s7025_s14 + $0x8] sm:$0xff] }
 0x8b8   :  { %5073 = vpow2.f32 %v2488_v24  ;;  %2656 = vmatpush.bf16.msra.mxu2 %v4748_v26 }
 0x8b9   :  { %v2366_v34 = vmul.f32 1.442695, %v2359_v2 }
 0x8bb   :  { %5075 = vpow2.f32 %v2366_v34  ;;  %v4747_v34 = vld [vmem:[%s7025_s14] sm:$0xff] }
 0x8bc   :  { %2657 = vmatpush.bf16.msra.mxu2 %v4747_v34 }
 0x8bd   :  { %v5072_v36 = vpop.eup %5071 }
 0x8be   :  { %v2509_v15 = vmul.f32 %v5072_v36, %v6333_v31  ;;  %v2517_v38 = vpop.permute.xlu2 %2516  ;;  %v5074_v39 = vpop.eup %5073 }
 0x8bf   :  { %2532 = vmatpush.bf16.msrb.mxu1 %v2517_v38  ;;  %v2498_v5 = vsel %vm2093_vm3, %v5074_v39, 0.0 }
 0x8c0   :  { %v2512_v33 = vpack.c.bf16 %v2509_v15, %v2508_v37 }
 0x8c1   :  { %v5076_v30 = vpop.eup %5075 }
 0x8c2   :  { %v2377_v41 = vsel %vm2093_vm3, %v5076_v30, 0.0 }
 0x8c3   :  { %2378 = vadd.xlane.f32.xlu0 %v2377_v41 }
 0x8c5   :  { %2499 = vadd.xlane.f32.xlu2 %v2498_v5 }
 0x8cd   :  { %v2163_v59 = vpop.f32.mrf.mxu3 }
 0x8d7   :  { %v2370_v50 = vpop.xlane.xlu0 %2369 }
 0x8d8   :  { %v2287_v42 = vpop.f32.mrf.mxu1  ;;  %5077 = vrcp.f32 %v2370_v50 }
 0x8db   :  { %v2376_v40 = vpop.xlane.xlu1 %2375 }
 0x8de   :  { %v5078_v11 = vpop.eup %5077 }
 0x8df   :  { %v2384_v45 = vmul.f32 %v5078_v11, %v5062_v63  ;;  %v2165_v63 = vpop.f32.mrf.mxu3 }
 0x8e0   :  { %v2289_v44 = vpop.f32.mrf.mxu1 }
 0x8e1   :  { %v4946_v49 = vpack.i.bf16 %v2289_v44, %v2287_v42 }
 0x8e3   :  { %4947 = vrot.lane.b32.xlu0 %v4946_v49, %s5245_s7  ;;  %v2503_v62 = vpop.xlane.xlu1 %2502 }
 0x8e7   :  { %v2168_v6 = vpop.f32.mrf.mxu3 }
 0x8ea   :  { %v2391_v21 = vpop.permute.xlu0 %2390 }
 0x8eb   :  { %4962 = vrot.lane.b32.xlu0 %v4961_v22, %s5245_s7  ;;  %2409 = vmatpush.bf16.msra.mxu3 %v2391_v21 }
 0x8ef   :  { %v2170_v10 = vpop.f32.mrf.mxu3 }
 0x8f7   :  { %v2373_v31 = vpop.xlane.xlu2 %2372 }
 0x8f8   :  { %5079 = vrcp.f32 %v2373_v31 }
 0x8f9   :  { %5081 = vrcp.f32 %v2376_v40 }
 0x8fa   :  { %5083 = vrcp.f32 %v2503_v62 }
 0x8fe   :  { %v5080_v53 = vpop.eup %5079 }
 0x8ff   :  { %v2385_v58 = vmul.f32 %v5080_v53, %v5068_v17  ;;  %v2515_v61 = vpop.permute.xlu2 %2514  ;;  %v5082_v22 = vpop.eup %5081 }
 0x900   :  { %2533 = vmatpush.bf16.msrb.mxu1 %v2515_v61  ;;  %v5084_v47 = vpop.eup %5083  ;;  %v2386_v0 = vmul.f32 %v5082_v22, %v6353_v12 }
 0x901   :  { %v2388_v28 = vpack.c.bf16 %v2385_v58, %v2384_v45  ;;  %v2511_v46 = vmul.f32 %v5084_v47, %v6357_v32 }
 0x903   :  { %4448 = vmatmul.msk.bf16.vlgmr.msra.gmra.mxu3 %vm2093_vm3, %v2388_v28  ;;  %4452 = vmatmul.msk.bf16.vlgmr.msrb.gmra.mxu1 %vm2093_vm3, %v2512_v33 }
 0x936   :  { %v2379_v4 = vpop.xlane.xlu0 %2378 }
 0x937   :  { %5085 = vrcp.f32 %v2379_v4 }
 0x938   :  { %v2500_v20 = vpop.xlane.xlu2 %2499 }
 0x939   :  { %5087 = vrcp.f32 %v2500_v20 }
 0x93a   :  { %5089 = vrcp.f32 %v5249_v23 }
 0x93d   :  { %v5086_v48 = vpop.eup %5085 }
 0x93e   :  { %v2387_v1 = vmul.f32 %v5086_v48, %v5076_v30 }
 0x93f   :  { %v5088_v3 = vpop.eup %5087 }
 0x940   :  { %v2510_v8 = vmul.f32 %v5088_v3, %v5074_v39  ;;  %v2389_v43 = vpack.c.bf16 %v2387_v1, %v2386_v0 }
 0x942   :  { %4449 = vmatmul.msk.bf16.gmra.mxu3 %vm2093_vm3, %v2389_v43  ;;  %v2513_v51 = vpack.c.bf16 %v2511_v46, %v2510_v8  ;;  %v5011_v46 = vld [vmem:[%s7026_s15] ss:$0 sm:$0xff] }
 0x944   :  { %4453 = vmatmul.msk.bf16.gmra.mxu1 %vm2093_vm3, %v2513_v51 }
 0x955   :  { %v4948_v35 = vpop.permute.xlu0 %4947 }
 0x956   :  { %v4950_v36 = vunpack.i.h.bf16 %v4948_v35  ;;  %v4949_v37 = vunpack.i.l.bf16 %v4948_v35 }
 0x958   :  { %v2594_v30 = vsel %vm2053_vm1, %v2165_v63, %v4950_v36  ;;  %v2593_v41 = vsel %vm2053_vm1, %v2163_v59, %v4949_v37 }
 0x95d   :  { %v4963_v11 = vpop.permute.xlu0 %4962 }
 0x95e   :  { %v4965_v53 = vunpack.i.h.bf16 %v4963_v11  ;;  %v4964_v45 = vunpack.i.l.bf16 %v4963_v11  ;;  %v4754_v11 = vld [vmem:[%s7027_s16 + $0x18] sm:$0xff] }
 0x95f   :  { %2832 = vmatpush.bf16.msrb.mxu3 %v4754_v11 }
 0x960   :  { %v2596_v62 = vsel %vm2053_vm1, %v2170_v10, %v4965_v53  ;;  %v2595_v4 = vsel %vm2053_vm1, %v2168_v6, %v4964_v45  ;;  %v4753_v53 = vld [vmem:[%s7027_s16 + $0x10] sm:$0xff]  ;;  %v4752_v45 = vld [vmem:[%s7027_s16 + $0x8] sm:$0xff] }
 0x963   :  { %2833 = vmatpush.bf16.msrb.mxu3 %v4753_v53 }
 0x967   :  { %2834 = vmatpush.bf16.msrb.mxu3 %v4752_v45 }
 0x980   :  { %v2535_v13 = vpop.f32.mrf.mxu1 }
 0x986   :  { %v2411_v7 = vpop.f32.mrf.mxu3 }
 0x988   :  { %v2537_v52 = vpop.f32.mrf.mxu1 }
 0x989   :  { %v4956_v14 = vpack.i.bf16 %v2537_v52, %v2535_v13 }
 0x98b   :  { %4957 = vrot.lane.b32.xlu2 %v4956_v14, %s5243_s26 }
 0x98e   :  { %v2413_v12 = vpop.f32.mrf.mxu3 }
 0x98f   :  { %v4951_v16 = vpack.i.bf16 %v2413_v12, %v2411_v7 }
 0x991   :  { %4952 = vrot.lane.b32.xlu1 %v4951_v16, %s5246_s30 }
 0x9c1   :  { %v2540_v32 = vpop.f32.mrf.mxu1 }
 0x9c5   :  { %v2416_v17 = vpop.f32.mrf.mxu3 }
 0x9c9   :  { %v2542_v27 = vpop.f32.mrf.mxu1 }
 0x9ca   :  { %v4971_v24 = vpack.i.bf16 %v2542_v27, %v2540_v32 }
 0x9cc   :  { %4972 = vrot.lane.b32.xlu0 %v4971_v24, %s5243_s26 }
 0x9cd   :  { %v2418_v29 = vpop.f32.mrf.mxu3 }
 0x9ce   :  { %v4966_v2 = vpack.i.bf16 %v2418_v29, %v2416_v17 }
 0x9d0   :  { %4967 = vrot.lane.b32.xlu1 %v4966_v2, %s5246_s30 }
 0x9e5   :  { %v4958_v15 = vpop.permute.xlu2 %4957 }
 0x9e6   :  { %v4960_v5 = vunpack.i.h.bf16 %v4958_v15  ;;  %v4959_v42 = vunpack.i.l.bf16 %v4958_v15 }
 0xa03   :  { %v4953_v38 = vpop.permute.xlu1 %4952 }
 0xa04   :  { %v4955_v39 = vunpack.i.h.bf16 %v4953_v38  ;;  %v4954_v33 = vunpack.i.l.bf16 %v4953_v38 }
 0xa06   :  { %v2598_v44 = vsel %vm2093_vm3, %v2594_v30, %v4955_v39  ;;  %v2597_v49 = vsel %vm2093_vm3, %v2593_v41, %v4954_v33 }
 0xa07   :  { %v2602_v50 = vsel %vm2601_vm7, %v2597_v49, %v4959_v42  ;;  %v2603_v21 = vsel %vm2601_vm7, %v2598_v44, %v4960_v5 }
 0xa08   :  { %v2606_v31 = vpack.c.bf16 %v2603_v21, %v2602_v50 }
 0xa0a   :  { %4470 = vmatmul.msk.bf16.vlgmr.msra.gmra.mxu2 %vm96_vm12, %v2606_v31 }
 0xa3e   :  { %v4973_v58 = vpop.permute.xlu0 %4972 }
 0xa3f   :  { %v4975_v20 = vunpack.i.h.bf16 %v4973_v58  ;;  %v4974_v22 = vunpack.i.l.bf16 %v4973_v58 }
 0xa42   :  { %v4968_v61 = vpop.permute.xlu1 %4967 }
 0xa43   :  { %v4970_v28 = vunpack.i.h.bf16 %v4968_v61  ;;  %v4969_v40 = vunpack.i.l.bf16 %v4968_v61 }
 0xa45   :  { %v2600_v47 = vsel %vm2093_vm3, %v2596_v62, %v4970_v28  ;;  %v2599_v48 = vsel %vm2093_vm3, %v2595_v4, %v4969_v40  ;;  %v4751_v40 = vld [vmem:[%s7027_s16] sm:$0xff] }
 0xa46   :  { %v2604_v0 = vsel %vm2601_vm7, %v2599_v48, %v4974_v22  ;;  %v2605_v1 = vsel %vm2601_vm7, %v2600_v47, %v4975_v20  ;;  %2835 = vmatpush.bf16.msrb.mxu3 %v4751_v40 }
 0xa47   :  { %v2607_v3 = vpack.c.bf16 %v2605_v1, %v2604_v0 }
 0xa49   :  { %4471 = vmatmul.msk.bf16.gmra.mxu2 %vm96_vm12, %v2607_v3 }
 0xa8d   :  { %v2659_v8 = vpop.f32.mrf.mxu2 }
 0xa8e   :  { %v2660_v43 = vadd.f32 %v5011_v46, %v2659_v8 }
 0xa90   :  { %v2669_v51 = vadd.f32 %v2660_v43, %v6098_v18 }
 0xa92   :  { %v2673_v59 = vsel %vm96_vm12, %v2669_v51, 0.0 }
 0xa93   :  { %2674 = vadd.xlane.f32.xlu1 %v2673_v59 }
 0xa95   :  { %v2661_v63 = vpop.f32.mrf.mxu2 }
 0xa96   :  { %v2662_v6 = vadd.f32 %v5011_v46, %v2661_v63 }
 0xa98   :  { %v2670_v10 = vadd.f32 %v2662_v6, %v6100_v19  ;;  %v5090_v19 = vpop.eup %5089  ;;  %v5012_v6 = vld [vmem:[%s7031_s20] ss:$0 sm:$0xff] }
 0xa99   :  { %v2686_v25 = vmul.f32 64.0, %v5090_v19  ;;  %vm2690_vm8 = vweird.f32 %v5090_v19 }
 0xa9a   :  { %v2676_v13 = vsel %vm96_vm12, %v2670_v10, 0.0 }
 0xa9b   :  { %2677 = vadd.xlane.f32.xlu0 %v2676_v13  ;;  %v2687_v27 = vsub.f32 1.0, %v2686_v25 }
 0xa9d   :  { %v2688_v24 = vmul.f32 %v5090_v19, %v2687_v27  ;;  %v4762_v27 = vld [vmem:[%s7029_s18 + $0x38] sm:$0xff] }
 0xa9e   :  { %2921 = vmatpush.bf16.msra.mxu0 %v4762_v27 }
 0xa9f   :  { %v2689_v26 = vadd.f32 %v5090_v19, %v2688_v24 }
 0xaa1   :  { %v6426_v29 = vsel %vm2690_vm8, %v5090_v19, %v2689_v26 }
 0xacc   :  { %v2664_v7 = vpop.f32.mrf.mxu2 }
 0xacd   :  { %v2665_v52 = vadd.f32 %v5011_v46, %v2664_v7 }
 0xacf   :  { %v2671_v14 = vadd.f32 %v2665_v52, %v6121_v54  ;;  %v5013_v52 = vld [vmem:[%s7032_s21] ss:$0 sm:$0xff] }
 0xad1   :  { %v2679_v12 = vsel %vm96_vm12, %v2671_v14, 0.0 }
 0xad2   :  { %2680 = vadd.xlane.f32.xlu2 %v2679_v12 }
 0xad4   :  { %v2666_v16 = vpop.f32.mrf.mxu2 }
 0xad5   :  { %v2667_v32 = vadd.f32 %v5011_v46, %v2666_v16 }
 0xad7   :  { %v2672_v18 = vadd.f32 %v2667_v32, %v6123_v55 }
 0xad9   :  { %v2682_v17 = vsel %vm96_vm12, %v2672_v18, 0.0 }
 0xada   :  { %2683 = vadd.xlane.f32.xlu1 %v2682_v17 }
 0xb06   :  { %v2675_v54 = vpop.xlane.xlu1 %2674 }
 0xb07   :  { %v2692_v2 = vmul.f32 %v6426_v29, %v2675_v54  ;;  %v4761_v54 = vld [vmem:[%s7029_s18 + $0x30] sm:$0xff] }
 0xb08   :  { %2922 = vmatpush.bf16.msra.mxu0 %v4761_v54 }
 0xb09   :  { %v2696_v34 = vsub.f32 %v2669_v51, %v2692_v2 }
 0xb0b   :  { %v2700_v35 = vmul.f32 %v2696_v34, %v2696_v34 }
 0xb0d   :  { %v2704_v55 = vsel %vm96_vm12, %v2700_v35, 0.0 }
 0xb0e   :  { %v2678_v36 = vpop.xlane.xlu0 %2677  ;;  %2705 = vadd.xlane.f32.xlu0 %v2704_v55  ;;  %v4760_v55 = vld [vmem:[%s7029_s18 + $0x28] sm:$0xff] }
 0xb0f   :  { %v2693_v37 = vmul.f32 %v6426_v29, %v2678_v36  ;;  %2923 = vmatpush.bf16.msra.mxu0 %v4760_v55 }
 0xb11   :  { %v2697_v15 = vsub.f32 %v2670_v10, %v2693_v37 }
 0xb13   :  { %v2701_v38 = vmul.f32 %v2697_v15, %v2697_v15 }
 0xb15   :  { %v2707_v39 = vsel %vm96_vm12, %v2701_v38, 0.0 }
 0xb16   :  { %2708 = vadd.xlane.f32.xlu2 %v2707_v39 }
 0xb45   :  { %v2681_v33 = vpop.xlane.xlu2 %2680 }
 0xb46   :  { %v2694_v30 = vmul.f32 %v6426_v29, %v2681_v33 }
 0xb48   :  { %v6433_v41 = vsub.f32 %v2671_v14, %v2694_v30 }
 0xb4a   :  { %v2702_v5 = vmul.f32 %v6433_v41, %v6433_v41 }
 0xb4c   :  { %v2710_v42 = vsel %vm96_vm12, %v2702_v5, 0.0 }
 0xb4d   :  { %2711 = vadd.xlane.f32.xlu1 %v2710_v42  ;;  %v2684_v44 = vpop.xlane.xlu1 %2683 }
 0xb4e   :  { %v2695_v49 = vmul.f32 %v6426_v29, %v2684_v44 }
 0xb50   :  { %v6439_v50 = vsub.f32 %v2672_v18, %v2695_v49 }
 0xb52   :  { %v2703_v21 = vmul.f32 %v6439_v50, %v6439_v50 }
 0xb54   :  { %v2713_v31 = vsel %vm96_vm12, %v2703_v21, 0.0 }
 0xb55   :  { %2714 = vadd.xlane.f32.xlu0 %v2713_v31 }
 0xb81   :  { %v2706_v58 = vpop.xlane.xlu0 %2705 }
 0xb82   :  { %v2716_v61 = vmul.f32 %v2706_v58, %v6426_v29 }
 0xb84   :  { %v2720_v28 = vadd.f32 1e-05, %v2716_v61 }
 0xb86   :  { %5091 = vrsqrt.f32 %v2720_v28  ;;  %vm2730_vm10 = vweird.f32 %v2720_v28 }
 0xb89   :  { %v2709_v62 = vpop.xlane.xlu2 %2708 }
 0xb8a   :  { %v2717_v4 = vmul.f32 %v2709_v62, %v6426_v29  ;;  %v4757_v62 = vld [vmem:[%s7029_s18 + $0x10] sm:$0xff] }
 0xb8c   :  { %v5092_v20 = vpop.eup %5091  ;;  %v2721_v22 = vadd.f32 1e-05, %v2717_v4  ;;  %v4756_v4 = vld [vmem:[%s7029_s18 + $0x8] sm:$0xff] }
 0xb8d   :  { %v2725_v47 = vmul.f32 %v5092_v20, %v2720_v28  ;;  %vm2731_vm9 = vweird.f32 %v5092_v20 }
 0xb8e   :  { %5093 = vrsqrt.f32 %v2721_v22  ;;  %vm2732_vm11 = vmor %vm2730_vm10, %vm2731_vm9  ;;  %vm2740_vm14 = vweird.f32 %v2721_v22 }
 0xb8f   :  { %v2726_v48 = vmul.f32 %v5092_v20, %v2725_v47 }
 0xb91   :  { %v2727_v0 = vmul.f32 0.5, %v2726_v48 }
 0xb93   :  { %v2728_v1 = vsub.f32 1.5, %v2727_v0 }
 0xb94   :  { %v5094_v3 = vpop.eup %5093 }
 0xb95   :  { %v2729_v46 = vmul.f32 %v5092_v20, %v2728_v1  ;;  %v2735_v8 = vmul.f32 %v5094_v3, %v2721_v22  ;;  %vm2741_vm13 = vweird.f32 %v5094_v3  ;;  %v5014_v22 = vld [vmem:[%s7028_s17] ss:$0 sm:$0xff] }
 0xb96   :  { %vm2742_vm15 = vmor %vm2740_vm14, %vm2741_vm13 }
 0xb97   :  { %v2736_v43 = vmul.f32 %v5094_v3, %v2735_v8  ;;  %v2733_v51 = vsel %vm2732_vm11, %v5092_v20, %v2729_v46 }
 0xb98   :  { %v2764_v10 = vmul.f32 %v2733_v51, %v2696_v34 }
 0xb99   :  { %v2737_v59 = vmul.f32 0.5, %v2736_v43 }
 0xb9a   :  { %v2772_v14 = vmul.f32 %v5012_v6, %v2764_v10 }
 0xb9b   :  { %v2738_v63 = vsub.f32 1.5, %v2737_v59 }
 0xb9c   :  { %v6464_v32 = vadd.f32 %v5013_v52, %v2772_v14 }
 0xb9d   :  { %v2739_v13 = vmul.f32 %v5094_v3, %v2738_v63 }
 0xb9f   :  { %v2743_v7 = vsel %vm2742_vm15, %v5094_v3, %v2739_v13  ;;  %v5015_v13 = vld [vmem:[%s7030_s19] ss:$0 sm:$0xff] }
 0xba0   :  { %v2765_v12 = vmul.f32 %v2743_v7, %v2697_v15  ;;  %v4759_v15 = vld [vmem:[%s7029_s18 + $0x20] sm:$0xff] }
 0xba1   :  { %2924 = vmatpush.bf16.msra.mxu0 %v4759_v15 }
 0xba2   :  { %v2773_v16 = vmul.f32 %v5012_v6, %v2765_v12 }
 0xba4   :  { %v6466_v18 = vadd.f32 %v5013_v52, %v2773_v16 }
 0xba6   :  { %v2784_v17 = vpack.c.bf16 %v6466_v18, %v6464_v32 }
 0xba8   :  { %4488 = vmatmul.msk.bf16.vlgmr.msrb.gmra.mxu3 %vm96_vm12, %v2784_v17 }
 0xbc0   :  { %v2712_v23 = vpop.xlane.xlu1 %2711 }
 0xbc1   :  { %v2718_v19 = vmul.f32 %v2712_v23, %v6426_v29 }
 0xbc3   :  { %v2722_v25 = vadd.f32 1e-05, %v2718_v19 }
 0xbc5   :  { %5095 = vrsqrt.f32 %v2722_v25  ;;  %vm2750_vm2 = vweird.f32 %v2722_v25 }
 0xbc8   :  { %v2715_v24 = vpop.xlane.xlu0 %2714 }
 0xbc9   :  { %v2719_v26 = vmul.f32 %v2715_v24, %v6426_v29 }
 0xbcb   :  { %v5096_v2 = vpop.eup %5095  ;;  %v2723_v34 = vadd.f32 1e-05, %v2719_v26 }
 0xbcc   :  { %v2745_v35 = vmul.f32 %v5096_v2, %v2722_v25  ;;  %vm2751_vm0 = vweird.f32 %v5096_v2 }
 0xbcd   :  { %5097 = vrsqrt.f32 %v2723_v34  ;;  %vm2752_vm4 = vmor %vm2750_vm2, %vm2751_vm0  ;;  %vm2760_vm6 = vweird.f32 %v2723_v34 }
 0xbce   :  { %v2746_v36 = vmul.f32 %v5096_v2, %v2745_v35 }
 0xbd0   :  { %v2747_v37 = vmul.f32 0.5, %v2746_v36 }
 0xbd2   :  { %v2748_v38 = vsub.f32 1.5, %v2747_v37 }
 0xbd3   :  { %v5098_v39 = vpop.eup %5097 }
 0xbd4   :  { %v2749_v33 = vmul.f32 %v5096_v2, %v2748_v38  ;;  %v2755_v30 = vmul.f32 %v5098_v39, %v2723_v34  ;;  %vm2761_vm5 = vweird.f32 %v5098_v39 }
 0xbd5   :  { %vm2762_vm8 = vmor %vm2760_vm6, %vm2761_vm5 }
 0xbd6   :  { %v2753_v5 = vsel %vm2752_vm4, %v5096_v2, %v2749_v33  ;;  %v2756_v42 = vmul.f32 %v5098_v39, %v2755_v30 }
 0xbd7   :  { %v2766_v44 = vmul.f32 %v2753_v5, %v6433_v41  ;;  %v4758_v41 = vld [vmem:[%s7029_s18 + $0x18] sm:$0xff] }
 0xbd8   :  { %v2757_v49 = vmul.f32 0.5, %v2756_v42  ;;  %2925 = vmatpush.bf16.msra.mxu0 %v4758_v41 }
 0xbd9   :  { %v2774_v21 = vmul.f32 %v5012_v6, %v2766_v44 }
 0xbda   :  { %v2758_v31 = vsub.f32 1.5, %v2757_v49 }
 0xbdb   :  { %v2782_v11 = vadd.f32 %v5013_v52, %v2774_v21 }
 0xbdc   :  { %v2759_v53 = vmul.f32 %v5098_v39, %v2758_v31  ;;  %2926 = vmatpush.bf16.msra.mxu0 %v4757_v62  ;;  %v4559_v62 = vld [vmem:[%s7023_s12 + $0x78] sm:$0xf0] }
 0xbde   :  { %v2763_v45 = vsel %vm2762_vm8, %v5098_v39, %v2759_v53 }
 0xbdf   :  { %v2767_v58 = vmul.f32 %v2763_v45, %v6439_v50  ;;  %v4755_v50 = vld [vmem:[%s7029_s18] sm:$0xff] }
 0xbe0   :  { %2927 = vmatpush.bf16.msra.mxu0 %v4756_v4 }
 0xbe1   :  { %v2775_v61 = vmul.f32 %v5012_v6, %v2767_v58 }
 0xbe3   :  { %v2783_v28 = vadd.f32 %v5013_v52, %v2775_v61  ;;  %v4557_v61 = vld [vmem:[%s7023_s12 + $0x70] sm:$0xf] }
 0xbe4   :  { %2928 = vmatpush.bf16.msra.mxu0 %v4755_v50  ;;  %v4549_v50 = vld [vmem:[%s7023_s12 + $0x60] sm:$0xf] }
 0xbe5   :  { %v2785_v40 = vpack.c.bf16 %v2783_v28, %v2782_v11 }
 0xbe7   :  { %4489 = vmatmul.msk.bf16.gmra.mxu3 %vm96_vm12, %v2785_v40  ;;  %v4769_v40 = vld [vmem:[%s7023_s12 + $0x74] sm:$0xf] }
 0xbe8   :  { %v4562_v4 = vor.u32 %v4769_v40, %v4559_v62 }
 0xbea   :  { %3135 = vmatpush.bf16.msrb.mxu2 %v4562_v4 }
 0xc2b   :  { %v2837_v20 = vpop.f32.mrf.mxu3 }
 0xc2c   :  { %v2838_v47 = vadd.f32 %v5014_v22, %v2837_v20  ;;  %v4768_v20 = vld [vmem:[%s7023_s12 + $0x64] sm:$0xf0] }
 0xc2e   :  { %v2847_v1 = vmax.f32 %v2838_v47, 0.0  ;;  %v4550_v47 = vor.u32 %v4768_v20, %v4549_v50 }
 0xc33   :  { %v2839_v48 = vpop.f32.mrf.mxu3 }
 0xc34   :  { %v2840_v0 = vadd.f32 %v5014_v22, %v2839_v48  ;;  %v4551_v48 = vld [vmem:[%s7023_s12 + $0x68] sm:$0xf0] }
 0xc36   :  { %v2848_v3 = vmax.f32 %v2840_v0, 0.0 }
 0xc38   :  { %v2851_v46 = vpack.c.bf16 %v2848_v3, %v2847_v1  ;;  %v4541_v1 = vld [vmem:[%s7023_s12 + $0x50] sm:$0xf]  ;;  %v4766_v3 = vld [vmem:[%s7023_s12 + $0x54] sm:$0xf0] }
 0xc3a   :  { %2929 = vmatmul.bf16.vlgmr.msra.gmra.mxu0 %v2851_v46  ;;  %v4765_v46 = vld [vmem:[%s7023_s12 + $0x54] sm:$0xf] }
 0xc6a   :  { %v2842_v8 = vpop.f32.mrf.mxu3 }
 0xc6b   :  { %v2843_v43 = vadd.f32 %v5014_v22, %v2842_v8  ;;  %v4542_v8 = vor.u32 %v4766_v3, %v4541_v1 }
 0xc6d   :  { %v2849_v63 = vmax.f32 %v2843_v43, 0.0  ;;  %v4543_v43 = vld [vmem:[%s7023_s12 + $0x58] sm:$0xf0] }
 0xc72   :  { %v2844_v51 = vpop.f32.mrf.mxu3 }
 0xc73   :  { %v2845_v59 = vadd.f32 %v5014_v22, %v2844_v51  ;;  %v4767_v22 = vld [vmem:[%s7023_s12 + $0x64] sm:$0xf] }
 0xc74   :  { %v4554_v0 = vor.u32 %v4767_v22, %v4551_v48 }
 0xc75   :  { %v2850_v6 = vmax.f32 %v2845_v59, 0.0  ;;  %v4546_v59 = vor.u32 %v4765_v46, %v4543_v43 }
 0xc76   :  { %3136 = vmatpush.bf16.msrb.mxu2 %v4554_v0 }
 0xc77   :  { %v2852_v10 = vpack.c.bf16 %v2850_v6, %v2849_v63  ;;  %v4533_v6 = vld [vmem:[%s7023_s12 + $0x40] sm:$0xf] }
 0xc79   :  { %2934 = vmatmul.bf16.gmra.mxu0 %v2852_v10  ;;  %v4764_v10 = vld [vmem:[%s7023_s12 + $0x44] sm:$0xf0] }
 0xc7a   :  { %3137 = vmatpush.bf16.msrb.mxu2 %v4546_v59 }
 0xcb7   :  { %v2930_v7 = vpop.f32.mrf.mxu0 }
 0xcb8   :  { %v2931_v52 = vadd.f32 %v5015_v13, %v2930_v7 }
 0xcba   :  { %v2940_v14 = vadd.f32 %v2931_v52, %v6464_v32  ;;  %v4534_v52 = vor.u32 %v4764_v10, %v4533_v6 }
 0xcbc   :  { %v2944_v12 = vsel %vm96_vm12, %v2940_v14, 0.0 }
 0xcbd   :  { %2945 = vadd.xlane.f32.xlu2 %v2944_v12 }
 0xcbf   :  { %v2932_v16 = vpop.f32.mrf.mxu0 }
 0xcc0   :  { %v2933_v17 = vadd.f32 %v5015_v13, %v2932_v16 }
 0xcc2   :  { %v2941_v23 = vadd.f32 %v2933_v17, %v6466_v18 }
 0xcc4   :  { %v2947_v19 = vsel %vm96_vm12, %v2941_v23, 0.0 }
 0xcc5   :  { %2948 = vadd.xlane.f32.xlu1 %v2947_v19 }
 0xcf6   :  { %v2935_v25 = vpop.f32.mrf.mxu0 }
 0xcf7   :  { %v2936_v27 = vadd.f32 %v5015_v13, %v2935_v25 }
 0xcf9   :  { %v2942_v24 = vadd.f32 %v2936_v27, %v2782_v11 }
 0xcfb   :  { %v2950_v26 = vsel %vm96_vm12, %v2942_v24, 0.0 }
 0xcfc   :  { %2951 = vadd.xlane.f32.xlu0 %v2950_v26 }
 0xcfe   :  { %v2937_v54 = vpop.f32.mrf.mxu0 }
 0xcff   :  { %v2938_v2 = vadd.f32 %v5015_v13, %v2937_v54  ;;  %v4763_v13 = vld [vmem:[%s7023_s12 + $0x44] sm:$0xf] }
 0xd01   :  { %v2943_v34 = vadd.f32 %v2938_v2, %v2783_v28  ;;  %v4770_v28 = vld [vmem:[%s7023_s12 + $0x74] sm:$0xf0] }
 0xd02   :  { %v4558_v41 = vor.u32 %v4770_v28, %v4557_v61 }
 0xd03   :  { %v2953_v32 = vsel %vm96_vm12, %v2943_v34, 0.0 }
 0xd04   :  { %2954 = vadd.xlane.f32.xlu2 %v2953_v32  ;;  %3116 = vmatpush.bf16.msra.mxu1 %v4558_v41 }
 0xd08   :  { %3117 = vmatpush.bf16.msra.mxu1 %v4550_v47 }
 0xd0c   :  { %3118 = vmatpush.bf16.msra.mxu1 %v4542_v8 }
 0xd10   :  { %3119 = vmatpush.bf16.msra.mxu1 %v4534_v52 }
 0xd30   :  { %v2946_v35 = vpop.xlane.xlu2 %2945 }
 0xd31   :  { %v2956_v55 = vmul.f32 %v2946_v35, %v6426_v29 }
 0xd33   :  { %v6513_v36 = vsub.f32 %v2940_v14, %v2956_v55  ;;  %v4535_v14 = vld [vmem:[%s7023_s12 + $0x48] sm:$0xf0] }
 0xd34   :  { %v4538_v12 = vor.u32 %v4763_v13, %v4535_v14 }
 0xd35   :  { %v2964_v18 = vmul.f32 %v6513_v36, %v6513_v36 }
 0xd36   :  { %3138 = vmatpush.bf16.msrb.mxu2 %v4538_v12 }
 0xd37   :  { %v2968_v37 = vsel %vm96_vm12, %v2964_v18, 0.0 }
 0xd38   :  { %2969 = vadd.xlane.f32.xlu1 %v2968_v37  ;;  %v2949_v15 = vpop.xlane.xlu1 %2948  ;;  %v5016_v37 = vld [vmem:[%s7033_s22] ss:$0 sm:$0xff] }
 0xd39   :  { %v2957_v38 = vmul.f32 %v2949_v15, %v6426_v29 }
 0xd3b   :  { %v6519_v39 = vsub.f32 %v2941_v23, %v2957_v38 }
 0xd3d   :  { %v2965_v33 = vmul.f32 %v6519_v39, %v6519_v39 }
 0xd3f   :  { %v2971_v30 = vsel %vm96_vm12, %v2965_v33, 0.0 }
 0xd40   :  { %2972 = vadd.xlane.f32.xlu0 %v2971_v30  ;;  %v5017_v30 = vld [vmem:[%s7034_s23] ss:$0 sm:$0xff] }
 0xd6f   :  { %v2952_v5 = vpop.xlane.xlu0 %2951 }
 0xd70   :  { %v2958_v42 = vmul.f32 %v2952_v5, %v6426_v29 }
 0xd72   :  { %v6525_v44 = vsub.f32 %v2942_v24, %v2958_v42 }
 0xd74   :  { %v2966_v49 = vmul.f32 %v6525_v44, %v6525_v44 }
 0xd76   :  { %v2974_v21 = vsel %vm96_vm12, %v2966_v49, 0.0 }
 0xd77   :  { %v2955_v31 = vpop.xlane.xlu2 %2954  ;;  %2975 = vadd.xlane.f32.xlu2 %v2974_v21 }
 0xd78   :  { %v2959_v11 = vmul.f32 %v2955_v31, %v6426_v29 }
 0xd7a   :  { %v6531_v53 = vsub.f32 %v2943_v34, %v2959_v11 }
 0xd7c   :  { %v2967_v45 = vmul.f32 %v6531_v53, %v6531_v53 }
 0xd7e   :  { %v2977_v58 = vsel %vm96_vm12, %v2967_v45, 0.0 }
 0xd7f   :  { %2978 = vadd.xlane.f32.xlu1 %v2977_v58 }
 0xdab   :  { %v2970_v51 = vpop.xlane.xlu1 %2969 }
 0xdac   :  { %v2980_v63 = vmul.f32 %v2970_v51, %v6426_v29 }
 0xdae   :  { %v2984_v7 = vadd.f32 1e-05, %v2980_v63 }
 0xdb0   :  { %5099 = vrsqrt.f32 %v2984_v7  ;;  %vm2994_vm10 = vweird.f32 %v2984_v7 }
 0xdb3   :  { %v2973_v16 = vpop.xlane.xlu0 %2972 }
 0xdb4   :  { %v2981_v17 = vmul.f32 %v2973_v16, %v6426_v29 }
 0xdb6   :  { %v5100_v23 = vpop.eup %5099  ;;  %v2985_v19 = vadd.f32 1e-05, %v2981_v17 }
 0xdb7   :  { %v2989_v25 = vmul.f32 %v5100_v23, %v2984_v7  ;;  %vm2995_vm9 = vweird.f32 %v5100_v23  ;;  %v4530_v7 = vld [vmem:[%s7024_s13 + $0x2] sm:$0x3] }
 0xdb8   :  { %5101 = vrsqrt.f32 %v2985_v19  ;;  %vm2996_vm11 = vmor %vm2994_vm10, %vm2995_vm9  ;;  %vm3004_vm14 = vweird.f32 %v2985_v19  ;;  %v3063_v14 = vperm.slane %v4530_v7, 1  ;;  %v3062_v12 = vperm.slane %v4530_v7, 0 }
 0xdb9   :  { %v2990_v27 = vmul.f32 %v5100_v23, %v2989_v25 }
 0xdbb   :  { %v2991_v24 = vmul.f32 0.5, %v2990_v27 }
 0xdbd   :  { %v2992_v26 = vsub.f32 1.5, %v2991_v24 }
 0xdbe   :  { %v5102_v54 = vpop.eup %5101 }
 0xdbf   :  { %v2993_v2 = vmul.f32 %v5100_v23, %v2992_v26  ;;  %v2999_v34 = vmul.f32 %v5102_v54, %v2985_v19  ;;  %vm3005_vm13 = vweird.f32 %v5102_v54 }
 0xdc0   :  { %vm3006_vm15 = vmor %vm3004_vm14, %vm3005_vm13 }
 0xdc1   :  { %v3000_v32 = vmul.f32 %v5102_v54, %v2999_v34  ;;  %v2997_v35 = vsel %vm2996_vm11, %v5100_v23, %v2993_v2 }
 0xdc2   :  { %v3028_v15 = vmul.f32 %v2997_v35, %v6513_v36 }
 0xdc3   :  { %v3001_v55 = vmul.f32 0.5, %v3000_v32 }
 0xdc4   :  { %v3036_v5 = vmul.f32 %v5016_v37, %v3028_v15 }
 0xdc5   :  { %v3002_v18 = vsub.f32 1.5, %v3001_v55 }
 0xdc6   :  { %v6594_v21 = vadd.f32 %v5017_v30, %v3036_v5 }
 0xdc7   :  { %v3003_v38 = vmul.f32 %v5102_v54, %v3002_v18 }
 0xdc9   :  { %v3007_v33 = vsel %vm3006_vm15, %v5102_v54, %v3003_v38 }
 0xdca   :  { %v3029_v42 = vmul.f32 %v3007_v33, %v6519_v39 }
 0xdcc   :  { %v3037_v49 = vmul.f32 %v5016_v37, %v3029_v42 }
 0xdce   :  { %v6596_v31 = vadd.f32 %v5017_v30, %v3037_v49 }
 0xdd0   :  { %v3048_v11 = vpack.c.bf16 %v6596_v31, %v6594_v21 }
 0xdd2   :  { %4563 = vmatmul.msk.bf16.vlgmr.msra.gmra.mxu1 %vm96_vm12, %v3048_v11  ;;  %4565 = vmatmul.msk.bf16.vlgmr.msrb.gmra.mxu2 %vm96_vm12, %v3048_v11 }
 0xdea   :  { %v2976_v36 = vpop.xlane.xlu2 %2975 }
 0xdeb   :  { %v2982_v45 = vmul.f32 %v2976_v36, %v6426_v29 }
 0xded   :  { %v2986_v58 = vadd.f32 1e-05, %v2982_v45 }
 0xdef   :  { %5103 = vrsqrt.f32 %v2986_v58  ;;  %vm3014_vm2 = vweird.f32 %v2986_v58 }
 0xdf2   :  { %v2979_v61 = vpop.xlane.xlu1 %2978 }
 0xdf3   :  { %v2983_v39 = vmul.f32 %v2979_v61, %v6426_v29 }
 0xdf5   :  { %v5104_v28 = vpop.eup %5103  ;;  %v2987_v40 = vadd.f32 1e-05, %v2983_v39 }
 0xdf6   :  { %v3009_v41 = vmul.f32 %v5104_v28, %v2986_v58  ;;  %vm3015_vm0 = vweird.f32 %v5104_v28 }
 0xdf7   :  { %5105 = vrsqrt.f32 %v2987_v40  ;;  %vm3016_vm4 = vmor %vm3014_vm2, %vm3015_vm0  ;;  %vm3024_vm6 = vweird.f32 %v2987_v40 }
 0xdf8   :  { %v3010_v62 = vmul.f32 %v5104_v28, %v3009_v41 }
 0xdfa   :  { %v3011_v4 = vmul.f32 0.5, %v3010_v62 }
 0xdfc   :  { %v3012_v50 = vsub.f32 1.5, %v3011_v4 }
 0xdfd   :  { %v5106_v20 = vpop.eup %5105 }
 0xdfe   :  { %v3013_v22 = vmul.f32 %v5104_v28, %v3012_v50  ;;  %v3019_v47 = vmul.f32 %v5106_v20, %v2987_v40  ;;  %vm3025_vm5 = vweird.f32 %v5106_v20 }
 0xdff   :  { %vm3026_vm8 = vmor %vm3024_vm6, %vm3025_vm5 }
 0xe00   :  { %v3017_v48 = vsel %vm3016_vm4, %v5104_v28, %v3013_v22  ;;  %v3020_v0 = vmul.f32 %v5106_v20, %v3019_v47 }
 0xe01   :  { %v3030_v1 = vmul.f32 %v3017_v48, %v6525_v44 }
 0xe02   :  { %v3021_v3 = vmul.f32 0.5, %v3020_v0 }
 0xe03   :  { %v3038_v46 = vmul.f32 %v5016_v37, %v3030_v1 }
 0xe04   :  { %v3022_v8 = vsub.f32 1.5, %v3021_v3 }
 0xe05   :  { %v6605_v43 = vadd.f32 %v5017_v30, %v3038_v46 }
 0xe06   :  { %v3023_v51 = vmul.f32 %v5106_v20, %v3022_v8 }
 0xe08   :  { %v3027_v59 = vsel %vm3026_vm8, %v5106_v20, %v3023_v51 }
 0xe09   :  { %v3031_v63 = vmul.f32 %v3027_v59, %v6531_v53 }
 0xe0b   :  { %v3039_v6 = vmul.f32 %v5016_v37, %v3031_v63 }
 0xe0d   :  { %v6608_v10 = vadd.f32 %v5017_v30, %v3039_v6 }
 0xe0f   :  { %v3049_v13 = vpack.c.bf16 %v6608_v10, %v6605_v43 }
 0xe11   :  { %4564 = vmatmul.msk.bf16.gmra.mxu1 %vm96_vm12, %v3049_v13  ;;  %4566 = vmatmul.msk.bf16.gmra.mxu2 %vm96_vm12, %v3049_v13 }
 0xe4f   :  { %v3121_v44 = vpop.f32.mrf.mxu1 }
 0xe50   :  { %v3122_v17 = vadd.f32 %v3121_v44, %v3062_v12 }
 0xe55   :  { %v3140_v52 = vpop.f32.mrf.mxu2 }
 0xe56   :  { %v3141_v16 = vadd.f32 %v3140_v52, %v3063_v14 }
 0xe57   :  { %v3123_v53 = vpop.f32.mrf.mxu1 }
 0xe58   :  { %v3150_v19 = vpack.c.bf16 %v3141_v16, %v3122_v17  ;;  %v3124_v25 = vadd.f32 %v3123_v53, %v3062_v12 }
 0xe5a   :  { %v3158_v26 = vunpack.c.l.b16 %v3150_v19  ;;  %v3253_v54 = vunpack.c.h.b16 %v3150_v19 }
 0xe5d   :  { %v3142_v23 = vpop.f32.mrf.mxu2 }
 0xe5e   :  { %v3143_v27 = vadd.f32 %v3142_v23, %v3063_v14 }
 0xe60   :  { %v3151_v24 = vpack.c.bf16 %v3143_v27, %v3124_v25 }
 0xe62   :  { %v3159_v2 = vunpack.c.l.b16 %v3151_v24  ;;  %v3254_v34 = vunpack.c.h.b16 %v3151_v24 }
 0xe64   :  { %v3162_v32 = vpack.c.b16 %v3159_v2, %v3158_v26  ;;  %v6617_v35 = vpack.c.b16 %v3254_v34, %v3253_v54 }
 0xe66   :  { %3164 = vrot.lane.b32.xlu1 %v3162_v32, %s5241_s9 }
 0xe8e   :  { %v3126_v55 = vpop.f32.mrf.mxu1 }
 0xe8f   :  { %v3127_v37 = vadd.f32 %v3126_v55, %v3062_v12 }
 0xe94   :  { %v3145_v18 = vpop.f32.mrf.mxu2 }
 0xe95   :  { %v3146_v15 = vadd.f32 %v3145_v18, %v3063_v14 }
 0xe96   :  { %v3128_v33 = vpop.f32.mrf.mxu1 }
 0xe97   :  { %v3152_v38 = vpack.c.bf16 %v3146_v15, %v3127_v37  ;;  %v3129_v5 = vadd.f32 %v3128_v33, %v3062_v12 }
 0xe99   :  { %v3160_v11 = vunpack.c.l.b16 %v3152_v38  ;;  %v3255_v36 = vunpack.c.h.b16 %v3152_v38 }
 0xe9c   :  { %v3147_v30 = vpop.f32.mrf.mxu2 }
 0xe9d   :  { %v3148_v42 = vadd.f32 %v3147_v30, %v3063_v14 }
 0xe9f   :  { %v3153_v49 = vpack.c.bf16 %v3148_v42, %v3129_v5 }
 0xea1   :  { %v3161_v45 = vunpack.c.l.b16 %v3153_v49  ;;  %v3256_v58 = vunpack.c.h.b16 %v3153_v49 }
 0xea3   :  { %v3163_v61 = vpack.c.b16 %v3161_v45, %v3160_v11  ;;  %v6620_v39 = vpack.c.b16 %v3256_v58, %v3255_v36 }
 0xea5   :  { %3273 = vmatpush.bf16.msrb.mxu0 %v6620_v39  ;;  %3288 = vrot.lane.b32.xlu1 %v3163_v61, %s5242_s5 }
 0xea6   :  { %3292 = vrot.lane.b32.xlu2 %v3163_v61, %s5243_s26  ;;  %3166 = vrot.lane.b32.xlu0 %v3163_v61, %s5241_s9 }
 0xea9   :  { %3274 = vmatpush.bf16.msrb.mxu0 %v6617_v35 }
 0xead   :  { %3538 = vrot.lane.b32.xlu1 %v3162_v32, %s5245_s7 }
 0xeae   :  { %3286 = vrot.lane.b32.xlu2 %v3162_v32, %s5242_s5  ;;  %3290 = vrot.lane.b32.xlu0 %v3162_v32, %s5243_s26 }
 0xeb5   :  { %3412 = vrot.lane.b32.xlu1 %v3163_v61, %s5247_s28 }
 0xeb6   :  { %3540 = vrot.lane.b32.xlu2 %v3163_v61, %s5245_s7  ;;  %3416 = vrot.lane.b32.xlu0 %v3163_v61, %s5246_s30 }
 0xebd   :  { %3381 = vrot.lane.b32.xlu1 %v6620_v39, %s5242_s5 }
 0xebe   :  { %3410 = vrot.lane.b32.xlu2 %v3162_v32, %s5247_s28  ;;  %3414 = vrot.lane.b32.xlu0 %v3162_v32, %s5246_s30 }
 0xec6   :  { %3536 = vrot.lane.b32.xlu2 %v3163_v61, %s5248_s8  ;;  %3534 = vrot.lane.b32.xlu0 %v3162_v32, %s5248_s8 }
 0xece   :  { %3629 = vrot.lane.b32.xlu2 %v6620_v39, %s5248_s8  ;;  %3379 = vrot.lane.b32.xlu0 %v6617_v35, %s5242_s5 }
 0xed8   :  { %v3165_v41 = vpop.permute.xlu1 %3164 }
 0xed9   :  { %v3175_v0 = vsel %vm2053_vm1, %v3165_v41, 0 }
 0xf00   :  { %v3293_v28 = vpop.permute.xlu2 %3292 }
 0xf01   :  { %v3304_v40 = vsel %vm2053_vm1, %v3293_v28, 0 }
 0xf02   :  { %3312 = vmatpush.bf16.xpose.msrb.mxu1 %v3304_v40 }
 0xf08   :  { %v3287_v62 = vpop.permute.xlu2 %3286 }
 0xf10   :  { %v3541_v22 = vpop.permute.xlu2 %3540 }
 0xf11   :  { %v3552_v3 = vsel %vm2053_vm1, %v3541_v22, 0 }
 0xf17   :  { %v3289_v4 = vpop.permute.xlu1 %3288 }
 0xf18   :  { %v3167_v50 = vpop.permute.xlu0 %3166  ;;  %v3411_v63 = vpop.permute.xlu2 %3410 }
 0xf19   :  { %v3178_v20 = vsel %vm2053_vm1, %v3167_v50, 0 }
 0xf1a   :  { %3186 = vmatpush.bf16.xpose.msra.mxu3 %v3178_v20 }
 0xf1f   :  { %v3539_v47 = vpop.permute.xlu1 %3538 }
 0xf20   :  { %v3291_v48 = vpop.permute.xlu0 %3290  ;;  %v3549_v59 = vsel %vm2053_vm1, %v3539_v47, 0  ;;  %v3537_v7 = vpop.permute.xlu2 %3536 }
 0xf21   :  { %v3301_v1 = vsel %vm2053_vm1, %v3291_v48, 0 }
 0xf22   :  { %3187 = vmatpush.bf16.xpose.msra.mxu3 %v3175_v0  ;;  %3313 = vmatpush.bf16.xpose.msrb.mxu1 %v3301_v1 }
 0xf27   :  { %v3413_v46 = vpop.permute.xlu1 %3412 }
 0xf28   :  { %v3417_v8 = vpop.permute.xlu0 %3416  ;;  %v3630_v12 = vpop.permute.xlu2 %3629 }
 0xf29   :  { %v3428_v51 = vsel %vm2053_vm1, %v3417_v8, 0  ;;  %4567 = vmatmul.msk.bf16.vlgmr.msra.gmra.mxu3 %vm2053_vm1, %v3162_v32  ;;  %4571 = vmatmul.msk.bf16.vlgmr.msrb.gmra.mxu1 %vm2053_vm1, %v3287_v62 }
 0xf2a   :  { %3560 = vmatpush.bf16.xpose.msra.mxu1 %v3552_v3  ;;  %3436 = vmatpush.bf16.xpose.msrb.mxu3 %v3428_v51 }
 0xf2f   :  { %v3382_v6 = vpop.permute.xlu1 %3381 }
 0xf30   :  { %v3415_v13 = vpop.permute.xlu0 %3414  ;;  %3397 = vmatpush.bf16.msra.mxu2 %v3382_v6 }
 0xf31   :  { %v3425_v44 = vsel %vm2053_vm1, %v3415_v13, 0 }
 0xf32   :  { %3561 = vmatpush.bf16.xpose.msra.mxu1 %v3549_v59  ;;  %3437 = vmatpush.bf16.xpose.msrb.mxu3 %v3425_v44 }
 0xf38   :  { %v3535_v52 = vpop.permute.xlu0 %3534 }
 0xf39   :  { %4568 = vmatmul.msk.bf16.gmra.mxu3 %vm2053_vm1, %v3163_v61  ;;  %4572 = vmatmul.msk.bf16.gmra.mxu1 %vm2053_vm1, %v3289_v4 }
 0xf40   :  { %v3380_v14 = vpop.permute.xlu0 %3379 }
 0xf41   :  { %3398 = vmatpush.bf16.msra.mxu2 %v3380_v14 }
 0xf45   :  { %3645 = vmatpush.bf16.msrb.mxu2 %v3630_v12 }
 0xf49   :  { %4575 = vmatmul.msk.bf16.vlgmr.msrb.gmra.mxu3 %vm2053_vm1, %v3411_v63  ;;  %4579 = vmatmul.msk.bf16.vlgmr.msra.gmra.mxu1 %vm2053_vm1, %v3535_v52 }
 0xf59   :  { %4576 = vmatmul.msk.bf16.gmra.mxu3 %vm2053_vm1, %v3413_v46  ;;  %4580 = vmatmul.msk.bf16.gmra.mxu1 %vm2053_vm1, %v3537_v7 }
 0xfa6   :  { %v3315_v16 = vpop.f32.mrf.mxu1 }
 0xfa7   :  { %v3325_v53 = vmul.f32 0.25, %v3315_v16 }
 0xfa9   :  { %v6660_v17 = vadd.f32 %v3325_v53, %v6222_v9 }
 0xfab   :  { %v3333_v23 = vsel %vm2093_vm3, %v6660_v17, -inf }
 0xfac   :  { %3334 = vmax.xlane.f32.xlu0 %v3333_v23  ;;  %v3189_v19 = vpop.f32.mrf.mxu3 }
 0xfad   :  { %v3199_v25 = vmul.f32 0.25, %v3189_v19 }
 0xfae   :  { %v3317_v27 = vpop.f32.mrf.mxu1 }
 0xfaf   :  { %v3326_v24 = vmul.f32 0.25, %v3317_v27  ;;  %v6665_v26 = vadd.f32 %v3199_v25, %v6222_v9 }
 0xfb1   :  { %v3207_v54 = vsel %vm2093_vm3, %v6665_v26, -inf  ;;  %v6670_v2 = vadd.f32 %v3326_v24, %v6245_v57 }
 0xfb2   :  { %3208 = vmax.xlane.f32.xlu2 %v3207_v54 }
 0xfb3   :  { %v3336_v34 = vsel %vm2093_vm3, %v6670_v2, -inf }
 0xfb4   :  { %3337 = vmax.xlane.f32.xlu1 %v3336_v34  ;;  %v3191_v32 = vpop.f32.mrf.mxu3 }
 0xfb5   :  { %v3200_v55 = vmul.f32 0.25, %v3191_v32 }
 0xfb6   :  { %v3320_v18 = vpop.f32.mrf.mxu1 }
 0xfb7   :  { %v6675_v37 = vadd.f32 %v3200_v55, %v6245_v57  ;;  %v3327_v15 = vmul.f32 0.25, %v3320_v18 }
 0xfb9   :  { %v6678_v38 = vadd.f32 %v3327_v15, %v6183_v60  ;;  %v3210_v33 = vsel %vm2093_vm3, %v6675_v37, -inf }
 0xfba   :  { %3211 = vmax.xlane.f32.xlu0 %v3210_v33 }
 0xfbb   :  { %v3339_v30 = vsel %vm2093_vm3, %v6678_v38, -inf }
 0xfbc   :  { %v3194_v5 = vpop.f32.mrf.mxu3  ;;  %3340 = vmax.xlane.f32.xlu2 %v3339_v30 }
 0xfbd   :  { %v3201_v42 = vmul.f32 0.25, %v3194_v5 }
 0xfbe   :  { %v3322_v49 = vpop.f32.mrf.mxu1 }
 0xfbf   :  { %v6685_v11 = vadd.f32 %v3201_v42, %v6183_v60  ;;  %v3328_v36 = vmul.f32 0.25, %v3322_v49 }
 0xfc1   :  { %v3213_v45 = vsel %vm2093_vm3, %v6685_v11, -inf  ;;  %v6690_v58 = vadd.f32 %v3328_v36, %v6189_v56 }
 0xfc2   :  { %3214 = vmax.xlane.f32.xlu0 %v3213_v45 }
 0xfc3   :  { %v3342_v61 = vsel %vm2093_vm3, %v6690_v58, -inf }
 0xfc4   :  { %v3196_v28 = vpop.f32.mrf.mxu3  ;;  %3343 = vmax.xlane.f32.xlu1 %v3342_v61 }
 0xfc5   :  { %v3202_v40 = vmul.f32 0.25, %v3196_v28 }
 0xfc6   :  { %v3563_v41 = vpop.f32.mrf.mxu1 }
 0xfc7   :  { %v6695_v62 = vadd.f32 %v3202_v40, %v6189_v56  ;;  %v3573_v4 = vmul.f32 0.25, %v3563_v41 }
 0xfc9   :  { %v6698_v50 = vadd.f32 %v3573_v4, %v6222_v9  ;;  %v3216_v20 = vsel %vm2093_vm3, %v6695_v62, -inf }
 0xfca   :  { %3217 = vmax.xlane.f32.xlu2 %v3216_v20 }
 0xfcb   :  { %v3581_v22 = vsel %vm2093_vm3, %v6698_v50, -inf }
 0xfcc   :  { %v3439_v47 = vpop.f32.mrf.mxu3  ;;  %3582 = vmax.xlane.f32.xlu1 %v3581_v22 }
 0xfcd   :  { %v3449_v48 = vmul.f32 0.25, %v3439_v47 }
 0xfce   :  { %v3565_v0 = vpop.f32.mrf.mxu1 }
 0xfcf   :  { %v6705_v1 = vadd.f32 %v3449_v48, %v6222_v9  ;;  %v3574_v3 = vmul.f32 0.25, %v3565_v0 }
 0xfd1   :  { %v6708_v46 = vadd.f32 %v3574_v3, %v6245_v57  ;;  %v3457_v8 = vsel %vm2093_vm3, %v6705_v1, -inf }
 0xfd2   :  { %3458 = vmax.xlane.f32.xlu2 %v3457_v8 }
 0xfd3   :  { %v3584_v51 = vsel %vm2093_vm3, %v6708_v46, -inf }
 0xfd4   :  { %v3441_v59 = vpop.f32.mrf.mxu3  ;;  %3585 = vmax.xlane.f32.xlu0 %v3584_v51 }
 0xfd5   :  { %v3450_v63 = vmul.f32 0.25, %v3441_v59 }
 0xfd6   :  { %v3568_v6 = vpop.f32.mrf.mxu1 }
 0xfd7   :  { %v6715_v13 = vadd.f32 %v3450_v63, %v6245_v57  ;;  %v3575_v9 = vmul.f32 0.25, %v3568_v6 }
 0xfd9   :  { %v6718_v44 = vadd.f32 %v3575_v9, %v6183_v60  ;;  %v3460_v7 = vsel %vm2093_vm3, %v6715_v13, -inf }
 0xfda   :  { %3461 = vmax.xlane.f32.xlu1 %v3460_v7 }
 0xfdb   :  { %v3587_v52 = vsel %vm2093_vm3, %v6718_v44, -inf }
 0xfdc   :  { %3588 = vmax.xlane.f32.xlu0 %v3587_v52  ;;  %v3444_v14 = vpop.f32.mrf.mxu3 }
 0xfdd   :  { %v3451_v12 = vmul.f32 0.25, %v3444_v14 }
 0xfde   :  { %v3570_v16 = vpop.f32.mrf.mxu1 }
 0xfdf   :  { %v6725_v53 = vadd.f32 %v3451_v12, %v6183_v60  ;;  %v3576_v57 = vmul.f32 0.25, %v3570_v16 }
 0xfe1   :  { %v3463_v23 = vsel %vm2093_vm3, %v6725_v53, -inf  ;;  %v6730_v25 = vadd.f32 %v3576_v57, %v6189_v56 }
 0xfe2   :  { %3464 = vmax.xlane.f32.xlu2 %v3463_v23 }
 0xfe3   :  { %v3590_v54 = vsel %vm2093_vm3, %v6730_v25, -inf }
 0xfe4   :  { %v3446_v19 = vpop.f32.mrf.mxu3 }
 0xfe5   :  { %v3452_v27 = vmul.f32 0.25, %v3446_v19 }
 0xfe7   :  { %v6733_v24 = vadd.f32 %v3452_v27, %v6189_v56 }
 0xfe9   :  { %v3466_v60 = vsel %vm2093_vm3, %v6733_v24, -inf }
 0xfea   :  { %3591 = vmax.xlane.f32.xlu2 %v3590_v54  ;;  %3467 = vmax.xlane.f32.xlu1 %v3466_v60 }
0x101f   :  { %v3335_v34 = vpop.xlane.xlu0 %3334 }
0x1020   :  { %v3345_v32 = vsub.f32 %v6660_v17, %v3335_v34 }
0x1022   :  { %v3349_v55 = vmul.f32 1.442695, %v3345_v32 }
0x1024   :  { %5107 = vpow2.f32 %v3349_v55 }
0x1025   :  { %v3209_v18 = vpop.xlane.xlu2 %3208 }
0x1026   :  { %v3219_v15 = vsub.f32 %v6665_v26, %v3209_v18 }
0x1027   :  { %v3338_v33 = vpop.xlane.xlu1 %3337 }
0x1028   :  { %v3223_v30 = vmul.f32 1.442695, %v3219_v15  ;;  %v3346_v56 = vsub.f32 %v6670_v2, %v3338_v33 }
0x102a   :  { %v6742_v5 = vpop.eup %5107  ;;  %5109 = vpow2.f32 %v3223_v30  ;;  %v3351_v49 = vmul.f32 1.442695, %v3346_v56 }
0x102b   :  { %v3357_v42 = vsel %vm2093_vm3, %v6742_v5, 0.0 }
0x102c   :  { %3358 = vadd.xlane.f32.xlu1 %v3357_v42  ;;  %5111 = vpow2.f32 %v3351_v49 }
0x102d   :  { %v3212_v36 = vpop.xlane.xlu0 %3211 }
0x102e   :  { %v3220_v17 = vsub.f32 %v6675_v37, %v3212_v36 }
0x102f   :  { %v3341_v45 = vpop.xlane.xlu2 %3340 }
0x1030   :  { %v6747_v61 = vpop.eup %5109  ;;  %v3225_v26 = vmul.f32 1.442695, %v3220_v17  ;;  %v3347_v28 = vsub.f32 %v6678_v38, %v3341_v45 }
0x1031   :  { %v3231_v2 = vsel %vm2093_vm3, %v6747_v61, 0.0 }
0x1032   :  { %5113 = vpow2.f32 %v3225_v26  ;;  %3232 = vadd.xlane.f32.xlu0 %v3231_v2  ;;  %v3353_v40 = vmul.f32 1.442695, %v3347_v28  ;;  %v6752_v4 = vpop.eup %5111 }
0x1033   :  { %v3360_v38 = vsel %vm2093_vm3, %v6752_v4, 0.0 }
0x1034   :  { %5115 = vpow2.f32 %v3353_v40 }
0x1035   :  { %v3215_v41 = vpop.xlane.xlu0 %3214 }
0x1036   :  { %v3221_v37 = vsub.f32 %v6685_v11, %v3215_v41 }
0x1037   :  { %v3344_v20 = vpop.xlane.xlu1 %3343 }
0x1038   :  { %v6754_v22 = vpop.eup %5113  ;;  %v3227_v48 = vmul.f32 1.442695, %v3221_v37  ;;  %v3348_v59 = vsub.f32 %v6690_v58, %v3344_v20 }
0x1039   :  { %v3234_v47 = vsel %vm2093_vm3, %v6754_v22, 0.0 }
0x103a   :  { %3235 = vadd.xlane.f32.xlu2 %v3234_v47  ;;  %3361 = vadd.xlane.f32.xlu0 %v3360_v38  ;;  %v6761_v3 = vpop.eup %5115  ;;  %5117 = vpow2.f32 %v3227_v48  ;;  %v3355_v7 = vmul.f32 1.442695, %v3348_v59 }
0x103b   :  { %v3363_v6 = vsel %vm2093_vm3, %v6761_v3, 0.0 }
0x103d   :  { %v3218_v0 = vpop.xlane.xlu2 %3217 }
0x103e   :  { %v3222_v8 = vsub.f32 %v6695_v62, %v3218_v0 }
0x103f   :  { %v3583_v51 = vpop.xlane.xlu1 %3582 }
0x1040   :  { %v3229_v63 = vmul.f32 1.442695, %v3222_v8  ;;  %v3593_v11 = vsub.f32 %v6698_v50, %v3583_v51  ;;  %v6768_v14 = vpop.eup %5117 }
0x1041   :  { %v3237_v58 = vsel %vm2093_vm3, %v6768_v14, 0.0 }
0x1042   :  { %5119 = vpow2.f32 %v3229_v63  ;;  %v3597_v9 = vmul.f32 1.442695, %v3593_v11  ;;  %3364 = vadd.xlane.f32.xlu2 %v3363_v6 }
0x1044   :  { %5121 = vpow2.f32 %v3597_v9 }
0x1045   :  { %v3459_v52 = vpop.xlane.xlu2 %3458  ;;  %5123 = vpow2.f32 %v3355_v7 }
0x1046   :  { %v3469_v62 = vsub.f32 %v6705_v1, %v3459_v52 }
0x1047   :  { %v3586_v19 = vpop.xlane.xlu0 %3585 }
0x1048   :  { %v6770_v12 = vpop.eup %5119  ;;  %v3473_v23 = vmul.f32 1.442695, %v3469_v62  ;;  %v3594_v1 = vsub.f32 %v6708_v46, %v3586_v19 }
0x1049   :  { %v3240_v50 = vsel %vm2093_vm3, %v6770_v12, 0.0 }
0x104a   :  { %v6777_v16 = vpop.eup %5121  ;;  %3238 = vadd.xlane.f32.xlu2 %v3237_v58  ;;  %3241 = vadd.xlane.f32.xlu0 %v3240_v50  ;;  %5125 = vpow2.f32 %v3473_v23  ;;  %v3599_v60 = vmul.f32 1.442695, %v3594_v1 }
0x104b   :  { %v3605_v57 = vsel %vm2093_vm3, %v6777_v16, 0.0  ;;  %v6781_v27 = vpop.eup %5123 }
0x104c   :  { %3606 = vadd.xlane.f32.xlu1 %v3605_v57  ;;  %v3366_v54 = vsel %vm2093_vm3, %v6781_v27, 0.0  ;;  %5127 = vpow2.f32 %v3599_v60 }
0x104d   :  { %v3462_v34 = vpop.xlane.xlu1 %3461 }
0x104e   :  { %v3470_v55 = vsub.f32 %v6715_v13, %v3462_v34 }
0x104f   :  { %v3589_v56 = vpop.xlane.xlu0 %3588 }
0x1050   :  { %v6786_v32 = vpop.eup %5125  ;;  %v3475_v15 = vmul.f32 1.442695, %v3470_v55  ;;  %v3595_v42 = vsub.f32 %v6718_v44, %v3589_v56 }
0x1051   :  { %v3481_v18 = vsel %vm2093_vm3, %v6786_v32, 0.0 }
0x1052   :  { %3367 = vadd.xlane.f32.xlu2 %v3366_v54  ;;  %v6791_v33 = vpop.eup %5127  ;;  %5129 = vpow2.f32 %v3475_v15  ;;  %v3601_v49 = vmul.f32 1.442695, %v3595_v42 }
0x1053   :  { %v3608_v46 = vsel %vm2093_vm3, %v6791_v33, 0.0 }
0x1054   :  { %5131 = vpow2.f32 %v3601_v49 }
0x1055   :  { %v3465_v36 = vpop.xlane.xlu2 %3464 }
0x1056   :  { %v3471_v45 = vsub.f32 %v6725_v53, %v3465_v36 }
0x1058   :  { %v6799_v30 = vpop.eup %5129  ;;  %v3477_v28 = vmul.f32 1.442695, %v3471_v45 }
0x1059   :  { %v3484_v13 = vsel %vm2093_vm3, %v6799_v30, 0.0 }
0x105a   :  { %3482 = vadd.xlane.f32.xlu2 %v3481_v18  ;;  %5133 = vpow2.f32 %v3477_v28 }
0x105d   :  { %v3468_v17 = vpop.xlane.xlu1 %3467 }
0x105e   :  { %3627 = vrot.lane.b32.xlu0 %v6617_v35, %s5248_s8  ;;  %v3472_v26 = vsub.f32 %v6733_v24, %v3468_v17 }
0x1060   :  { %v3479_v2 = vmul.f32 1.442695, %v3472_v26 }
0x1062   :  { %3609 = vadd.xlane.f32.xlu2 %v3608_v46  ;;  %5135 = vpow2.f32 %v3479_v2 }
0x1065   :  { %3505 = vrot.lane.b32.xlu1 %v6620_v39, %s5247_s28  ;;  %v6808_v39 = vpop.eup %5131 }
0x1066   :  { %v3611_v44 = vsel %vm2093_vm3, %v6808_v39, 0.0  ;;  %v6812_v40 = vpop.eup %5133 }
0x1067   :  { %v3487_v53 = vsel %vm2093_vm3, %v6812_v40, 0.0 }
0x1068   :  { %v6814_v41 = vpop.eup %5135 }
0x1069   :  { %v3490_v24 = vsel %vm2093_vm3, %v6814_v41, 0.0 }
0x106a   :  { %3485 = vadd.xlane.f32.xlu2 %v3484_v13 }
0x1082   :  { %3503 = vrot.lane.b32.xlu2 %v6617_v35, %s5247_s28  ;;  %v3592_v35 = vpop.xlane.xlu2 %3591 }
0x1083   :  { %v3596_v20 = vsub.f32 %v6730_v25, %v3592_v35 }
0x1085   :  { %v3603_v37 = vmul.f32 1.442695, %v3596_v20 }
0x1087   :  { %5137 = vpow2.f32 %v3603_v37 }
0x1088   :  { %3612 = vadd.xlane.f32.xlu0 %v3611_v44 }
0x108d   :  { %v6821_v38 = vpop.eup %5137 }
0x108e   :  { %v3614_v0 = vsel %vm2093_vm3, %v6821_v38, 0.0 }
0x108f   :  { %3488 = vadd.xlane.f32.xlu1 %v3487_v53 }
0x1090   :  { %3491 = vadd.xlane.f32.xlu0 %v3490_v24 }
0x109f   :  { %v3359_v48 = vpop.xlane.xlu1 %3358 }
0x10a5   :  { %v3233_v47 = vpop.xlane.xlu0 %3232 }
0x10a6   :  { %5139 = vrcp.f32 %v3233_v47 }
0x10a7   :  { %5141 = vrcp.f32 %v3359_v48 }
0x10ab   :  { %3615 = vadd.xlane.f32.xlu2 %v3614_v0 }
0x10ac   :  { %v5140_v59 = vpop.eup %5139 }
0x10ad   :  { %v3236_v8 = vpop.xlane.xlu2 %3235  ;;  %v3362_v51 = vpop.xlane.xlu0 %3361  ;;  %v3247_v6 = vmul.f32 %v5140_v59, %v6747_v61 }
0x10ae   :  { %5143 = vrcp.f32 %v3236_v8  ;;  %v5142_v63 = vpop.eup %5141 }
0x10af   :  { %5145 = vrcp.f32 %v3362_v51  ;;  %v3373_v52 = vmul.f32 %v5142_v63, %v6742_v5 }
0x10b4   :  { %v5144_v11 = vpop.eup %5143 }
0x10b5   :  { %v5146_v25 = vpop.eup %5145  ;;  %v3248_v9 = vmul.f32 %v5144_v11, %v6754_v22  ;;  %v3365_v7 = vpop.xlane.xlu2 %3364 }
0x10b6   :  { %v3374_v62 = vmul.f32 %v5146_v25, %v6752_v4 }
0x10b7   :  { %v3251_v58 = vpack.c.bf16 %v3248_v9, %v3247_v6 }
0x10b8   :  { %v3377_v50 = vpack.c.bf16 %v3374_v62, %v3373_v52 }
0x10b9   :  { %4569 = vmatmul.msk.bf16.vlgmr.msrb.gmra.mxu0 %vm2093_vm3, %v3251_v58 }
0x10ba   :  { %4573 = vmatmul.msk.bf16.vlgmr.msra.gmra.mxu2 %vm2093_vm3, %v3377_v50 }
0x10bd   :  { %v3239_v57 = vpop.xlane.xlu2 %3238  ;;  %v3242_v23 = vpop.xlane.xlu0 %3241 }
0x10be   :  { %5147 = vrcp.f32 %v3239_v57 }
0x10bf   :  { %5149 = vrcp.f32 %v3242_v23  ;;  %v3607_v15 = vpop.xlane.xlu1 %3606 }
0x10c0   :  { %5151 = vrcp.f32 %v3365_v7 }
0x10c4   :  { %v5148_v19 = vpop.eup %5147 }
0x10c5   :  { %v5150_v61 = vpop.eup %5149  ;;  %v3249_v22 = vmul.f32 %v5148_v19, %v6768_v14  ;;  %v3368_v1 = vpop.xlane.xlu2 %3367 }
0x10c6   :  { %v3250_v5 = vmul.f32 %v5150_v61, %v6770_v12  ;;  %5153 = vrcp.f32 %v3368_v1  ;;  %v5152_v54 = vpop.eup %5151  ;;  %v4773_v1 = vld [vmem:[%s7025_s14 + $0x30] sm:$0xff] }
0x10c7   :  { %v3375_v34 = vmul.f32 %v5152_v54, %v6761_v3  ;;  %5155 = vrcp.f32 %v3607_v15 }
0x10c8   :  { %v3252_v4 = vpack.c.bf16 %v3250_v5, %v3249_v22  ;;  %v4774_v22 = vld [vmem:[%s7025_s14 + $0x38] sm:$0xff] }
0x10c9   :  { %3768 = vmatpush.bf16.msra.mxu3 %v4774_v22 }
0x10ca   :  { %4570 = vmatmul.msk.bf16.gmra.mxu0 %vm2093_vm3, %v3252_v4 }
0x10cc   :  { %v5154_v60 = vpop.eup %5153 }
0x10cd   :  { %v3376_v55 = vmul.f32 %v5154_v60, %v6781_v27  ;;  %v3483_v18 = vpop.xlane.xlu2 %3482  ;;  %v5156_v56 = vpop.eup %5155  ;;  %3769 = vmatpush.bf16.msra.mxu3 %v4773_v1  ;;  %v4772_v60 = vld [vmem:[%s7025_s14 + $0x28] sm:$0xff] }
0x10ce   :  { %v3621_v49 = vmul.f32 %v5156_v56, %v6777_v16 }
0x10cf   :  { %v3378_v46 = vpack.c.bf16 %v3376_v55, %v3375_v34  ;;  %v4771_v34 = vld [vmem:[%s7025_s14 + $0x20] sm:$0xff] }
0x10d0   :  { %v3628_v13 = vpop.permute.xlu0 %3627 }
0x10d1   :  { %4574 = vmatmul.msk.bf16.gmra.mxu2 %vm2093_vm3, %v3378_v46  ;;  %3770 = vmatpush.bf16.msra.mxu3 %v4772_v60 }
0x10d2   :  { %3646 = vmatpush.bf16.msrb.mxu2 %v3628_v13 }
0x10d5   :  { %v3610_v14 = vpop.xlane.xlu2 %3609  ;;  %3771 = vmatpush.bf16.msra.mxu3 %v4771_v34 }
0x10d6   :  { %5157 = vrcp.f32 %v3610_v14 }
0x10d7   :  { %v3506_v12 = vpop.permute.xlu1 %3505  ;;  %5159 = vrcp.f32 %v3483_v18 }
0x10d8   :  { %3521 = vmatpush.bf16.msra.mxu0 %v3506_v12 }
0x10dc   :  { %v5158_v42 = vpop.eup %5157 }
0x10dd   :  { %v3622_v3 = vmul.f32 %v5158_v42, %v6791_v33  ;;  %v3486_v27 = vpop.xlane.xlu2 %3485  ;;  %v5160_v17 = vpop.eup %5159 }
0x10de   :  { %5161 = vrcp.f32 %v3486_v27  ;;  %v3497_v26 = vmul.f32 %v5160_v17, %v6786_v32 }
0x10df   :  { %v3625_v36 = vpack.c.bf16 %v3622_v3, %v3621_v49 }
0x10e1   :  { %4581 = vmatmul.msk.bf16.vlgmr.msrb.gmra.mxu2 %vm2093_vm3, %v3625_v36 }
0x10e4   :  { %v5162_v45 = vpop.eup %5161 }
0x10e5   :  { %v3498_v28 = vmul.f32 %v5162_v45, %v6799_v30  ;;  %v3504_v2 = vpop.permute.xlu2 %3503 }
0x10e6   :  { %3522 = vmatpush.bf16.msra.mxu0 %v3504_v2 }
0x10e7   :  { %v3501_v44 = vpack.c.bf16 %v3498_v28, %v3497_v26 }
0x10e9   :  { %4577 = vmatmul.msk.bf16.vlgmr.msra.gmra.mxu0 %vm2093_vm3, %v3501_v44 }
0x10fb   :  { %v3613_v53 = vpop.xlane.xlu0 %3612 }
0x1102   :  { %v3489_v16 = vpop.xlane.xlu1 %3488 }
0x1103   :  { %5163 = vrcp.f32 %v3489_v16  ;;  %v3492_v33 = vpop.xlane.xlu0 %3491 }
0x1104   :  { %5165 = vrcp.f32 %v3492_v33 }
0x1105   :  { %5167 = vrcp.f32 %v3613_v53 }
0x1109   :  { %v5164_v24 = vpop.eup %5163 }
0x110a   :  { %v5166_v35 = vpop.eup %5165  ;;  %v3499_v20 = vmul.f32 %v5164_v24, %v6812_v40 }
0x110b   :  { %v3500_v37 = vmul.f32 %v5166_v35, %v6814_v41  ;;  %v5168_v30 = vpop.eup %5167 }
0x110c   :  { %v3623_v0 = vmul.f32 %v5168_v30, %v6808_v39 }
0x110d   :  { %v3502_v47 = vpack.c.bf16 %v3500_v37, %v3499_v20 }
0x110f   :  { %4578 = vmatmul.msk.bf16.gmra.mxu0 %vm2093_vm3, %v3502_v47 }
0x111e   :  { %v3616_v32 = vpop.xlane.xlu2 %3615 }
0x111f   :  { %5169 = vrcp.f32 %v3616_v32 }
0x1125   :  { %v5170_v48 = vpop.eup %5169 }
0x1126   :  { %v3624_v8 = vmul.f32 %v5170_v48, %v6821_v38 }
0x1128   :  { %v3626_v51 = vpack.c.bf16 %v3624_v8, %v3623_v0 }
0x112a   :  { %4582 = vmatmul.msk.bf16.gmra.mxu2 %vm2093_vm3, %v3626_v51  ;;  %v5018_v51 = vld [vmem:[%s7026_s15 + $0x1] ss:$0 sm:$0xff] }
0x1136   :  { %v3276_v63 = vpop.f32.mrf.mxu0 }
0x113d   :  { %v3400_v59 = vpop.f32.mrf.mxu2 }
0x113e   :  { %v3278_v41 = vpop.f32.mrf.mxu0 }
0x1145   :  { %v3402_v40 = vpop.f32.mrf.mxu2 }
0x1146   :  { %v4976_v11 = vpack.i.bf16 %v3402_v40, %v3400_v59 }
0x1147   :  { %v3281_v25 = vpop.f32.mrf.mxu0 }
0x1148   :  { %4977 = vrot.lane.b32.xlu2 %v4976_v11, %s5245_s7 }
0x114f   :  { %v3283_v52 = vpop.f32.mrf.mxu0 }
0x1154   :  { %v3405_v6 = vpop.f32.mrf.mxu2 }
0x115c   :  { %v3407_v9 = vpop.f32.mrf.mxu2 }
0x115d   :  { %v4991_v7 = vpack.i.bf16 %v3407_v9, %v3405_v6 }
0x115f   :  { %4992 = vrot.lane.b32.xlu2 %v4991_v7, %s5245_s7 }
0x1164   :  { %v3648_v39 = vpop.f32.mrf.mxu2 }
0x1166   :  { %v3524_v62 = vpop.f32.mrf.mxu0 }
0x116c   :  { %v3650_v38 = vpop.f32.mrf.mxu2 }
0x116d   :  { %v4986_v58 = vpack.i.bf16 %v3650_v38, %v3648_v39 }
0x116e   :  { %v3526_v50 = vpop.f32.mrf.mxu0 }
0x116f   :  { %v4981_v57 = vpack.i.bf16 %v3526_v50, %v3524_v62  ;;  %4987 = vrot.lane.b32.xlu0 %v4986_v58, %s5243_s26 }
0x1171   :  { %4982 = vrot.lane.b32.xlu1 %v4981_v57, %s5246_s30 }
0x118c   :  { %v3529_v23 = vpop.f32.mrf.mxu0 }
0x1194   :  { %v3531_v19 = vpop.f32.mrf.mxu0 }
0x1195   :  { %v4996_v61 = vpack.i.bf16 %v3531_v19, %v3529_v23 }
0x1197   :  { %4997 = vrot.lane.b32.xlu0 %v4996_v61, %s5246_s30 }
0x11a2   :  { %v4978_v55 = vpop.permute.xlu2 %4977 }
0x11a3   :  { %v4980_v18 = vunpack.i.h.bf16 %v4978_v55  ;;  %v4979_v15 = vunpack.i.l.bf16 %v4978_v55 }
0x11a5   :  { %v3707_v56 = vsel %vm2053_vm1, %v3278_v41, %v4980_v18  ;;  %v3706_v42 = vsel %vm2053_vm1, %v3276_v63, %v4979_v15 }
0x11ad   :  { %v3653_v5 = vpop.f32.mrf.mxu2 }
0x11b5   :  { %v3655_v4 = vpop.f32.mrf.mxu2 }
0x11b6   :  { %v5001_v54 = vpack.i.bf16 %v3655_v4, %v3653_v5 }
0x11b8   :  { %5002 = vrot.lane.b32.xlu1 %v5001_v54, %s5243_s26 }
0x11b9   :  { %v4993_v28 = vpop.permute.xlu2 %4992 }
0x11ba   :  { %v4995_v44 = vunpack.i.h.bf16 %v4993_v28  ;;  %v4994_v53 = vunpack.i.l.bf16 %v4993_v28 }
0x11bc   :  { %v3709_v35 = vsel %vm2053_vm1, %v3283_v52, %v4995_v44  ;;  %v3708_v20 = vsel %vm2053_vm1, %v3281_v25, %v4994_v53 }
0x11e1   :  { %v4988_v46 = vpop.permute.xlu0 %4987 }
0x11e2   :  { %v4990_v49 = vunpack.i.h.bf16 %v4988_v46  ;;  %v4989_v3 = vunpack.i.l.bf16 %v4988_v46 }
0x11e3   :  { %v4983_v13 = vpop.permute.xlu1 %4982 }
0x11e4   :  { %v4985_v14 = vunpack.i.h.bf16 %v4983_v13  ;;  %v4984_v12 = vunpack.i.l.bf16 %v4983_v13 }
0x11e6   :  { %v3711_v27 = vsel %vm2093_vm3, %v3707_v56, %v4985_v14  ;;  %v3710_v36 = vsel %vm2093_vm3, %v3706_v42, %v4984_v12  ;;  %v4778_v12 = vld [vmem:[%s7027_s16 + $0x38] sm:$0xff]  ;;  %v4777_v56 = vld [vmem:[%s7027_s16 + $0x30] sm:$0xff]  ;;  %v4776_v42 = vld [vmem:[%s7027_s16 + $0x28] sm:$0xff] }
0x11e7   :  { %v3715_v17 = vsel %vm2601_vm7, %v3711_v27, %v4990_v49  ;;  %v3714_v45 = vsel %vm2601_vm7, %v3710_v36, %v4989_v3  ;;  %3943 = vmatpush.bf16.msrb.mxu0 %v4778_v12  ;;  %v4775_v36 = vld [vmem:[%s7027_s16 + $0x20] sm:$0xff] }
0x11e8   :  { %v3718_v26 = vpack.c.bf16 %v3715_v17, %v3714_v45 }
0x11ea   :  { %4608 = vmatmul.msk.bf16.vlgmr.msra.gmra.mxu3 %vm96_vm12, %v3718_v26 }
0x11eb   :  { %3944 = vmatpush.bf16.msrb.mxu0 %v4777_v56 }
0x11ef   :  { %3945 = vmatpush.bf16.msrb.mxu0 %v4776_v42 }
0x11f3   :  { %3946 = vmatpush.bf16.msrb.mxu0 %v4775_v36  ;;  %v5021_v36 = vld [vmem:[%s7028_s17 + $0x1] ss:$0 sm:$0xff] }
0x1209   :  { %v4998_v2 = vpop.permute.xlu0 %4997 }
0x120a   :  { %v5000_v16 = vunpack.i.h.bf16 %v4998_v2  ;;  %v4999_v33 = vunpack.i.l.bf16 %v4998_v2 }
0x120c   :  { %v3713_v32 = vsel %vm2093_vm3, %v3709_v35, %v5000_v16  ;;  %v3712_v30 = vsel %vm2093_vm3, %v3708_v20, %v4999_v33 }
0x122a   :  { %v5003_v24 = vpop.permute.xlu1 %5002 }
0x122b   :  { %v5005_v37 = vunpack.i.h.bf16 %v5003_v24  ;;  %v5004_v47 = vunpack.i.l.bf16 %v5003_v24 }
0x122d   :  { %v3717_v48 = vsel %vm2601_vm7, %v3713_v32, %v5005_v37  ;;  %v3716_v0 = vsel %vm2601_vm7, %v3712_v30, %v5004_v47  ;;  %v5019_v30 = vld [vmem:[%s7031_s20 + $0x1] ss:$0 sm:$0xff] }
0x122e   :  { %v3719_v8 = vpack.c.bf16 %v3717_v48, %v3716_v0 }
0x1230   :  { %4609 = vmatmul.msk.bf16.gmra.mxu3 %vm96_vm12, %v3719_v8 }
0x126d   :  { %v3773_v59 = vpop.f32.mrf.mxu3 }
0x126e   :  { %v3774_v63 = vadd.f32 %v5018_v51, %v3773_v59 }
0x1270   :  { %v3783_v40 = vadd.f32 %v3774_v63, %v6594_v21 }
0x1272   :  { %v3787_v11 = vsel %vm96_vm12, %v3783_v40, 0.0 }
0x1273   :  { %3788 = vadd.xlane.f32.xlu2 %v3787_v11 }
0x1275   :  { %v3775_v41 = vpop.f32.mrf.mxu3 }
0x1276   :  { %v3776_v25 = vadd.f32 %v5018_v51, %v3775_v41 }
0x1278   :  { %v3784_v6 = vadd.f32 %v3776_v25, %v6596_v31 }
0x127a   :  { %v3790_v9 = vsel %vm96_vm12, %v3784_v6, 0.0 }
0x127b   :  { %3791 = vadd.xlane.f32.xlu0 %v3790_v9 }
0x12b3   :  { %v3778_v7 = vpop.f32.mrf.mxu3 }
0x12b4   :  { %v3779_v52 = vadd.f32 %v5018_v51, %v3778_v7 }
0x12b6   :  { %v3785_v39 = vadd.f32 %v3779_v52, %v6605_v43  ;;  %v4786_v52 = vld [vmem:[%s7029_s18 + $0x78] sm:$0xff] }
0x12b7   :  { %4034 = vmatpush.bf16.msrb.mxu1 %v4786_v52 }
0x12b8   :  { %v3793_v62 = vsel %vm96_vm12, %v3785_v39, 0.0 }
0x12b9   :  { %3794 = vadd.xlane.f32.xlu1 %v3793_v62 }
0x12bb   :  { %v3780_v38 = vpop.f32.mrf.mxu3 }
0x12bc   :  { %v3781_v58 = vadd.f32 %v5018_v51, %v3780_v38  ;;  %v5020_v51 = vld [vmem:[%s7032_s21 + $0x1] ss:$0 sm:$0xff]  ;;  %v4785_v38 = vld [vmem:[%s7029_s18 + $0x70] sm:$0xff] }
0x12bd   :  { %4035 = vmatpush.bf16.msrb.mxu1 %v4785_v38 }
0x12be   :  { %v3786_v21 = vadd.f32 %v3781_v58, %v6608_v10 }
0x12c0   :  { %v3796_v50 = vsel %vm96_vm12, %v3786_v21, 0.0 }
0x12c1   :  { %3797 = vadd.xlane.f32.xlu2 %v3796_v50 }
0x12e6   :  { %v3789_v57 = vpop.xlane.xlu2 %3788 }
0x12e7   :  { %v3799_v31 = vmul.f32 %v3789_v57, %v6426_v29  ;;  %v4784_v57 = vld [vmem:[%s7029_s18 + $0x68] sm:$0xff] }
0x12e8   :  { %4036 = vmatpush.bf16.msrb.mxu1 %v4784_v57 }
0x12e9   :  { %v3803_v23 = vsub.f32 %v3783_v40, %v3799_v31 }
0x12eb   :  { %v3807_v19 = vmul.f32 %v3803_v23, %v3803_v23 }
0x12ed   :  { %v3811_v61 = vsel %vm96_vm12, %v3807_v19, 0.0  ;;  %v4783_v19 = vld [vmem:[%s7029_s18 + $0x60] sm:$0xff] }
0x12ee   :  { %v3792_v22 = vpop.xlane.xlu0 %3791  ;;  %3812 = vadd.xlane.f32.xlu0 %v3811_v61  ;;  %4037 = vmatpush.bf16.msrb.mxu1 %v4783_v19 }
0x12ef   :  { %v3800_v43 = vmul.f32 %v3792_v22, %v6426_v29 }
0x12f1   :  { %v3804_v1 = vsub.f32 %v3784_v6, %v3800_v43 }
0x12f3   :  { %v3808_v5 = vmul.f32 %v3804_v1, %v3804_v1 }
0x12f5   :  { %v3814_v4 = vsel %vm96_vm12, %v3808_v5, 0.0 }
0x12f6   :  { %3815 = vadd.xlane.f32.xlu1 %v3814_v4 }
0x132c   :  { %v3795_v10 = vpop.xlane.xlu1 %3794 }
0x132d   :  { %v3801_v54 = vmul.f32 %v3795_v10, %v6426_v29 }
0x132f   :  { %v6897_v60 = vsub.f32 %v3785_v39, %v3801_v54 }
0x1331   :  { %v3809_v34 = vmul.f32 %v6897_v60, %v6897_v60 }
0x1333   :  { %v3817_v55 = vsel %vm96_vm12, %v3809_v34, 0.0 }
0x1334   :  { %3818 = vadd.xlane.f32.xlu2 %v3817_v55  ;;  %v3798_v18 = vpop.xlane.xlu2 %3797 }
0x1335   :  { %v3802_v15 = vmul.f32 %v3798_v18, %v6426_v29 }
0x1337   :  { %v6903_v46 = vsub.f32 %v3786_v21, %v3802_v15 }
0x1339   :  { %v3810_v13 = vmul.f32 %v6903_v46, %v6903_v46 }
0x133b   :  { %v3820_v14 = vsel %vm96_vm12, %v3810_v13, 0.0 }
0x133c   :  { %3821 = vadd.xlane.f32.xlu0 %v3820_v14 }
0x1361   :  { %v3813_v49 = vpop.xlane.xlu0 %3812 }
0x1362   :  { %v3823_v3 = vmul.f32 %v3813_v49, %v6426_v29  ;;  %v4782_v49 = vld [vmem:[%s7029_s18 + $0x58] sm:$0xff] }
0x1363   :  { %4038 = vmatpush.bf16.msrb.mxu1 %v4782_v49 }
0x1364   :  { %v3827_v27 = vadd.f32 1e-05, %v3823_v3  ;;  %v4779_v3 = vld [vmem:[%s7029_s18 + $0x40] sm:$0xff] }
0x1366   :  { %5171 = vrsqrt.f32 %v3827_v27  ;;  %vm3837_vm3 = vweird.f32 %v3827_v27 }
0x1369   :  { %v3816_v17 = vpop.xlane.xlu1 %3815 }
0x136a   :  { %v3824_v45 = vmul.f32 %v3816_v17, %v6426_v29 }
0x136c   :  { %v5172_v26 = vpop.eup %5171  ;;  %v3828_v28 = vadd.f32 1e-05, %v3824_v45 }
0x136d   :  { %v3832_v2 = vmul.f32 %v5172_v26, %v3827_v27  ;;  %vm3838_vm1 = vweird.f32 %v5172_v26 }
0x136e   :  { %5173 = vrsqrt.f32 %v3828_v28  ;;  %vm3839_vm7 = vmor %vm3837_vm3, %vm3838_vm1  ;;  %vm3847_vm10 = vweird.f32 %v3828_v28 }
0x136f   :  { %v3833_v44 = vmul.f32 %v5172_v26, %v3832_v2 }
0x1371   :  { %v3834_v53 = vmul.f32 0.5, %v3833_v44 }
0x1373   :  { %v3835_v16 = vsub.f32 1.5, %v3834_v53 }
0x1374   :  { %v5174_v33 = vpop.eup %5173 }
0x1375   :  { %v3836_v24 = vmul.f32 %v5172_v26, %v3835_v16  ;;  %v3842_v35 = vmul.f32 %v5174_v33, %v3828_v28  ;;  %vm3848_vm9 = vweird.f32 %v5174_v33 }
0x1376   :  { %vm3849_vm11 = vmor %vm3847_vm10, %vm3848_vm9 }
0x1377   :  { %v3843_v20 = vmul.f32 %v5174_v33, %v3842_v35  ;;  %v3840_v37 = vsel %vm3839_vm7, %v5172_v26, %v3836_v24 }
0x1378   :  { %v3871_v48 = vmul.f32 %v3840_v37, %v3803_v23 }
0x1379   :  { %v3844_v47 = vmul.f32 0.5, %v3843_v20 }
0x137a   :  { %v3880_v59 = vmul.f32 %v5019_v30, %v3871_v48 }
0x137b   :  { %v3845_v32 = vsub.f32 1.5, %v3844_v47  ;;  %v5022_v47 = vld [vmem:[%s7030_s19 + $0x1] ss:$0 sm:$0xff] }
0x137c   :  { %v6928_v11 = vadd.f32 %v5020_v51, %v3880_v59 }
0x137d   :  { %v3846_v0 = vmul.f32 %v5174_v33, %v3845_v32 }
0x137f   :  { %v3850_v8 = vsel %vm3849_vm11, %v5174_v33, %v3846_v0 }
0x1380   :  { %v3872_v63 = vmul.f32 %v3850_v8, %v3804_v1 }
0x1382   :  { %v3881_v40 = vmul.f32 %v5019_v30, %v3872_v63 }
0x1384   :  { %v6930_v41 = vadd.f32 %v5020_v51, %v3881_v40 }
0x1386   :  { %v3893_v25 = vpack.c.bf16 %v6930_v41, %v6928_v11 }
0x1388   :  { %4637 = vmatmul.msk.bf16.vlgmr.msrb.gmra.mxu0 %vm96_vm12, %v3893_v25 }
0x13a7   :  { %v3819_v6 = vpop.xlane.xlu2 %3818 }
0x13a8   :  { %v3825_v9 = vmul.f32 %v3819_v6, %v6426_v29 }
0x13aa   :  { %v3829_v7 = vadd.f32 1e-05, %v3825_v9 }
0x13ac   :  { %5175 = vrsqrt.f32 %v3829_v7  ;;  %vm3857_vm14 = vweird.f32 %v3829_v7 }
0x13af   :  { %v3822_v39 = vpop.xlane.xlu0 %3821 }
0x13b0   :  { %v3826_v62 = vmul.f32 %v3822_v39, %v6426_v29 }
0x13b2   :  { %v5176_v58 = vpop.eup %5175  ;;  %v3830_v21 = vadd.f32 1e-05, %v3826_v62 }
0x13b3   :  { %v3852_v50 = vmul.f32 %v5176_v58, %v3829_v7  ;;  %vm3858_vm13 = vweird.f32 %v5176_v58 }
0x13b4   :  { %5177 = vrsqrt.f32 %v3830_v21  ;;  %vm3859_vm15 = vmor %vm3857_vm14, %vm3858_vm13  ;;  %vm3867_vm2 = vweird.f32 %v3830_v21 }
0x13b5   :  { %v3853_v31 = vmul.f32 %v5176_v58, %v3852_v50 }
0x13b7   :  { %v3854_v23 = vmul.f32 0.5, %v3853_v31 }
0x13b9   :  { %v3855_v61 = vsub.f32 1.5, %v3854_v23 }
0x13ba   :  { %v5178_v22 = vpop.eup %5177 }
0x13bb   :  { %v3856_v43 = vmul.f32 %v5176_v58, %v3855_v61  ;;  %v3862_v1 = vmul.f32 %v5178_v22, %v3830_v21  ;;  %vm3868_vm0 = vweird.f32 %v5178_v22 }
0x13bc   :  { %vm3869_vm4 = vmor %vm3867_vm2, %vm3868_vm0  ;;  %vm4168_vm0 = vcmask 517120  }
0x13bd   :  { %v3863_v5 = vmul.f32 %v5178_v22, %v3862_v1  ;;  %v3860_v4 = vsel %vm3859_vm15, %v5176_v58, %v3856_v43 }
0x13be   :  { %v3873_v34 = vmul.f32 %v3860_v4, %v6897_v60  ;;  %v4781_v60 = vld [vmem:[%s7029_s18 + $0x50] sm:$0xff] }
0x13bf   :  { %v3864_v10 = vmul.f32 0.5, %v3863_v5  ;;  %4039 = vmatpush.bf16.msrb.mxu1 %v4781_v60 }
0x13c0   :  { %v3882_v13 = vmul.f32 %v5019_v30, %v3873_v34 }
0x13c1   :  { %v3865_v54 = vsub.f32 1.5, %v3864_v10 }
0x13c2   :  { %v3891_v12 = vadd.f32 %v5020_v51, %v3882_v13 }
0x13c3   :  { %v3866_v55 = vmul.f32 %v5178_v22, %v3865_v54 }
0x13c5   :  { %v3870_v18 = vsel %vm3869_vm4, %v5178_v22, %v3866_v55 }
0x13c6   :  { %v3874_v15 = vmul.f32 %v3870_v18, %v6903_v46  ;;  %v4780_v46 = vld [vmem:[%s7029_s18 + $0x48] sm:$0xff] }
0x13c7   :  { %4040 = vmatpush.bf16.msrb.mxu1 %v4780_v46 }
0x13c8   :  { %v3883_v14 = vmul.f32 %v5019_v30, %v3874_v15 }
0x13ca   :  { %v3892_v56 = vadd.f32 %v5020_v51, %v3883_v14 }
0x13cb   :  { %4041 = vmatpush.bf16.msrb.mxu1 %v4779_v3 }
0x13cc   :  { %v3894_v42 = vpack.c.bf16 %v3892_v56, %v3891_v12 }
0x13ce   :  { %4638 = vmatmul.msk.bf16.gmra.mxu0 %vm96_vm12, %v3894_v42 }
0x1405   :  { %v3948_v27 = vpop.f32.mrf.mxu0 }
0x1406   :  { %v3949_v17 = vadd.f32 %v5021_v36, %v3948_v27 }
0x1408   :  { %v3958_v28 = vmax.f32 %v3949_v17, 0.0 }
0x140d   :  { %v3950_v45 = vpop.f32.mrf.mxu0 }
0x140e   :  { %v3951_v26 = vadd.f32 %v5021_v36, %v3950_v45  ;;  %v5023_v45 = vld [vmem:[%s7033_s22 + $0x1] ss:$0 sm:$0xff]  ;;  %s5250_s22 = smov [#allocation4]  }
0x1410   :  { %v3959_v2 = vmax.f32 %v3951_v26, 0.0 }
0x1412   :  { %v3962_v44 = vpack.c.bf16 %v3959_v2, %v3958_v28  ;;  %v5024_v2 = vld [vmem:[%s7034_s23 + $0x1] ss:$0 sm:$0xff]  ;;  %s4175_s23 = sshll.u32 %s5250_s22, 4  ;;  %s4176_s23 = int_to_ptr.vmem [resolvable:$true] %s4175_s23 }
0x1414   :  { %4042 = vmatmul.bf16.vlgmr.msrb.gmra.mxu1 %v3962_v44 }
0x144b   :  { %v3953_v53 = vpop.f32.mrf.mxu0 }
0x144c   :  { %v3954_v16 = vadd.f32 %v5021_v36, %v3953_v53 }
0x144e   :  { %v3960_v35 = vmax.f32 %v3954_v16, 0.0 }
0x1453   :  { %v3955_v33 = vpop.f32.mrf.mxu0 }
0x1454   :  { %v3956_v24 = vadd.f32 %v5021_v36, %v3955_v33 }
0x1456   :  { %v3961_v20 = vmax.f32 %v3956_v24, 0.0 }
0x1458   :  { %v3963_v37 = vpack.c.bf16 %v3961_v20, %v3960_v35 }
0x145a   :  { %4047 = vmatmul.bf16.gmra.mxu1 %v3963_v37 }
0x1491   :  { %v4043_v32 = vpop.f32.mrf.mxu1 }
0x1492   :  { %v4044_v30 = vadd.f32 %v5022_v47, %v4043_v32 }
0x1494   :  { %v4053_v48 = vadd.f32 %v4044_v30, %v6928_v11 }
0x1496   :  { %v4057_v0 = vsel %vm96_vm12, %v4053_v48, 0.0 }
0x1497   :  { %4058 = vadd.xlane.f32.xlu1 %v4057_v0 }
0x1499   :  { %v4045_v8 = vpop.f32.mrf.mxu1 }
0x149a   :  { %v4046_v51 = vadd.f32 %v5022_v47, %v4045_v8 }
0x149c   :  { %v4054_v59 = vadd.f32 %v4046_v51, %v6930_v41 }
0x149e   :  { %v4060_v63 = vsel %vm96_vm12, %v4054_v59, 0.0 }
0x149f   :  { %4061 = vadd.xlane.f32.xlu0 %v4060_v63 }
0x14d7   :  { %v4048_v40 = vpop.f32.mrf.mxu1 }
0x14d8   :  { %v4049_v25 = vadd.f32 %v5022_v47, %v4048_v40 }
0x14da   :  { %v4055_v6 = vadd.f32 %v4049_v25, %v3891_v12 }
0x14dc   :  { %v4063_v9 = vsel %vm96_vm12, %v4055_v6, 0.0 }
0x14dd   :  { %4064 = vadd.xlane.f32.xlu2 %v4063_v9 }
0x14df   :  { %v4050_v7 = vpop.f32.mrf.mxu1 }
0x14e0   :  { %v4051_v52 = vadd.f32 %v5022_v47, %v4050_v7 }
0x14e2   :  { %v4056_v39 = vadd.f32 %v4051_v52, %v3892_v56 }
0x14e4   :  { %v4066_v11 = vsel %vm96_vm12, %v4056_v39, 0.0 }
0x14e5   :  { %4067 = vadd.xlane.f32.xlu1 %v4066_v11 }
0x150a   :  { %v4059_v62 = vpop.xlane.xlu1 %4058 }
0x150b   :  { %v4069_v38 = vmul.f32 %v4059_v62, %v6426_v29 }
0x150d   :  { %v4073_v58 = vsub.f32 %v4053_v48, %v4069_v38 }
0x150f   :  { %v4077_v41 = vmul.f32 %v4073_v58, %v4073_v58 }
0x1511   :  { %v4081_v21 = vsel %vm96_vm12, %v4077_v41, 0.0 }
0x1512   :  { %v4062_v50 = vpop.xlane.xlu0 %4061  ;;  %4082 = vadd.xlane.f32.xlu2 %v4081_v21 }
0x1513   :  { %v4070_v57 = vmul.f32 %v4062_v50, %v6426_v29 }
0x1515   :  { %v4074_v31 = vsub.f32 %v4054_v59, %v4070_v57 }
0x1517   :  { %v4078_v23 = vmul.f32 %v4074_v31, %v4074_v31 }
0x1519   :  { %v4084_v19 = vsel %vm96_vm12, %v4078_v23, 0.0 }
0x151a   :  { %4085 = vadd.xlane.f32.xlu1 %v4084_v19 }
0x1550   :  { %v4065_v61 = vpop.xlane.xlu2 %4064 }
0x1551   :  { %v4071_v22 = vmul.f32 %v4065_v61, %v6426_v29 }
0x1553   :  { %v6981_v43 = vsub.f32 %v4055_v6, %v4071_v22 }
0x1555   :  { %v4079_v1 = vmul.f32 %v6981_v43, %v6981_v43 }
0x1557   :  { %v4087_v5 = vsel %vm96_vm12, %v4079_v1, 0.0 }
0x1558   :  { %v4068_v4 = vpop.xlane.xlu1 %4067  ;;  %4088 = vadd.xlane.f32.xlu0 %v4087_v5 }
0x1559   :  { %v4072_v10 = vmul.f32 %v4068_v4, %v6426_v29 }
0x155b   :  { %v6987_v54 = vsub.f32 %v4056_v39, %v4072_v10 }
0x155d   :  { %v4080_v34 = vmul.f32 %v6987_v54, %v6987_v54 }
0x155f   :  { %v4090_v55 = vsel %vm96_vm12, %v4080_v34, 0.0 }
0x1560   :  { %4091 = vadd.xlane.f32.xlu2 %v4090_v55 }
0x1585   :  { %v4083_v18 = vpop.xlane.xlu2 %4082 }
0x1586   :  { %v4093_v15 = vmul.f32 %v4083_v18, %v6426_v29 }
0x1588   :  { %v4097_v13 = vadd.f32 1e-05, %v4093_v15 }
0x158a   :  { %5179 = vrsqrt.f32 %v4097_v13  ;;  %vm4107_vm6 = vweird.f32 %v4097_v13 }
0x158d   :  { %v4086_v14 = vpop.xlane.xlu1 %4085 }
0x158e   :  { %v4094_v12 = vmul.f32 %v4086_v14, %v6426_v29 }
0x1590   :  { %v5180_v56 = vpop.eup %5179  ;;  %v4098_v42 = vadd.f32 1e-05, %v4094_v12 }
0x1591   :  { %v4102_v49 = vmul.f32 %v5180_v56, %v4097_v13  ;;  %vm4108_vm5 = vweird.f32 %v5180_v56 }
0x1592   :  { %5181 = vrsqrt.f32 %v4098_v42  ;;  %vm4109_vm8 = vmor %vm4107_vm6, %vm4108_vm5  ;;  %vm4117_vm3 = vweird.f32 %v4098_v42 }
0x1593   :  { %v4103_v60 = vmul.f32 %v5180_v56, %v4102_v49 }
0x1595   :  { %v4104_v46 = vmul.f32 0.5, %v4103_v60 }
0x1597   :  { %v4105_v3 = vsub.f32 1.5, %v4104_v46 }
0x1598   :  { %v5182_v27 = vpop.eup %5181 }
0x1599   :  { %v4106_v36 = vmul.f32 %v5180_v56, %v4105_v3  ;;  %v4112_v17 = vmul.f32 %v5182_v27, %v4098_v42  ;;  %vm4118_vm1 = vweird.f32 %v5182_v27 }
0x159a   :  { %vm4119_vm7 = vmor %vm4117_vm3, %vm4118_vm1 }
0x159b   :  { %v4110_v26 = vsel %vm4109_vm8, %v5180_v56, %v4106_v36  ;;  %v4113_v28 = vmul.f32 %v5182_v27, %v4112_v17 }
0x159c   :  { %v4141_v44 = vmul.f32 %v4110_v26, %v4073_v58 }
0x159d   :  { %v4114_v53 = vmul.f32 0.5, %v4113_v28 }
0x159e   :  { %v4150_v16 = vmul.f32 %v5023_v45, %v4141_v44 }
0x159f   :  { %v4115_v33 = vsub.f32 1.5, %v4114_v53 }
0x15a0   :  { %v4159_v24 = vadd.f32 %v5024_v2, %v4150_v16 }
0x15a1   :  { %v4116_v35 = vmul.f32 %v5182_v27, %v4115_v33 }
0x15a2   :  { %4163 = vst.msk [vmem:[#allocation3] sm:$0xff] %vm96_vm12, %v4159_v24 }
0x15a3   :  { %v4120_v20 = vsel %vm4119_vm7, %v5182_v27, %v4116_v35 }
0x15a4   :  { %v4142_v37 = vmul.f32 %v4120_v20, %v4074_v31 }
0x15a6   :  { %v4151_v47 = vmul.f32 %v5023_v45, %v4142_v37 }
0x15a8   :  { %v4160_v32 = vadd.f32 %v5024_v2, %v4151_v47 }
0x15aa   :  { %4164 = vst.msk [vmem:[#allocation3 + $0x8] sm:$0xff] %vm96_vm12, %v4160_v32 }
0x15cb   :  { %v4089_v30 = vpop.xlane.xlu0 %4088 }
0x15cc   :  { %v4095_v48 = vmul.f32 %v4089_v30, %v6426_v29 }
0x15ce   :  { %v4099_v0 = vadd.f32 1e-05, %v4095_v48 }
0x15d0   :  { %5183 = vrsqrt.f32 %v4099_v0  ;;  %vm4127_vm10 = vweird.f32 %v4099_v0 }
0x15d3   :  { %v4092_v8 = vpop.xlane.xlu2 %4091 }
0x15d4   :  { %v4096_v51 = vmul.f32 %v4092_v8, %v6426_v29 }
0x15d6   :  { %v5184_v59 = vpop.eup %5183  ;;  %v4100_v63 = vadd.f32 1e-05, %v4096_v51 }
0x15d7   :  { %v4122_v40 = vmul.f32 %v5184_v59, %v4099_v0  ;;  %vm4128_vm9 = vweird.f32 %v5184_v59 }
0x15d8   :  { %5185 = vrsqrt.f32 %v4100_v63  ;;  %vm4129_vm11 = vmor %vm4127_vm10, %vm4128_vm9  ;;  %vm4137_vm14 = vweird.f32 %v4100_v63 }
0x15d9   :  { %v4123_v25 = vmul.f32 %v5184_v59, %v4122_v40 }
0x15db   :  { %v4124_v6 = vmul.f32 0.5, %v4123_v25 }
0x15dd   :  { %v4125_v9 = vsub.f32 1.5, %v4124_v6 }
0x15de   :  { %v5186_v7 = vpop.eup %5185 }
0x15df   :  { %v4126_v52 = vmul.f32 %v5184_v59, %v4125_v9  ;;  %v4132_v39 = vmul.f32 %v5186_v7, %v4100_v63  ;;  %vm4138_vm13 = vweird.f32 %v5186_v7 }
0x15e0   :  { %vm4139_vm15 = vmor %vm4137_vm14, %vm4138_vm13 }
0x15e1   :  { %v4130_v11 = vsel %vm4129_vm11, %v5184_v59, %v4126_v52  ;;  %v4133_v62 = vmul.f32 %v5186_v7, %v4132_v39 }
0x15e2   :  { %v4143_v38 = vmul.f32 %v4130_v11, %v6981_v43 }
0x15e3   :  { %v4134_v58 = vmul.f32 0.5, %v4133_v62 }
0x15e4   :  { %v4152_v41 = vmul.f32 %v5023_v45, %v4143_v38 }
0x15e5   :  { %v4135_v29 = vsub.f32 1.5, %v4134_v58 }
0x15e6   :  { %v4161_v21 = vadd.f32 %v5024_v2, %v4152_v41 }
0x15e7   :  { %v4136_v50 = vmul.f32 %v5186_v7, %v4135_v29 }
0x15e8   :  { %4165 = vst.msk [vmem:[#allocation3 + $0x10] sm:$0xff] %vm96_vm12, %v4161_v21 }
0x15e9   :  { %v4140_v57 = vsel %vm4139_vm15, %v5186_v7, %v4136_v50 }
0x15ea   :  { %v4144_v31 = vmul.f32 %v4140_v57, %v6987_v54 }
0x15ec   :  { %v4153_v23 = vmul.f32 %v5023_v45, %v4144_v31 }
0x15ee   :  { %v4162_v19 = vadd.f32 %v5024_v2, %v4153_v23 }
0x15ef   :  { %v4167_v61 = vld [vmem:[#allocation3] ss:$16 sm:$0x3] }
0x15f0   :  { %4166 = vst.msk [vmem:[#allocation3 + $0x18] sm:$0xff] %vm96_vm12, %v4162_v19 }
0x15f1   :  { %4169 = vst.msk [vmem:[#allocation4] sm:$0x3] %vm4168_vm0, %v4167_v61 }
0x15f2   :  { %4180 = dma.vmem_to_hbm [thread:$0]  %s4176_s23, 32, %s4178_s6, [#allocation5]  }
0x15f3   :  { %5235 = dma.done.wait [#allocation5], 32  }
0x15f4   :  { %5236 = vsyncadd [#allocation5], 4294967264 }
0x15f5   :  { %4185 = vsyncpa [#allocation5], 1 }

</bundles_post_ra>
